<compile_context>
chip_gen: v7x
topology: tpu7x:2x2x1
jax: 0.10.0
libtpu: 0.0.40
codegen_flags: <defaults>
</compile_context>

<pallas_src>
import math

import jax
import jax.numpy as jnp
from jax.experimental import pallas as pl
from jax.experimental.pallas import tpu as pltpu

_TB_MAX = 512  # batch tile; sized for v7x's 64 MiB VMEM with lots of headroom


def _round_up(n, m):
    return ((n + m - 1) // m) * m


def _hand_sign_kernel(x0_ref, x1_ref, w1_ref, b1_ref, w2_ref, b2_ref,
                      w3_ref, b3_ref, w4_ref, b4_ref, w5_ref, b5_ref,
                      w6_ref, b6_ref, o_ref):
    f32, bf16 = jnp.float32, jnp.bfloat16
    tb = o_ref.shape[0]

    # Hoisted loads + broadcasts (JAX does not CSE broadcast_in_dim; keep them
    # out of the unrolled 21-iteration landmark loop).
    w1r0 = jnp.broadcast_to(w1_ref[0:1, :], (tb, 256))
    w1r1 = jnp.broadcast_to(w1_ref[1:2, :], (tb, 256))
    b1_b = jnp.broadcast_to(b1_ref[...], (tb, 256))
    b2_b = jnp.broadcast_to(b2_ref[...], (tb, 128))
    b3_b = jnp.broadcast_to(b3_ref[...], (tb, 128))
    w2_v = w2_ref[...]          # (256, 128) bf16
    w3_v = w3_ref[...]          # (128, 128) bf16

    # block2 layer-4 accumulator: sum over landmarks of (tb,128)@(128,256).
    acc = jnp.zeros((tb, 256), dtype=f32)

    for n in range(21):                       # unrolled, static trip count
        x0 = x0_ref[n]                        # (tb, 1) f32
        x1 = x1_ref[n]                        # (tb, 1) f32
        # Linear(2,256) on the VPU (a K=2 MXU matmul would waste the array) + ReLU
        h = jnp.maximum(x0 * w1r0 + x1 * w1r1 + b1_b, 0.0)          # (tb, 256)
        # Linear(256,128) + ReLU
        h = jnp.maximum(
            jnp.dot(h.astype(bf16), w2_v, preferred_element_type=f32) + b2_b,
            0.0)                                                     # (tb, 128)
        # Linear(128,128)
        h = jnp.dot(h.astype(bf16), w3_v, preferred_element_type=f32) + b3_b
        # block2 Linear(2688,256): per-landmark K=128 partial contraction
        acc = acc + jnp.dot(h.astype(bf16), w4_ref[n],
                            preferred_element_type=f32)              # (tb, 256)

    h = jnp.maximum(acc + b4_ref[...], 0.0)                          # (tb, 256)
    h = jnp.maximum(
        jnp.dot(h.astype(bf16), w5_ref[...], preferred_element_type=f32)
        + b5_ref[...], 0.0)                                          # (tb, 128)
    o_ref[...] = (
        jnp.dot(h.astype(bf16), w6_ref[...], preferred_element_type=f32)
        + b6_ref[...])                                               # (tb, out_pad)


def init_params(key, output_size):
    """PyTorch-Linear-like init. Weights stored (in_features, out_features)."""
    layer_dims = [
        (2, 256), (256, 128), (128, 128),            # block
        (2688, 256), (256, 128), (128, output_size)  # block2
    ]
    params = []
    for (din, dout) in layer_dims:
        key, kw, kb = jax.random.split(key, 3)
        bound = 1.0 / math.sqrt(din)
        w = jax.random.uniform(kw, (din, dout), jnp.float32, -bound, bound)
        b = jax.random.uniform(kb, (1, dout), jnp.float32, -bound, bound)
        params.append((w, b))
    return params


def hand_sign_classifier(x, params, output_size):
    """Forward pass. x: (B, 21, 2) float32 -> logits (B, output_size)."""
    (w1, b1), (w2, b2), (w3, b3), (w4, b4), (w5, b5), (w6, b6) = params
    B, N, C = x.shape
    assert (N, C) == (21, 2), (N, C)

    bf16 = jnp.bfloat16
    # Kernel-ready weights: bf16 MXU operands, reshaped / lane-padded.
    w2b, w3b, w5b = w2.astype(bf16), w3.astype(bf16), w5.astype(bf16)
    w4r = w4.reshape(21, 128, 256).astype(bf16)   # matches torch .view(B,-1) order
    out_pad = _round_up(output_size, 128)
    w6p = jnp.zeros((128, out_pad), bf16).at[:, :output_size].set(w6.astype(bf16))
    b6p = jnp.zeros((1, out_pad), jnp.float32).at[:, :output_size].set(b6)

    # Batch tiling / padding (multiple of 8 sublanes).
    TB = _TB_MAX if B >= _TB_MAX else _round_up(B, 8)
    B_pad = _round_up(B, TB)

    # Layout plumbing (host side): landmark axis outermost, xy coords split so
    # the kernel never slices a lane-sparse (rows, 2) operand.
    xt = jnp.transpose(x, (1, 0, 2))                      # (21, B, 2)
    if B_pad != B:
        xt = jnp.pad(xt, ((0, 0), (0, B_pad - B), (0, 0)))
    x0 = xt[:, :, 0:1]                                    # (21, B_pad, 1)
    x1 = xt[:, :, 1:2]                                    # (21, B_pad, 1)

    grid = (B_pad // TB,)
    const2 = lambda b: (0, 0)
    const3 = lambda b: (0, 0, 0)
    in_specs = [
        pl.BlockSpec((21, TB, 1), lambda b: (0, b, 0)),   # x0
        pl.BlockSpec((21, TB, 1), lambda b: (0, b, 0)),   # x1
        pl.BlockSpec((2, 256), const2),                   # w1 (f32, VPU path)
        pl.BlockSpec((1, 256), const2),                   # b1
        pl.BlockSpec((256, 128), const2),                 # w2 bf16
        pl.BlockSpec((1, 128), const2),                   # b2
        pl.BlockSpec((128, 128), const2),                 # w3 bf16
        pl.BlockSpec((1, 128), const2),                   # b3
        pl.BlockSpec((21, 128, 256), const3),             # w4 reshaped bf16
        pl.BlockSpec((1, 256), const2),                   # b4
        pl.BlockSpec((256, 128), const2),                 # w5 bf16
        pl.BlockSpec((1, 128), const2),                   # b5
        pl.BlockSpec((128, out_pad), const2),             # w6 padded bf16
        pl.BlockSpec((1, out_pad), const2),               # b6 padded
    ]

    out = pl.pallas_call(
        _hand_sign_kernel,
        out_shape=jax.ShapeDtypeStruct((B_pad, out_pad), jnp.float32),
        grid=grid,
        in_specs=in_specs,
        out_specs=pl.BlockSpec((TB, out_pad), lambda b: (b, 0)),
        compiler_params=pltpu.CompilerParams(
            dimension_semantics=("parallel",),
            vmem_limit_bytes=48 * 1024 * 1024),
    )(x0, x1, w1, b1, w2b, b2, w3b, b3, w4r, b4, w5b, b5, w6p, b6p)

    return out[:B, :output_size]


def _reference(x, params):
    """Plain-JAX reference with the same bf16-weight / f32-accumulate numerics."""
    (w1, b1), (w2, b2), (w3, b3), (w4, b4), (w5, b5), (w6, b6) = params
    B = x.shape[0]
    bf16, f32 = jnp.bfloat16, jnp.float32

    def mm(h, w):
        return jnp.dot(h.astype(bf16), w.astype(bf16), preferred_element_type=f32)

    # Layer 1 as explicit f32 FMA (matches the kernel's VPU formulation).
    h = jnp.maximum(x[..., 0:1] * w1[0] + x[..., 1:2] * w1[1] + b1, 0.0)  # (B,21,256)
    h = jnp.maximum(mm(h, w2) + b2, 0.0)        # (B,21,128)
    h = mm(h, w3) + b3                          # (B,21,128)
    h = h.reshape(B, -1)                        # (B, 2688) — torch .view(B, -1)
    h = jnp.maximum(mm(h, w4) + b4, 0.0)
    h = jnp.maximum(mm(h, w5) + b5, 0.0)
    return mm(h, w6) + b6


# TODO(synk): HandSignClassifier.predict() (HandPoints preprocessing + argmax) is
# host-side glue outside the forward pass and is not implemented as a kernel.

if __name__ == "__main__":
    output_size = 10
    key = jax.random.PRNGKey(0)
    k_param, k_x = jax.random.split(key)

    params = init_params(k_param, output_size)
    # 21 hand landmarks x (x, y) coords — forced by the 2688 = 21*128 flatten.
    x = jax.random.normal(k_x, (2, 21, 2), dtype=jnp.float32)

    logits = jax.block_until_ready(hand_sign_classifier(x, params, output_size))
    ref = jax.block_until_ready(_reference(x, params))

    assert logits.shape == (2, output_size), logits.shape
    assert jnp.allclose(logits, ref, atol=1e-3, rtol=1e-3), float(
        jnp.max(jnp.abs(logits - ref)))
    print("KERNEL_OK")
</pallas_src>

<mosaic_0001>
module attributes {stable_mosaic.version = 11 : i64} {
  func.func @_hand_sign_kernel(%arg0: i32, %arg1: memref<21x8x1xf32, #tpu.memory_space<vmem>>, %arg2: memref<21x8x1xf32, #tpu.memory_space<vmem>>, %arg3: memref<2x256xf32, #tpu.memory_space<vmem>>, %arg4: memref<1x256xf32, #tpu.memory_space<vmem>>, %arg5: memref<256x128xbf16, #tpu.memory_space<vmem>>, %arg6: memref<1x128xf32, #tpu.memory_space<vmem>>, %arg7: memref<128x128xbf16, #tpu.memory_space<vmem>>, %arg8: memref<1x128xf32, #tpu.memory_space<vmem>>, %arg9: memref<21x128x256xbf16, #tpu.memory_space<vmem>>, %arg10: memref<1x256xf32, #tpu.memory_space<vmem>>, %arg11: memref<256x128xbf16, #tpu.memory_space<vmem>>, %arg12: memref<1x128xf32, #tpu.memory_space<vmem>>, %arg13: memref<128x128xbf16, #tpu.memory_space<vmem>>, %arg14: memref<1x128xf32, #tpu.memory_space<vmem>>, %arg15: memref<8x128xf32, #tpu.memory_space<vmem>>) attributes {dimension_semantics = [#tpu.dimension_semantics<parallel>], iteration_bounds = array<i64: 1>, scalar_prefetch = 0 : i64, scratch_operands = 0 : i64, tpu.core_type = #tpu.core_type<tc>, window_params = [{transform_indices = @transform_0, window_bounds = array<i64: 21, 8, 1>}, {transform_indices = @transform_1, window_bounds = array<i64: 21, 8, 1>}, {pipeline_mode = #tpu.pipeline_mode<synchronous>, transform_indices = @transform_2, window_bounds = array<i64: 2, 256>}, {pipeline_mode = #tpu.pipeline_mode<synchronous>, transform_indices = @transform_3, window_bounds = array<i64: 1, 256>}, {pipeline_mode = #tpu.pipeline_mode<synchronous>, transform_indices = @transform_4, window_bounds = array<i64: 256, 128>}, {pipeline_mode = #tpu.pipeline_mode<synchronous>, transform_indices = @transform_5, window_bounds = array<i64: 1, 128>}, {pipeline_mode = #tpu.pipeline_mode<synchronous>, transform_indices = @transform_6, window_bounds = array<i64: 128, 128>}, {pipeline_mode = #tpu.pipeline_mode<synchronous>, transform_indices = @transform_7, window_bounds = array<i64: 1, 128>}, {pipeline_mode = #tpu.pipeline_mode<synchronous>, transform_indices = @transform_8, window_bounds = array<i64: 21, 128, 256>}, {pipeline_mode = #tpu.pipeline_mode<synchronous>, transform_indices = @transform_9, window_bounds = array<i64: 1, 256>}, {pipeline_mode = #tpu.pipeline_mode<synchronous>, transform_indices = @transform_10, window_bounds = array<i64: 256, 128>}, {pipeline_mode = #tpu.pipeline_mode<synchronous>, transform_indices = @transform_11, window_bounds = array<i64: 1, 128>}, {pipeline_mode = #tpu.pipeline_mode<synchronous>, transform_indices = @transform_12, window_bounds = array<i64: 128, 128>}, {pipeline_mode = #tpu.pipeline_mode<synchronous>, transform_indices = @transform_13, window_bounds = array<i64: 1, 128>}, {transform_indices = @transform_14, window_bounds = array<i64: 8, 128>}]} {
    %c0 = arith.constant 0 : index
    %c0_0 = arith.constant 0 : index
    %0 = vector.load %arg3[%c0, %c0_0] : memref<2x256xf32, #tpu.memory_space<vmem>>, vector<1x256xf32>
    %1 = vector.shape_cast %0 : vector<1x256xf32> to vector<1x256xf32>
    %2 = vector.broadcast %1 : vector<1x256xf32> to vector<8x256xf32>
    %c1 = arith.constant 1 : index
    %c0_1 = arith.constant 0 : index
    %3 = vector.load %arg3[%c1, %c0_1] : memref<2x256xf32, #tpu.memory_space<vmem>>, vector<1x256xf32>
    %4 = vector.shape_cast %3 : vector<1x256xf32> to vector<1x256xf32>
    %5 = vector.broadcast %4 : vector<1x256xf32> to vector<8x256xf32>
    %c0_2 = arith.constant 0 : index
    %c0_3 = arith.constant 0 : index
    %6 = vector.load %arg4[%c0_2, %c0_3] : memref<1x256xf32, #tpu.memory_space<vmem>>, vector<1x256xf32>
    %7 = vector.shape_cast %6 : vector<1x256xf32> to vector<1x256xf32>
    %8 = vector.broadcast %7 : vector<1x256xf32> to vector<8x256xf32>
    %c0_4 = arith.constant 0 : index
    %c0_5 = arith.constant 0 : index
    %9 = vector.load %arg6[%c0_4, %c0_5] : memref<1x128xf32, #tpu.memory_space<vmem>>, vector<1x128xf32>
    %10 = vector.shape_cast %9 : vector<1x128xf32> to vector<1x128xf32>
    %11 = vector.broadcast %10 : vector<1x128xf32> to vector<8x128xf32>
    %c0_6 = arith.constant 0 : index
    %c0_7 = arith.constant 0 : index
    %12 = vector.load %arg8[%c0_6, %c0_7] : memref<1x128xf32, #tpu.memory_space<vmem>>, vector<1x128xf32>
    %13 = vector.shape_cast %12 : vector<1x128xf32> to vector<1x128xf32>
    %14 = vector.broadcast %13 : vector<1x128xf32> to vector<8x128xf32>
    %c0_8 = arith.constant 0 : index
    %c0_9 = arith.constant 0 : index
    %15 = vector.load %arg5[%c0_8, %c0_9] : memref<256x128xbf16, #tpu.memory_space<vmem>>, vector<256x128xbf16>
    %c0_10 = arith.constant 0 : index
    %c0_11 = arith.constant 0 : index
    %16 = vector.load %arg7[%c0_10, %c0_11] : memref<128x128xbf16, #tpu.memory_space<vmem>>, vector<128x128xbf16>
    %cst = arith.constant 0.000000e+00 : f32
    %17 = vector.broadcast %cst : f32 to vector<8x256xf32>
    %c0_12 = arith.constant 0 : index
    %c0_13 = arith.constant 0 : index
    %c0_14 = arith.constant 0 : index
    %18 = vector.load %arg1[%c0_12, %c0_13, %c0_14] : memref<21x8x1xf32, #tpu.memory_space<vmem>>, vector<1x8x1xf32>
    %19 = vector.shape_cast %18 : vector<1x8x1xf32> to vector<8x1xf32>
    %c0_15 = arith.constant 0 : index
    %c0_16 = arith.constant 0 : index
    %c0_17 = arith.constant 0 : index
    %20 = vector.load %arg2[%c0_15, %c0_16, %c0_17] : memref<21x8x1xf32, #tpu.memory_space<vmem>>, vector<1x8x1xf32>
    %21 = vector.shape_cast %20 : vector<1x8x1xf32> to vector<8x1xf32>
    %22 = vector.broadcast %19 : vector<8x1xf32> to vector<8x256xf32>
    %23 = arith.mulf %22, %2 : vector<8x256xf32>
    %24 = vector.broadcast %21 : vector<8x1xf32> to vector<8x256xf32>
    %25 = arith.mulf %24, %5 : vector<8x256xf32>
    %26 = arith.addf %23, %25 : vector<8x256xf32>
    %27 = arith.addf %26, %8 : vector<8x256xf32>
    %cst_18 = arith.constant 0.000000e+00 : f32
    %28 = vector.broadcast %cst_18 : f32 to vector<8x256xf32>
    %29 = arith.maximumf %27, %28 : vector<8x256xf32>
    %30 = arith.truncf %29 : vector<8x256xf32> to vector<8x256xbf16>
    %cst_19 = arith.constant dense<0.000000e+00> : vector<8x128xf32>
    %31 = tpu.matmul %30, %15, %cst_19 {dimension_numbers = #tpu.dot_dimension_numbers<[1], [0], [0], [1], [0, 0, 1, 1], [], []>} : vector<8x256xbf16>, vector<256x128xbf16>, vector<8x128xf32> -> vector<8x128xf32>
    %32 = arith.addf %31, %11 : vector<8x128xf32>
    %cst_20 = arith.constant 0.000000e+00 : f32
    %33 = vector.broadcast %cst_20 : f32 to vector<8x128xf32>
    %34 = arith.maximumf %32, %33 : vector<8x128xf32>
    %35 = arith.truncf %34 : vector<8x128xf32> to vector<8x128xbf16>
    %cst_21 = arith.constant dense<0.000000e+00> : vector<8x128xf32>
    %36 = tpu.matmul %35, %16, %cst_21 {dimension_numbers = #tpu.dot_dimension_numbers<[1], [0], [0], [1], [0, 0, 1, 1], [], []>} : vector<8x128xbf16>, vector<128x128xbf16>, vector<8x128xf32> -> vector<8x128xf32>
    %37 = arith.addf %36, %14 : vector<8x128xf32>
    %38 = arith.truncf %37 : vector<8x128xf32> to vector<8x128xbf16>
    %c0_22 = arith.constant 0 : index
    %c0_23 = arith.constant 0 : index
    %c0_24 = arith.constant 0 : index
    %39 = vector.load %arg9[%c0_22, %c0_23, %c0_24] : memref<21x128x256xbf16, #tpu.memory_space<vmem>>, vector<1x128x256xbf16>
    %40 = vector.shape_cast %39 : vector<1x128x256xbf16> to vector<128x256xbf16>
    %cst_25 = arith.constant dense<0.000000e+00> : vector<8x256xf32>
    %41 = tpu.matmul %38, %40, %cst_25 {dimension_numbers = #tpu.dot_dimension_numbers<[1], [0], [0], [1], [0, 0, 1, 1], [], []>} : vector<8x128xbf16>, vector<128x256xbf16>, vector<8x256xf32> -> vector<8x256xf32>
    %42 = arith.addf %17, %41 : vector<8x256xf32>
    %c1_26 = arith.constant 1 : index
    %c0_27 = arith.constant 0 : index
    %c0_28 = arith.constant 0 : index
    %43 = vector.load %arg1[%c1_26, %c0_27, %c0_28] : memref<21x8x1xf32, #tpu.memory_space<vmem>>, vector<1x8x1xf32>
    %44 = vector.shape_cast %43 : vector<1x8x1xf32> to vector<8x1xf32>
    %c1_29 = arith.constant 1 : index
    %c0_30 = arith.constant 0 : index
    %c0_31 = arith.constant 0 : index
    %45 = vector.load %arg2[%c1_29, %c0_30, %c0_31] : memref<21x8x1xf32, #tpu.memory_space<vmem>>, vector<1x8x1xf32>
    %46 = vector.shape_cast %45 : vector<1x8x1xf32> to vector<8x1xf32>
    %47 = vector.broadcast %44 : vector<8x1xf32> to vector<8x256xf32>
    %48 = arith.mulf %47, %2 : vector<8x256xf32>
    %49 = vector.broadcast %46 : vector<8x1xf32> to vector<8x256xf32>
    %50 = arith.mulf %49, %5 : vector<8x256xf32>
    %51 = arith.addf %48, %50 : vector<8x256xf32>
    %52 = arith.addf %51, %8 : vector<8x256xf32>
    %cst_32 = arith.constant 0.000000e+00 : f32
    %53 = vector.broadcast %cst_32 : f32 to vector<8x256xf32>
    %54 = arith.maximumf %52, %53 : vector<8x256xf32>
    %55 = arith.truncf %54 : vector<8x256xf32> to vector<8x256xbf16>
    %cst_33 = arith.constant dense<0.000000e+00> : vector<8x128xf32>
    %56 = tpu.matmul %55, %15, %cst_33 {dimension_numbers = #tpu.dot_dimension_numbers<[1], [0], [0], [1], [0, 0, 1, 1], [], []>} : vector<8x256xbf16>, vector<256x128xbf16>, vector<8x128xf32> -> vector<8x128xf32>
    %57 = arith.addf %56, %11 : vector<8x128xf32>
    %cst_34 = arith.constant 0.000000e+00 : f32
    %58 = vector.broadcast %cst_34 : f32 to vector<8x128xf32>
    %59 = arith.maximumf %57, %58 : vector<8x128xf32>
    %60 = arith.truncf %59 : vector<8x128xf32> to vector<8x128xbf16>
    %cst_35 = arith.constant dense<0.000000e+00> : vector<8x128xf32>
    %61 = tpu.matmul %60, %16, %cst_35 {dimension_numbers = #tpu.dot_dimension_numbers<[1], [0], [0], [1], [0, 0, 1, 1], [], []>} : vector<8x128xbf16>, vector<128x128xbf16>, vector<8x128xf32> -> vector<8x128xf32>
    %62 = arith.addf %61, %14 : vector<8x128xf32>
    %63 = arith.truncf %62 : vector<8x128xf32> to vector<8x128xbf16>
    %c1_36 = arith.constant 1 : index
    %c0_37 = arith.constant 0 : index
    %c0_38 = arith.constant 0 : index
    %64 = vector.load %arg9[%c1_36, %c0_37, %c0_38] : memref<21x128x256xbf16, #tpu.memory_space<vmem>>, vector<1x128x256xbf16>
    %65 = vector.shape_cast %64 : vector<1x128x256xbf16> to vector<128x256xbf16>
    %cst_39 = arith.constant dense<0.000000e+00> : vector<8x256xf32>
    %66 = tpu.matmul %63, %65, %cst_39 {dimension_numbers = #tpu.dot_dimension_numbers<[1], [0], [0], [1], [0, 0, 1, 1], [], []>} : vector<8x128xbf16>, vector<128x256xbf16>, vector<8x256xf32> -> vector<8x256xf32>
    %67 = arith.addf %42, %66 : vector<8x256xf32>
    %c2 = arith.constant 2 : index
    %c0_40 = arith.constant 0 : index
    %c0_41 = arith.constant 0 : index
    %68 = vector.load %arg1[%c2, %c0_40, %c0_41] : memref<21x8x1xf32, #tpu.memory_space<vmem>>, vector<1x8x1xf32>
    %69 = vector.shape_cast %68 : vector<1x8x1xf32> to vector<8x1xf32>
    %c2_42 = arith.constant 2 : index
    %c0_43 = arith.constant 0 : index
    %c0_44 = arith.constant 0 : index
    %70 = vector.load %arg2[%c2_42, %c0_43, %c0_44] : memref<21x8x1xf32, #tpu.memory_space<vmem>>, vector<1x8x1xf32>
    %71 = vector.shape_cast %70 : vector<1x8x1xf32> to vector<8x1xf32>
    %72 = vector.broadcast %69 : vector<8x1xf32> to vector<8x256xf32>
    %73 = arith.mulf %72, %2 : vector<8x256xf32>
    %74 = vector.broadcast %71 : vector<8x1xf32> to vector<8x256xf32>
    %75 = arith.mulf %74, %5 : vector<8x256xf32>
    %76 = arith.addf %73, %75 : vector<8x256xf32>
    %77 = arith.addf %76, %8 : vector<8x256xf32>
    %cst_45 = arith.constant 0.000000e+00 : f32
    %78 = vector.broadcast %cst_45 : f32 to vector<8x256xf32>
    %79 = arith.maximumf %77, %78 : vector<8x256xf32>
    %80 = arith.truncf %79 : vector<8x256xf32> to vector<8x256xbf16>
    %cst_46 = arith.constant dense<0.000000e+00> : vector<8x128xf32>
    %81 = tpu.matmul %80, %15, %cst_46 {dimension_numbers = #tpu.dot_dimension_numbers<[1], [0], [0], [1], [0, 0, 1, 1], [], []>} : vector<8x256xbf16>, vector<256x128xbf16>, vector<8x128xf32> -> vector<8x128xf32>
    %82 = arith.addf %81, %11 : vector<8x128xf32>
    %cst_47 = arith.constant 0.000000e+00 : f32
    %83 = vector.broadcast %cst_47 : f32 to vector<8x128xf32>
    %84 = arith.maximumf %82, %83 : vector<8x128xf32>
    %85 = arith.truncf %84 : vector<8x128xf32> to vector<8x128xbf16>
    %cst_48 = arith.constant dense<0.000000e+00> : vector<8x128xf32>
    %86 = tpu.matmul %85, %16, %cst_48 {dimension_numbers = #tpu.dot_dimension_numbers<[1], [0], [0], [1], [0, 0, 1, 1], [], []>} : vector<8x128xbf16>, vector<128x128xbf16>, vector<8x128xf32> -> vector<8x128xf32>
    %87 = arith.addf %86, %14 : vector<8x128xf32>
    %88 = arith.truncf %87 : vector<8x128xf32> to vector<8x128xbf16>
    %c2_49 = arith.constant 2 : index
    %c0_50 = arith.constant 0 : index
    %c0_51 = arith.constant 0 : index
    %89 = vector.load %arg9[%c2_49, %c0_50, %c0_51] : memref<21x128x256xbf16, #tpu.memory_space<vmem>>, vector<1x128x256xbf16>
    %90 = vector.shape_cast %89 : vector<1x128x256xbf16> to vector<128x256xbf16>
    %cst_52 = arith.constant dense<0.000000e+00> : vector<8x256xf32>
    %91 = tpu.matmul %88, %90, %cst_52 {dimension_numbers = #tpu.dot_dimension_numbers<[1], [0], [0], [1], [0, 0, 1, 1], [], []>} : vector<8x128xbf16>, vector<128x256xbf16>, vector<8x256xf32> -> vector<8x256xf32>
    %92 = arith.addf %67, %91 : vector<8x256xf32>
    %c3 = arith.constant 3 : index
    %c0_53 = arith.constant 0 : index
    %c0_54 = arith.constant 0 : index
    %93 = vector.load %arg1[%c3, %c0_53, %c0_54] : memref<21x8x1xf32, #tpu.memory_space<vmem>>, vector<1x8x1xf32>
    %94 = vector.shape_cast %93 : vector<1x8x1xf32> to vector<8x1xf32>
    %c3_55 = arith.constant 3 : index
    %c0_56 = arith.constant 0 : index
    %c0_57 = arith.constant 0 : index
    %95 = vector.load %arg2[%c3_55, %c0_56, %c0_57] : memref<21x8x1xf32, #tpu.memory_space<vmem>>, vector<1x8x1xf32>
    %96 = vector.shape_cast %95 : vector<1x8x1xf32> to vector<8x1xf32>
    %97 = vector.broadcast %94 : vector<8x1xf32> to vector<8x256xf32>
    %98 = arith.mulf %97, %2 : vector<8x256xf32>
    %99 = vector.broadcast %96 : vector<8x1xf32> to vector<8x256xf32>
    %100 = arith.mulf %99, %5 : vector<8x256xf32>
    %101 = arith.addf %98, %100 : vector<8x256xf32>
    %102 = arith.addf %101, %8 : vector<8x256xf32>
    %cst_58 = arith.constant 0.000000e+00 : f32
    %103 = vector.broadcast %cst_58 : f32 to vector<8x256xf32>
    %104 = arith.maximumf %102, %103 : vector<8x256xf32>
    %105 = arith.truncf %104 : vector<8x256xf32> to vector<8x256xbf16>
    %cst_59 = arith.constant dense<0.000000e+00> : vector<8x128xf32>
    %106 = tpu.matmul %105, %15, %cst_59 {dimension_numbers = #tpu.dot_dimension_numbers<[1], [0], [0], [1], [0, 0, 1, 1], [], []>} : vector<8x256xbf16>, vector<256x128xbf16>, vector<8x128xf32> -> vector<8x128xf32>
    %107 = arith.addf %106, %11 : vector<8x128xf32>
    %cst_60 = arith.constant 0.000000e+00 : f32
    %108 = vector.broadcast %cst_60 : f32 to vector<8x128xf32>
    %109 = arith.maximumf %107, %108 : vector<8x128xf32>
    %110 = arith.truncf %109 : vector<8x128xf32> to vector<8x128xbf16>
    %cst_61 = arith.constant dense<0.000000e+00> : vector<8x128xf32>
    %111 = tpu.matmul %110, %16, %cst_61 {dimension_numbers = #tpu.dot_dimension_numbers<[1], [0], [0], [1], [0, 0, 1, 1], [], []>} : vector<8x128xbf16>, vector<128x128xbf16>, vector<8x128xf32> -> vector<8x128xf32>
    %112 = arith.addf %111, %14 : vector<8x128xf32>
    %113 = arith.truncf %112 : vector<8x128xf32> to vector<8x128xbf16>
    %c3_62 = arith.constant 3 : index
    %c0_63 = arith.constant 0 : index
    %c0_64 = arith.constant 0 : index
    %114 = vector.load %arg9[%c3_62, %c0_63, %c0_64] : memref<21x128x256xbf16, #tpu.memory_space<vmem>>, vector<1x128x256xbf16>
    %115 = vector.shape_cast %114 : vector<1x128x256xbf16> to vector<128x256xbf16>
    %cst_65 = arith.constant dense<0.000000e+00> : vector<8x256xf32>
    %116 = tpu.matmul %113, %115, %cst_65 {dimension_numbers = #tpu.dot_dimension_numbers<[1], [0], [0], [1], [0, 0, 1, 1], [], []>} : vector<8x128xbf16>, vector<128x256xbf16>, vector<8x256xf32> -> vector<8x256xf32>
    %117 = arith.addf %92, %116 : vector<8x256xf32>
    %c4 = arith.constant 4 : index
    %c0_66 = arith.constant 0 : index
    %c0_67 = arith.constant 0 : index
    %118 = vector.load %arg1[%c4, %c0_66, %c0_67] : memref<21x8x1xf32, #tpu.memory_space<vmem>>, vector<1x8x1xf32>
    %119 = vector.shape_cast %118 : vector<1x8x1xf32> to vector<8x1xf32>
    %c4_68 = arith.constant 4 : index
    %c0_69 = arith.constant 0 : index
    %c0_70 = arith.constant 0 : index
    %120 = vector.load %arg2[%c4_68, %c0_69, %c0_70] : memref<21x8x1xf32, #tpu.memory_space<vmem>>, vector<1x8x1xf32>
    %121 = vector.shape_cast %120 : vector<1x8x1xf32> to vector<8x1xf32>
    %122 = vector.broadcast %119 : vector<8x1xf32> to vector<8x256xf32>
    %123 = arith.mulf %122, %2 : vector<8x256xf32>
    %124 = vector.broadcast %121 : vector<8x1xf32> to vector<8x256xf32>
    %125 = arith.mulf %124, %5 : vector<8x256xf32>
    %126 = arith.addf %123, %125 : vector<8x256xf32>
    %127 = arith.addf %126, %8 : vector<8x256xf32>
    %cst_71 = arith.constant 0.000000e+00 : f32
    %128 = vector.broadcast %cst_71 : f32 to vector<8x256xf32>
    %129 = arith.maximumf %127, %128 : vector<8x256xf32>
    %130 = arith.truncf %129 : vector<8x256xf32> to vector<8x256xbf16>
    %cst_72 = arith.constant dense<0.000000e+00> : vector<8x128xf32>
    %131 = tpu.matmul %130, %15, %cst_72 {dimension_numbers = #tpu.dot_dimension_numbers<[1], [0], [0], [1], [0, 0, 1, 1], [], []>} : vector<8x256xbf16>, vector<256x128xbf16>, vector<8x128xf32> -> vector<8x128xf32>
    %132 = arith.addf %131, %11 : vector<8x128xf32>
    %cst_73 = arith.constant 0.000000e+00 : f32
    %133 = vector.broadcast %cst_73 : f32 to vector<8x128xf32>
    %134 = arith.maximumf %132, %133 : vector<8x128xf32>
    %135 = arith.truncf %134 : vector<8x128xf32> to vector<8x128xbf16>
    %cst_74 = arith.constant dense<0.000000e+00> : vector<8x128xf32>
    %136 = tpu.matmul %135, %16, %cst_74 {dimension_numbers = #tpu.dot_dimension_numbers<[1], [0], [0], [1], [0, 0, 1, 1], [], []>} : vector<8x128xbf16>, vector<128x128xbf16>, vector<8x128xf32> -> vector<8x128xf32>
    %137 = arith.addf %136, %14 : vector<8x128xf32>
    %138 = arith.truncf %137 : vector<8x128xf32> to vector<8x128xbf16>
    %c4_75 = arith.constant 4 : index
    %c0_76 = arith.constant 0 : index
    %c0_77 = arith.constant 0 : index
    %139 = vector.load %arg9[%c4_75, %c0_76, %c0_77] : memref<21x128x256xbf16, #tpu.memory_space<vmem>>, vector<1x128x256xbf16>
    %140 = vector.shape_cast %139 : vector<1x128x256xbf16> to vector<128x256xbf16>
    %cst_78 = arith.constant dense<0.000000e+00> : vector<8x256xf32>
    %141 = tpu.matmul %138, %140, %cst_78 {dimension_numbers = #tpu.dot_dimension_numbers<[1], [0], [0], [1], [0, 0, 1, 1], [], []>} : vector<8x128xbf16>, vector<128x256xbf16>, vector<8x256xf32> -> vector<8x256xf32>
    %142 = arith.addf %117, %141 : vector<8x256xf32>
    %c5 = arith.constant 5 : index
    %c0_79 = arith.constant 0 : index
    %c0_80 = arith.constant 0 : index
    %143 = vector.load %arg1[%c5, %c0_79, %c0_80] : memref<21x8x1xf32, #tpu.memory_space<vmem>>, vector<1x8x1xf32>
    %144 = vector.shape_cast %143 : vector<1x8x1xf32> to vector<8x1xf32>
    %c5_81 = arith.constant 5 : index
    %c0_82 = arith.constant 0 : index
    %c0_83 = arith.constant 0 : index
    %145 = vector.load %arg2[%c5_81, %c0_82, %c0_83] : memref<21x8x1xf32, #tpu.memory_space<vmem>>, vector<1x8x1xf32>
    %146 = vector.shape_cast %145 : vector<1x8x1xf32> to vector<8x1xf32>
    %147 = vector.broadcast %144 : vector<8x1xf32> to vector<8x256xf32>
    %148 = arith.mulf %147, %2 : vector<8x256xf32>
    %149 = vector.broadcast %146 : vector<8x1xf32> to vector<8x256xf32>
    %150 = arith.mulf %149, %5 : vector<8x256xf32>
    %151 = arith.addf %148, %150 : vector<8x256xf32>
    %152 = arith.addf %151, %8 : vector<8x256xf32>
    %cst_84 = arith.constant 0.000000e+00 : f32
    %153 = vector.broadcast %cst_84 : f32 to vector<8x256xf32>
    %154 = arith.maximumf %152, %153 : vector<8x256xf32>
    %155 = arith.truncf %154 : vector<8x256xf32> to vector<8x256xbf16>
    %cst_85 = arith.constant dense<0.000000e+00> : vector<8x128xf32>
    %156 = tpu.matmul %155, %15, %cst_85 {dimension_numbers = #tpu.dot_dimension_numbers<[1], [0], [0], [1], [0, 0, 1, 1], [], []>} : vector<8x256xbf16>, vector<256x128xbf16>, vector<8x128xf32> -> vector<8x128xf32>
    %157 = arith.addf %156, %11 : vector<8x128xf32>
    %cst_86 = arith.constant 0.000000e+00 : f32
    %158 = vector.broadcast %cst_86 : f32 to vector<8x128xf32>
    %159 = arith.maximumf %157, %158 : vector<8x128xf32>
    %160 = arith.truncf %159 : vector<8x128xf32> to vector<8x128xbf16>
    %cst_87 = arith.constant dense<0.000000e+00> : vector<8x128xf32>
    %161 = tpu.matmul %160, %16, %cst_87 {dimension_numbers = #tpu.dot_dimension_numbers<[1], [0], [0], [1], [0, 0, 1, 1], [], []>} : vector<8x128xbf16>, vector<128x128xbf16>, vector<8x128xf32> -> vector<8x128xf32>
    %162 = arith.addf %161, %14 : vector<8x128xf32>
    %163 = arith.truncf %162 : vector<8x128xf32> to vector<8x128xbf16>
    %c5_88 = arith.constant 5 : index
    %c0_89 = arith.constant 0 : index
    %c0_90 = arith.constant 0 : index
    %164 = vector.load %arg9[%c5_88, %c0_89, %c0_90] : memref<21x128x256xbf16, #tpu.memory_space<vmem>>, vector<1x128x256xbf16>
    %165 = vector.shape_cast %164 : vector<1x128x256xbf16> to vector<128x256xbf16>
    %cst_91 = arith.constant dense<0.000000e+00> : vector<8x256xf32>
    %166 = tpu.matmul %163, %165, %cst_91 {dimension_numbers = #tpu.dot_dimension_numbers<[1], [0], [0], [1], [0, 0, 1, 1], [], []>} : vector<8x128xbf16>, vector<128x256xbf16>, vector<8x256xf32> -> vector<8x256xf32>
    %167 = arith.addf %142, %166 : vector<8x256xf32>
    %c6 = arith.constant 6 : index
    %c0_92 = arith.constant 0 : index
    %c0_93 = arith.constant 0 : index
    %168 = vector.load %arg1[%c6, %c0_92, %c0_93] : memref<21x8x1xf32, #tpu.memory_space<vmem>>, vector<1x8x1xf32>
    %169 = vector.shape_cast %168 : vector<1x8x1xf32> to vector<8x1xf32>
    %c6_94 = arith.constant 6 : index
    %c0_95 = arith.constant 0 : index
    %c0_96 = arith.constant 0 : index
    %170 = vector.load %arg2[%c6_94, %c0_95, %c0_96] : memref<21x8x1xf32, #tpu.memory_space<vmem>>, vector<1x8x1xf32>
    %171 = vector.shape_cast %170 : vector<1x8x1xf32> to vector<8x1xf32>
    %172 = vector.broadcast %169 : vector<8x1xf32> to vector<8x256xf32>
    %173 = arith.mulf %172, %2 : vector<8x256xf32>
    %174 = vector.broadcast %171 : vector<8x1xf32> to vector<8x256xf32>
    %175 = arith.mulf %174, %5 : vector<8x256xf32>
    %176 = arith.addf %173, %175 : vector<8x256xf32>
    %177 = arith.addf %176, %8 : vector<8x256xf32>
    %cst_97 = arith.constant 0.000000e+00 : f32
    %178 = vector.broadcast %cst_97 : f32 to vector<8x256xf32>
    %179 = arith.maximumf %177, %178 : vector<8x256xf32>
    %180 = arith.truncf %179 : vector<8x256xf32> to vector<8x256xbf16>
    %cst_98 = arith.constant dense<0.000000e+00> : vector<8x128xf32>
    %181 = tpu.matmul %180, %15, %cst_98 {dimension_numbers = #tpu.dot_dimension_numbers<[1], [0], [0], [1], [0, 0, 1, 1], [], []>} : vector<8x256xbf16>, vector<256x128xbf16>, vector<8x128xf32> -> vector<8x128xf32>
    %182 = arith.addf %181, %11 : vector<8x128xf32>
    %cst_99 = arith.constant 0.000000e+00 : f32
    %183 = vector.broadcast %cst_99 : f32 to vector<8x128xf32>
    %184 = arith.maximumf %182, %183 : vector<8x128xf32>
    %185 = arith.truncf %184 : vector<8x128xf32> to vector<8x128xbf16>
    %cst_100 = arith.constant dense<0.000000e+00> : vector<8x128xf32>
    %186 = tpu.matmul %185, %16, %cst_100 {dimension_numbers = #tpu.dot_dimension_numbers<[1], [0], [0], [1], [0, 0, 1, 1], [], []>} : vector<8x128xbf16>, vector<128x128xbf16>, vector<8x128xf32> -> vector<8x128xf32>
    %187 = arith.addf %186, %14 : vector<8x128xf32>
    %188 = arith.truncf %187 : vector<8x128xf32> to vector<8x128xbf16>
    %c6_101 = arith.constant 6 : index
    %c0_102 = arith.constant 0 : index
    %c0_103 = arith.constant 0 : index
    %189 = vector.load %arg9[%c6_101, %c0_102, %c0_103] : memref<21x128x256xbf16, #tpu.memory_space<vmem>>, vector<1x128x256xbf16>
    %190 = vector.shape_cast %189 : vector<1x128x256xbf16> to vector<128x256xbf16>
    %cst_104 = arith.constant dense<0.000000e+00> : vector<8x256xf32>
    %191 = tpu.matmul %188, %190, %cst_104 {dimension_numbers = #tpu.dot_dimension_numbers<[1], [0], [0], [1], [0, 0, 1, 1], [], []>} : vector<8x128xbf16>, vector<128x256xbf16>, vector<8x256xf32> -> vector<8x256xf32>
    %192 = arith.addf %167, %191 : vector<8x256xf32>
    %c7 = arith.constant 7 : index
    %c0_105 = arith.constant 0 : index
    %c0_106 = arith.constant 0 : index
    %193 = vector.load %arg1[%c7, %c0_105, %c0_106] : memref<21x8x1xf32, #tpu.memory_space<vmem>>, vector<1x8x1xf32>
    %194 = vector.shape_cast %193 : vector<1x8x1xf32> to vector<8x1xf32>
    %c7_107 = arith.constant 7 : index
    %c0_108 = arith.constant 0 : index
    %c0_109 = arith.constant 0 : index
    %195 = vector.load %arg2[%c7_107, %c0_108, %c0_109] : memref<21x8x1xf32, #tpu.memory_space<vmem>>, vector<1x8x1xf32>
    %196 = vector.shape_cast %195 : vector<1x8x1xf32> to vector<8x1xf32>
    %197 = vector.broadcast %194 : vector<8x1xf32> to vector<8x256xf32>
    %198 = arith.mulf %197, %2 : vector<8x256xf32>
    %199 = vector.broadcast %196 : vector<8x1xf32> to vector<8x256xf32>
    %200 = arith.mulf %199, %5 : vector<8x256xf32>
    %201 = arith.addf %198, %200 : vector<8x256xf32>
    %202 = arith.addf %201, %8 : vector<8x256xf32>
    %cst_110 = arith.constant 0.000000e+00 : f32
    %203 = vector.broadcast %cst_110 : f32 to vector<8x256xf32>
    %204 = arith.maximumf %202, %203 : vector<8x256xf32>
    %205 = arith.truncf %204 : vector<8x256xf32> to vector<8x256xbf16>
    %cst_111 = arith.constant dense<0.000000e+00> : vector<8x128xf32>
    %206 = tpu.matmul %205, %15, %cst_111 {dimension_numbers = #tpu.dot_dimension_numbers<[1], [0], [0], [1], [0, 0, 1, 1], [], []>} : vector<8x256xbf16>, vector<256x128xbf16>, vector<8x128xf32> -> vector<8x128xf32>
    %207 = arith.addf %206, %11 : vector<8x128xf32>
    %cst_112 = arith.constant 0.000000e+00 : f32
    %208 = vector.broadcast %cst_112 : f32 to vector<8x128xf32>
    %209 = arith.maximumf %207, %208 : vector<8x128xf32>
    %210 = arith.truncf %209 : vector<8x128xf32> to vector<8x128xbf16>
    %cst_113 = arith.constant dense<0.000000e+00> : vector<8x128xf32>
    %211 = tpu.matmul %210, %16, %cst_113 {dimension_numbers = #tpu.dot_dimension_numbers<[1], [0], [0], [1], [0, 0, 1, 1], [], []>} : vector<8x128xbf16>, vector<128x128xbf16>, vector<8x128xf32> -> vector<8x128xf32>
    %212 = arith.addf %211, %14 : vector<8x128xf32>
    %213 = arith.truncf %212 : vector<8x128xf32> to vector<8x128xbf16>
    %c7_114 = arith.constant 7 : index
    %c0_115 = arith.constant 0 : index
    %c0_116 = arith.constant 0 : index
    %214 = vector.load %arg9[%c7_114, %c0_115, %c0_116] : memref<21x128x256xbf16, #tpu.memory_space<vmem>>, vector<1x128x256xbf16>
    %215 = vector.shape_cast %214 : vector<1x128x256xbf16> to vector<128x256xbf16>
    %cst_117 = arith.constant dense<0.000000e+00> : vector<8x256xf32>
    %216 = tpu.matmul %213, %215, %cst_117 {dimension_numbers = #tpu.dot_dimension_numbers<[1], [0], [0], [1], [0, 0, 1, 1], [], []>} : vector<8x128xbf16>, vector<128x256xbf16>, vector<8x256xf32> -> vector<8x256xf32>
    %217 = arith.addf %192, %216 : vector<8x256xf32>
    %c8 = arith.constant 8 : index
    %c0_118 = arith.constant 0 : index
    %c0_119 = arith.constant 0 : index
    %218 = vector.load %arg1[%c8, %c0_118, %c0_119] : memref<21x8x1xf32, #tpu.memory_space<vmem>>, vector<1x8x1xf32>
    %219 = vector.shape_cast %218 : vector<1x8x1xf32> to vector<8x1xf32>
    %c8_120 = arith.constant 8 : index
    %c0_121 = arith.constant 0 : index
    %c0_122 = arith.constant 0 : index
    %220 = vector.load %arg2[%c8_120, %c0_121, %c0_122] : memref<21x8x1xf32, #tpu.memory_space<vmem>>, vector<1x8x1xf32>
    %221 = vector.shape_cast %220 : vector<1x8x1xf32> to vector<8x1xf32>
    %222 = vector.broadcast %219 : vector<8x1xf32> to vector<8x256xf32>
    %223 = arith.mulf %222, %2 : vector<8x256xf32>
    %224 = vector.broadcast %221 : vector<8x1xf32> to vector<8x256xf32>
    %225 = arith.mulf %224, %5 : vector<8x256xf32>
    %226 = arith.addf %223, %225 : vector<8x256xf32>
    %227 = arith.addf %226, %8 : vector<8x256xf32>
    %cst_123 = arith.constant 0.000000e+00 : f32
    %228 = vector.broadcast %cst_123 : f32 to vector<8x256xf32>
    %229 = arith.maximumf %227, %228 : vector<8x256xf32>
    %230 = arith.truncf %229 : vector<8x256xf32> to vector<8x256xbf16>
    %cst_124 = arith.constant dense<0.000000e+00> : vector<8x128xf32>
    %231 = tpu.matmul %230, %15, %cst_124 {dimension_numbers = #tpu.dot_dimension_numbers<[1], [0], [0], [1], [0, 0, 1, 1], [], []>} : vector<8x256xbf16>, vector<256x128xbf16>, vector<8x128xf32> -> vector<8x128xf32>
    %232 = arith.addf %231, %11 : vector<8x128xf32>
    %cst_125 = arith.constant 0.000000e+00 : f32
    %233 = vector.broadcast %cst_125 : f32 to vector<8x128xf32>
    %234 = arith.maximumf %232, %233 : vector<8x128xf32>
    %235 = arith.truncf %234 : vector<8x128xf32> to vector<8x128xbf16>
    %cst_126 = arith.constant dense<0.000000e+00> : vector<8x128xf32>
    %236 = tpu.matmul %235, %16, %cst_126 {dimension_numbers = #tpu.dot_dimension_numbers<[1], [0], [0], [1], [0, 0, 1, 1], [], []>} : vector<8x128xbf16>, vector<128x128xbf16>, vector<8x128xf32> -> vector<8x128xf32>
    %237 = arith.addf %236, %14 : vector<8x128xf32>
    %238 = arith.truncf %237 : vector<8x128xf32> to vector<8x128xbf16>
    %c8_127 = arith.constant 8 : index
    %c0_128 = arith.constant 0 : index
    %c0_129 = arith.constant 0 : index
    %239 = vector.load %arg9[%c8_127, %c0_128, %c0_129] : memref<21x128x256xbf16, #tpu.memory_space<vmem>>, vector<1x128x256xbf16>
    %240 = vector.shape_cast %239 : vector<1x128x256xbf16> to vector<128x256xbf16>
    %cst_130 = arith.constant dense<0.000000e+00> : vector<8x256xf32>
    %241 = tpu.matmul %238, %240, %cst_130 {dimension_numbers = #tpu.dot_dimension_numbers<[1], [0], [0], [1], [0, 0, 1, 1], [], []>} : vector<8x128xbf16>, vector<128x256xbf16>, vector<8x256xf32> -> vector<8x256xf32>
    %242 = arith.addf %217, %241 : vector<8x256xf32>
    %c9 = arith.constant 9 : index
    %c0_131 = arith.constant 0 : index
    %c0_132 = arith.constant 0 : index
    %243 = vector.load %arg1[%c9, %c0_131, %c0_132] : memref<21x8x1xf32, #tpu.memory_space<vmem>>, vector<1x8x1xf32>
    %244 = vector.shape_cast %243 : vector<1x8x1xf32> to vector<8x1xf32>
    %c9_133 = arith.constant 9 : index
    %c0_134 = arith.constant 0 : index
    %c0_135 = arith.constant 0 : index
    %245 = vector.load %arg2[%c9_133, %c0_134, %c0_135] : memref<21x8x1xf32, #tpu.memory_space<vmem>>, vector<1x8x1xf32>
    %246 = vector.shape_cast %245 : vector<1x8x1xf32> to vector<8x1xf32>
    %247 = vector.broadcast %244 : vector<8x1xf32> to vector<8x256xf32>
    %248 = arith.mulf %247, %2 : vector<8x256xf32>
    %249 = vector.broadcast %246 : vector<8x1xf32> to vector<8x256xf32>
    %250 = arith.mulf %249, %5 : vector<8x256xf32>
    %251 = arith.addf %248, %250 : vector<8x256xf32>
    %252 = arith.addf %251, %8 : vector<8x256xf32>
    %cst_136 = arith.constant 0.000000e+00 : f32
    %253 = vector.broadcast %cst_136 : f32 to vector<8x256xf32>
    %254 = arith.maximumf %252, %253 : vector<8x256xf32>
    %255 = arith.truncf %254 : vector<8x256xf32> to vector<8x256xbf16>
    %cst_137 = arith.constant dense<0.000000e+00> : vector<8x128xf32>
    %256 = tpu.matmul %255, %15, %cst_137 {dimension_numbers = #tpu.dot_dimension_numbers<[1], [0], [0], [1], [0, 0, 1, 1], [], []>} : vector<8x256xbf16>, vector<256x128xbf16>, vector<8x128xf32> -> vector<8x128xf32>
    %257 = arith.addf %256, %11 : vector<8x128xf32>
    %cst_138 = arith.constant 0.000000e+00 : f32
    %258 = vector.broadcast %cst_138 : f32 to vector<8x128xf32>
    %259 = arith.maximumf %257, %258 : vector<8x128xf32>
    %260 = arith.truncf %259 : vector<8x128xf32> to vector<8x128xbf16>
    %cst_139 = arith.constant dense<0.000000e+00> : vector<8x128xf32>
    %261 = tpu.matmul %260, %16, %cst_139 {dimension_numbers = #tpu.dot_dimension_numbers<[1], [0], [0], [1], [0, 0, 1, 1], [], []>} : vector<8x128xbf16>, vector<128x128xbf16>, vector<8x128xf32> -> vector<8x128xf32>
    %262 = arith.addf %261, %14 : vector<8x128xf32>
    %263 = arith.truncf %262 : vector<8x128xf32> to vector<8x128xbf16>
    %c9_140 = arith.constant 9 : index
    %c0_141 = arith.constant 0 : index
    %c0_142 = arith.constant 0 : index
    %264 = vector.load %arg9[%c9_140, %c0_141, %c0_142] : memref<21x128x256xbf16, #tpu.memory_space<vmem>>, vector<1x128x256xbf16>
    %265 = vector.shape_cast %264 : vector<1x128x256xbf16> to vector<128x256xbf16>
    %cst_143 = arith.constant dense<0.000000e+00> : vector<8x256xf32>
    %266 = tpu.matmul %263, %265, %cst_143 {dimension_numbers = #tpu.dot_dimension_numbers<[1], [0], [0], [1], [0, 0, 1, 1], [], []>} : vector<8x128xbf16>, vector<128x256xbf16>, vector<8x256xf32> -> vector<8x256xf32>
    %267 = arith.addf %242, %266 : vector<8x256xf32>
    %c10 = arith.constant 10 : index
    %c0_144 = arith.constant 0 : index
    %c0_145 = arith.constant 0 : index
    %268 = vector.load %arg1[%c10, %c0_144, %c0_145] : memref<21x8x1xf32, #tpu.memory_space<vmem>>, vector<1x8x1xf32>
    %269 = vector.shape_cast %268 : vector<1x8x1xf32> to vector<8x1xf32>
    %c10_146 = arith.constant 10 : index
    %c0_147 = arith.constant 0 : index
    %c0_148 = arith.constant 0 : index
    %270 = vector.load %arg2[%c10_146, %c0_147, %c0_148] : memref<21x8x1xf32, #tpu.memory_space<vmem>>, vector<1x8x1xf32>
    %271 = vector.shape_cast %270 : vector<1x8x1xf32> to vector<8x1xf32>
    %272 = vector.broadcast %269 : vector<8x1xf32> to vector<8x256xf32>
    %273 = arith.mulf %272, %2 : vector<8x256xf32>
    %274 = vector.broadcast %271 : vector<8x1xf32> to vector<8x256xf32>
    %275 = arith.mulf %274, %5 : vector<8x256xf32>
    %276 = arith.addf %273, %275 : vector<8x256xf32>
    %277 = arith.addf %276, %8 : vector<8x256xf32>
    %cst_149 = arith.constant 0.000000e+00 : f32
    %278 = vector.broadcast %cst_149 : f32 to vector<8x256xf32>
    %279 = arith.maximumf %277, %278 : vector<8x256xf32>
    %280 = arith.truncf %279 : vector<8x256xf32> to vector<8x256xbf16>
    %cst_150 = arith.constant dense<0.000000e+00> : vector<8x128xf32>
    %281 = tpu.matmul %280, %15, %cst_150 {dimension_numbers = #tpu.dot_dimension_numbers<[1], [0], [0], [1], [0, 0, 1, 1], [], []>} : vector<8x256xbf16>, vector<256x128xbf16>, vector<8x128xf32> -> vector<8x128xf32>
    %282 = arith.addf %281, %11 : vector<8x128xf32>
    %cst_151 = arith.constant 0.000000e+00 : f32
    %283 = vector.broadcast %cst_151 : f32 to vector<8x128xf32>
    %284 = arith.maximumf %282, %283 : vector<8x128xf32>
    %285 = arith.truncf %284 : vector<8x128xf32> to vector<8x128xbf16>
    %cst_152 = arith.constant dense<0.000000e+00> : vector<8x128xf32>
    %286 = tpu.matmul %285, %16, %cst_152 {dimension_numbers = #tpu.dot_dimension_numbers<[1], [0], [0], [1], [0, 0, 1, 1], [], []>} : vector<8x128xbf16>, vector<128x128xbf16>, vector<8x128xf32> -> vector<8x128xf32>
    %287 = arith.addf %286, %14 : vector<8x128xf32>
    %288 = arith.truncf %287 : vector<8x128xf32> to vector<8x128xbf16>
    %c10_153 = arith.constant 10 : index
    %c0_154 = arith.constant 0 : index
    %c0_155 = arith.constant 0 : index
    %289 = vector.load %arg9[%c10_153, %c0_154, %c0_155] : memref<21x128x256xbf16, #tpu.memory_space<vmem>>, vector<1x128x256xbf16>
    %290 = vector.shape_cast %289 : vector<1x128x256xbf16> to vector<128x256xbf16>
    %cst_156 = arith.constant dense<0.000000e+00> : vector<8x256xf32>
    %291 = tpu.matmul %288, %290, %cst_156 {dimension_numbers = #tpu.dot_dimension_numbers<[1], [0], [0], [1], [0, 0, 1, 1], [], []>} : vector<8x128xbf16>, vector<128x256xbf16>, vector<8x256xf32> -> vector<8x256xf32>
    %292 = arith.addf %267, %291 : vector<8x256xf32>
    %c11 = arith.constant 11 : index
    %c0_157 = arith.constant 0 : index
    %c0_158 = arith.constant 0 : index
    %293 = vector.load %arg1[%c11, %c0_157, %c0_158] : memref<21x8x1xf32, #tpu.memory_space<vmem>>, vector<1x8x1xf32>
    %294 = vector.shape_cast %293 : vector<1x8x1xf32> to vector<8x1xf32>
    %c11_159 = arith.constant 11 : index
    %c0_160 = arith.constant 0 : index
    %c0_161 = arith.constant 0 : index
    %295 = vector.load %arg2[%c11_159, %c0_160, %c0_161] : memref<21x8x1xf32, #tpu.memory_space<vmem>>, vector<1x8x1xf32>
    %296 = vector.shape_cast %295 : vector<1x8x1xf32> to vector<8x1xf32>
    %297 = vector.broadcast %294 : vector<8x1xf32> to vector<8x256xf32>
    %298 = arith.mulf %297, %2 : vector<8x256xf32>
    %299 = vector.broadcast %296 : vector<8x1xf32> to vector<8x256xf32>
    %300 = arith.mulf %299, %5 : vector<8x256xf32>
    %301 = arith.addf %298, %300 : vector<8x256xf32>
    %302 = arith.addf %301, %8 : vector<8x256xf32>
    %cst_162 = arith.constant 0.000000e+00 : f32
    %303 = vector.broadcast %cst_162 : f32 to vector<8x256xf32>
    %304 = arith.maximumf %302, %303 : vector<8x256xf32>
    %305 = arith.truncf %304 : vector<8x256xf32> to vector<8x256xbf16>
    %cst_163 = arith.constant dense<0.000000e+00> : vector<8x128xf32>
    %306 = tpu.matmul %305, %15, %cst_163 {dimension_numbers = #tpu.dot_dimension_numbers<[1], [0], [0], [1], [0, 0, 1, 1], [], []>} : vector<8x256xbf16>, vector<256x128xbf16>, vector<8x128xf32> -> vector<8x128xf32>
    %307 = arith.addf %306, %11 : vector<8x128xf32>
    %cst_164 = arith.constant 0.000000e+00 : f32
    %308 = vector.broadcast %cst_164 : f32 to vector<8x128xf32>
    %309 = arith.maximumf %307, %308 : vector<8x128xf32>
    %310 = arith.truncf %309 : vector<8x128xf32> to vector<8x128xbf16>
    %cst_165 = arith.constant dense<0.000000e+00> : vector<8x128xf32>
    %311 = tpu.matmul %310, %16, %cst_165 {dimension_numbers = #tpu.dot_dimension_numbers<[1], [0], [0], [1], [0, 0, 1, 1], [], []>} : vector<8x128xbf16>, vector<128x128xbf16>, vector<8x128xf32> -> vector<8x128xf32>
    %312 = arith.addf %311, %14 : vector<8x128xf32>
    %313 = arith.truncf %312 : vector<8x128xf32> to vector<8x128xbf16>
    %c11_166 = arith.constant 11 : index
    %c0_167 = arith.constant 0 : index
    %c0_168 = arith.constant 0 : index
    %314 = vector.load %arg9[%c11_166, %c0_167, %c0_168] : memref<21x128x256xbf16, #tpu.memory_space<vmem>>, vector<1x128x256xbf16>
    %315 = vector.shape_cast %314 : vector<1x128x256xbf16> to vector<128x256xbf16>
    %cst_169 = arith.constant dense<0.000000e+00> : vector<8x256xf32>
    %316 = tpu.matmul %313, %315, %cst_169 {dimension_numbers = #tpu.dot_dimension_numbers<[1], [0], [0], [1], [0, 0, 1, 1], [], []>} : vector<8x128xbf16>, vector<128x256xbf16>, vector<8x256xf32> -> vector<8x256xf32>
    %317 = arith.addf %292, %316 : vector<8x256xf32>
    %c12 = arith.constant 12 : index
    %c0_170 = arith.constant 0 : index
    %c0_171 = arith.constant 0 : index
    %318 = vector.load %arg1[%c12, %c0_170, %c0_171] : memref<21x8x1xf32, #tpu.memory_space<vmem>>, vector<1x8x1xf32>
    %319 = vector.shape_cast %318 : vector<1x8x1xf32> to vector<8x1xf32>
    %c12_172 = arith.constant 12 : index
    %c0_173 = arith.constant 0 : index
    %c0_174 = arith.constant 0 : index
    %320 = vector.load %arg2[%c12_172, %c0_173, %c0_174] : memref<21x8x1xf32, #tpu.memory_space<vmem>>, vector<1x8x1xf32>
    %321 = vector.shape_cast %320 : vector<1x8x1xf32> to vector<8x1xf32>
    %322 = vector.broadcast %319 : vector<8x1xf32> to vector<8x256xf32>
    %323 = arith.mulf %322, %2 : vector<8x256xf32>
    %324 = vector.broadcast %321 : vector<8x1xf32> to vector<8x256xf32>
    %325 = arith.mulf %324, %5 : vector<8x256xf32>
    %326 = arith.addf %323, %325 : vector<8x256xf32>
    %327 = arith.addf %326, %8 : vector<8x256xf32>
    %cst_175 = arith.constant 0.000000e+00 : f32
    %328 = vector.broadcast %cst_175 : f32 to vector<8x256xf32>
    %329 = arith.maximumf %327, %328 : vector<8x256xf32>
    %330 = arith.truncf %329 : vector<8x256xf32> to vector<8x256xbf16>
    %cst_176 = arith.constant dense<0.000000e+00> : vector<8x128xf32>
    %331 = tpu.matmul %330, %15, %cst_176 {dimension_numbers = #tpu.dot_dimension_numbers<[1], [0], [0], [1], [0, 0, 1, 1], [], []>} : vector<8x256xbf16>, vector<256x128xbf16>, vector<8x128xf32> -> vector<8x128xf32>
    %332 = arith.addf %331, %11 : vector<8x128xf32>
    %cst_177 = arith.constant 0.000000e+00 : f32
    %333 = vector.broadcast %cst_177 : f32 to vector<8x128xf32>
    %334 = arith.maximumf %332, %333 : vector<8x128xf32>
    %335 = arith.truncf %334 : vector<8x128xf32> to vector<8x128xbf16>
    %cst_178 = arith.constant dense<0.000000e+00> : vector<8x128xf32>
    %336 = tpu.matmul %335, %16, %cst_178 {dimension_numbers = #tpu.dot_dimension_numbers<[1], [0], [0], [1], [0, 0, 1, 1], [], []>} : vector<8x128xbf16>, vector<128x128xbf16>, vector<8x128xf32> -> vector<8x128xf32>
    %337 = arith.addf %336, %14 : vector<8x128xf32>
    %338 = arith.truncf %337 : vector<8x128xf32> to vector<8x128xbf16>
    %c12_179 = arith.constant 12 : index
    %c0_180 = arith.constant 0 : index
    %c0_181 = arith.constant 0 : index
    %339 = vector.load %arg9[%c12_179, %c0_180, %c0_181] : memref<21x128x256xbf16, #tpu.memory_space<vmem>>, vector<1x128x256xbf16>
    %340 = vector.shape_cast %339 : vector<1x128x256xbf16> to vector<128x256xbf16>
    %cst_182 = arith.constant dense<0.000000e+00> : vector<8x256xf32>
    %341 = tpu.matmul %338, %340, %cst_182 {dimension_numbers = #tpu.dot_dimension_numbers<[1], [0], [0], [1], [0, 0, 1, 1], [], []>} : vector<8x128xbf16>, vector<128x256xbf16>, vector<8x256xf32> -> vector<8x256xf32>
    %342 = arith.addf %317, %341 : vector<8x256xf32>
    %c13 = arith.constant 13 : index
    %c0_183 = arith.constant 0 : index
    %c0_184 = arith.constant 0 : index
    %343 = vector.load %arg1[%c13, %c0_183, %c0_184] : memref<21x8x1xf32, #tpu.memory_space<vmem>>, vector<1x8x1xf32>
    %344 = vector.shape_cast %343 : vector<1x8x1xf32> to vector<8x1xf32>
    %c13_185 = arith.constant 13 : index
    %c0_186 = arith.constant 0 : index
    %c0_187 = arith.constant 0 : index
    %345 = vector.load %arg2[%c13_185, %c0_186, %c0_187] : memref<21x8x1xf32, #tpu.memory_space<vmem>>, vector<1x8x1xf32>
    %346 = vector.shape_cast %345 : vector<1x8x1xf32> to vector<8x1xf32>
    %347 = vector.broadcast %344 : vector<8x1xf32> to vector<8x256xf32>
    %348 = arith.mulf %347, %2 : vector<8x256xf32>
    %349 = vector.broadcast %346 : vector<8x1xf32> to vector<8x256xf32>
    %350 = arith.mulf %349, %5 : vector<8x256xf32>
    %351 = arith.addf %348, %350 : vector<8x256xf32>
    %352 = arith.addf %351, %8 : vector<8x256xf32>
    %cst_188 = arith.constant 0.000000e+00 : f32
    %353 = vector.broadcast %cst_188 : f32 to vector<8x256xf32>
    %354 = arith.maximumf %352, %353 : vector<8x256xf32>
    %355 = arith.truncf %354 : vector<8x256xf32> to vector<8x256xbf16>
    %cst_189 = arith.constant dense<0.000000e+00> : vector<8x128xf32>
    %356 = tpu.matmul %355, %15, %cst_189 {dimension_numbers = #tpu.dot_dimension_numbers<[1], [0], [0], [1], [0, 0, 1, 1], [], []>} : vector<8x256xbf16>, vector<256x128xbf16>, vector<8x128xf32> -> vector<8x128xf32>
    %357 = arith.addf %356, %11 : vector<8x128xf32>
    %cst_190 = arith.constant 0.000000e+00 : f32
    %358 = vector.broadcast %cst_190 : f32 to vector<8x128xf32>
    %359 = arith.maximumf %357, %358 : vector<8x128xf32>
    %360 = arith.truncf %359 : vector<8x128xf32> to vector<8x128xbf16>
    %cst_191 = arith.constant dense<0.000000e+00> : vector<8x128xf32>
    %361 = tpu.matmul %360, %16, %cst_191 {dimension_numbers = #tpu.dot_dimension_numbers<[1], [0], [0], [1], [0, 0, 1, 1], [], []>} : vector<8x128xbf16>, vector<128x128xbf16>, vector<8x128xf32> -> vector<8x128xf32>
    %362 = arith.addf %361, %14 : vector<8x128xf32>
    %363 = arith.truncf %362 : vector<8x128xf32> to vector<8x128xbf16>
    %c13_192 = arith.constant 13 : index
    %c0_193 = arith.constant 0 : index
    %c0_194 = arith.constant 0 : index
    %364 = vector.load %arg9[%c13_192, %c0_193, %c0_194] : memref<21x128x256xbf16, #tpu.memory_space<vmem>>, vector<1x128x256xbf16>
    %365 = vector.shape_cast %364 : vector<1x128x256xbf16> to vector<128x256xbf16>
    %cst_195 = arith.constant dense<0.000000e+00> : vector<8x256xf32>
    %366 = tpu.matmul %363, %365, %cst_195 {dimension_numbers = #tpu.dot_dimension_numbers<[1], [0], [0], [1], [0, 0, 1, 1], [], []>} : vector<8x128xbf16>, vector<128x256xbf16>, vector<8x256xf32> -> vector<8x256xf32>
    %367 = arith.addf %342, %366 : vector<8x256xf32>
    %c14 = arith.constant 14 : index
    %c0_196 = arith.constant 0 : index
    %c0_197 = arith.constant 0 : index
    %368 = vector.load %arg1[%c14, %c0_196, %c0_197] : memref<21x8x1xf32, #tpu.memory_space<vmem>>, vector<1x8x1xf32>
    %369 = vector.shape_cast %368 : vector<1x8x1xf32> to vector<8x1xf32>
    %c14_198 = arith.constant 14 : index
    %c0_199 = arith.constant 0 : index
    %c0_200 = arith.constant 0 : index
    %370 = vector.load %arg2[%c14_198, %c0_199, %c0_200] : memref<21x8x1xf32, #tpu.memory_space<vmem>>, vector<1x8x1xf32>
    %371 = vector.shape_cast %370 : vector<1x8x1xf32> to vector<8x1xf32>
    %372 = vector.broadcast %369 : vector<8x1xf32> to vector<8x256xf32>
    %373 = arith.mulf %372, %2 : vector<8x256xf32>
    %374 = vector.broadcast %371 : vector<8x1xf32> to vector<8x256xf32>
    %375 = arith.mulf %374, %5 : vector<8x256xf32>
    %376 = arith.addf %373, %375 : vector<8x256xf32>
    %377 = arith.addf %376, %8 : vector<8x256xf32>
    %cst_201 = arith.constant 0.000000e+00 : f32
    %378 = vector.broadcast %cst_201 : f32 to vector<8x256xf32>
    %379 = arith.maximumf %377, %378 : vector<8x256xf32>
    %380 = arith.truncf %379 : vector<8x256xf32> to vector<8x256xbf16>
    %cst_202 = arith.constant dense<0.000000e+00> : vector<8x128xf32>
    %381 = tpu.matmul %380, %15, %cst_202 {dimension_numbers = #tpu.dot_dimension_numbers<[1], [0], [0], [1], [0, 0, 1, 1], [], []>} : vector<8x256xbf16>, vector<256x128xbf16>, vector<8x128xf32> -> vector<8x128xf32>
    %382 = arith.addf %381, %11 : vector<8x128xf32>
    %cst_203 = arith.constant 0.000000e+00 : f32
    %383 = vector.broadcast %cst_203 : f32 to vector<8x128xf32>
    %384 = arith.maximumf %382, %383 : vector<8x128xf32>
    %385 = arith.truncf %384 : vector<8x128xf32> to vector<8x128xbf16>
    %cst_204 = arith.constant dense<0.000000e+00> : vector<8x128xf32>
    %386 = tpu.matmul %385, %16, %cst_204 {dimension_numbers = #tpu.dot_dimension_numbers<[1], [0], [0], [1], [0, 0, 1, 1], [], []>} : vector<8x128xbf16>, vector<128x128xbf16>, vector<8x128xf32> -> vector<8x128xf32>
    %387 = arith.addf %386, %14 : vector<8x128xf32>
    %388 = arith.truncf %387 : vector<8x128xf32> to vector<8x128xbf16>
    %c14_205 = arith.constant 14 : index
    %c0_206 = arith.constant 0 : index
    %c0_207 = arith.constant 0 : index
    %389 = vector.load %arg9[%c14_205, %c0_206, %c0_207] : memref<21x128x256xbf16, #tpu.memory_space<vmem>>, vector<1x128x256xbf16>
    %390 = vector.shape_cast %389 : vector<1x128x256xbf16> to vector<128x256xbf16>
    %cst_208 = arith.constant dense<0.000000e+00> : vector<8x256xf32>
    %391 = tpu.matmul %388, %390, %cst_208 {dimension_numbers = #tpu.dot_dimension_numbers<[1], [0], [0], [1], [0, 0, 1, 1], [], []>} : vector<8x128xbf16>, vector<128x256xbf16>, vector<8x256xf32> -> vector<8x256xf32>
    %392 = arith.addf %367, %391 : vector<8x256xf32>
    %c15 = arith.constant 15 : index
    %c0_209 = arith.constant 0 : index
    %c0_210 = arith.constant 0 : index
    %393 = vector.load %arg1[%c15, %c0_209, %c0_210] : memref<21x8x1xf32, #tpu.memory_space<vmem>>, vector<1x8x1xf32>
    %394 = vector.shape_cast %393 : vector<1x8x1xf32> to vector<8x1xf32>
    %c15_211 = arith.constant 15 : index
    %c0_212 = arith.constant 0 : index
    %c0_213 = arith.constant 0 : index
    %395 = vector.load %arg2[%c15_211, %c0_212, %c0_213] : memref<21x8x1xf32, #tpu.memory_space<vmem>>, vector<1x8x1xf32>
    %396 = vector.shape_cast %395 : vector<1x8x1xf32> to vector<8x1xf32>
    %397 = vector.broadcast %394 : vector<8x1xf32> to vector<8x256xf32>
    %398 = arith.mulf %397, %2 : vector<8x256xf32>
    %399 = vector.broadcast %396 : vector<8x1xf32> to vector<8x256xf32>
    %400 = arith.mulf %399, %5 : vector<8x256xf32>
    %401 = arith.addf %398, %400 : vector<8x256xf32>
    %402 = arith.addf %401, %8 : vector<8x256xf32>
    %cst_214 = arith.constant 0.000000e+00 : f32
    %403 = vector.broadcast %cst_214 : f32 to vector<8x256xf32>
    %404 = arith.maximumf %402, %403 : vector<8x256xf32>
    %405 = arith.truncf %404 : vector<8x256xf32> to vector<8x256xbf16>
    %cst_215 = arith.constant dense<0.000000e+00> : vector<8x128xf32>
    %406 = tpu.matmul %405, %15, %cst_215 {dimension_numbers = #tpu.dot_dimension_numbers<[1], [0], [0], [1], [0, 0, 1, 1], [], []>} : vector<8x256xbf16>, vector<256x128xbf16>, vector<8x128xf32> -> vector<8x128xf32>
    %407 = arith.addf %406, %11 : vector<8x128xf32>
    %cst_216 = arith.constant 0.000000e+00 : f32
    %408 = vector.broadcast %cst_216 : f32 to vector<8x128xf32>
    %409 = arith.maximumf %407, %408 : vector<8x128xf32>
    %410 = arith.truncf %409 : vector<8x128xf32> to vector<8x128xbf16>
    %cst_217 = arith.constant dense<0.000000e+00> : vector<8x128xf32>
    %411 = tpu.matmul %410, %16, %cst_217 {dimension_numbers = #tpu.dot_dimension_numbers<[1], [0], [0], [1], [0, 0, 1, 1], [], []>} : vector<8x128xbf16>, vector<128x128xbf16>, vector<8x128xf32> -> vector<8x128xf32>
    %412 = arith.addf %411, %14 : vector<8x128xf32>
    %413 = arith.truncf %412 : vector<8x128xf32> to vector<8x128xbf16>
    %c15_218 = arith.constant 15 : index
    %c0_219 = arith.constant 0 : index
    %c0_220 = arith.constant 0 : index
    %414 = vector.load %arg9[%c15_218, %c0_219, %c0_220] : memref<21x128x256xbf16, #tpu.memory_space<vmem>>, vector<1x128x256xbf16>
    %415 = vector.shape_cast %414 : vector<1x128x256xbf16> to vector<128x256xbf16>
    %cst_221 = arith.constant dense<0.000000e+00> : vector<8x256xf32>
    %416 = tpu.matmul %413, %415, %cst_221 {dimension_numbers = #tpu.dot_dimension_numbers<[1], [0], [0], [1], [0, 0, 1, 1], [], []>} : vector<8x128xbf16>, vector<128x256xbf16>, vector<8x256xf32> -> vector<8x256xf32>
    %417 = arith.addf %392, %416 : vector<8x256xf32>
    %c16 = arith.constant 16 : index
    %c0_222 = arith.constant 0 : index
    %c0_223 = arith.constant 0 : index
    %418 = vector.load %arg1[%c16, %c0_222, %c0_223] : memref<21x8x1xf32, #tpu.memory_space<vmem>>, vector<1x8x1xf32>
    %419 = vector.shape_cast %418 : vector<1x8x1xf32> to vector<8x1xf32>
    %c16_224 = arith.constant 16 : index
    %c0_225 = arith.constant 0 : index
    %c0_226 = arith.constant 0 : index
    %420 = vector.load %arg2[%c16_224, %c0_225, %c0_226] : memref<21x8x1xf32, #tpu.memory_space<vmem>>, vector<1x8x1xf32>
    %421 = vector.shape_cast %420 : vector<1x8x1xf32> to vector<8x1xf32>
    %422 = vector.broadcast %419 : vector<8x1xf32> to vector<8x256xf32>
    %423 = arith.mulf %422, %2 : vector<8x256xf32>
    %424 = vector.broadcast %421 : vector<8x1xf32> to vector<8x256xf32>
    %425 = arith.mulf %424, %5 : vector<8x256xf32>
    %426 = arith.addf %423, %425 : vector<8x256xf32>
    %427 = arith.addf %426, %8 : vector<8x256xf32>
    %cst_227 = arith.constant 0.000000e+00 : f32
    %428 = vector.broadcast %cst_227 : f32 to vector<8x256xf32>
    %429 = arith.maximumf %427, %428 : vector<8x256xf32>
    %430 = arith.truncf %429 : vector<8x256xf32> to vector<8x256xbf16>
    %cst_228 = arith.constant dense<0.000000e+00> : vector<8x128xf32>
    %431 = tpu.matmul %430, %15, %cst_228 {dimension_numbers = #tpu.dot_dimension_numbers<[1], [0], [0], [1], [0, 0, 1, 1], [], []>} : vector<8x256xbf16>, vector<256x128xbf16>, vector<8x128xf32> -> vector<8x128xf32>
    %432 = arith.addf %431, %11 : vector<8x128xf32>
    %cst_229 = arith.constant 0.000000e+00 : f32
    %433 = vector.broadcast %cst_229 : f32 to vector<8x128xf32>
    %434 = arith.maximumf %432, %433 : vector<8x128xf32>
    %435 = arith.truncf %434 : vector<8x128xf32> to vector<8x128xbf16>
    %cst_230 = arith.constant dense<0.000000e+00> : vector<8x128xf32>
    %436 = tpu.matmul %435, %16, %cst_230 {dimension_numbers = #tpu.dot_dimension_numbers<[1], [0], [0], [1], [0, 0, 1, 1], [], []>} : vector<8x128xbf16>, vector<128x128xbf16>, vector<8x128xf32> -> vector<8x128xf32>
    %437 = arith.addf %436, %14 : vector<8x128xf32>
    %438 = arith.truncf %437 : vector<8x128xf32> to vector<8x128xbf16>
    %c16_231 = arith.constant 16 : index
    %c0_232 = arith.constant 0 : index
    %c0_233 = arith.constant 0 : index
    %439 = vector.load %arg9[%c16_231, %c0_232, %c0_233] : memref<21x128x256xbf16, #tpu.memory_space<vmem>>, vector<1x128x256xbf16>
    %440 = vector.shape_cast %439 : vector<1x128x256xbf16> to vector<128x256xbf16>
    %cst_234 = arith.constant dense<0.000000e+00> : vector<8x256xf32>
    %441 = tpu.matmul %438, %440, %cst_234 {dimension_numbers = #tpu.dot_dimension_numbers<[1], [0], [0], [1], [0, 0, 1, 1], [], []>} : vector<8x128xbf16>, vector<128x256xbf16>, vector<8x256xf32> -> vector<8x256xf32>
    %442 = arith.addf %417, %441 : vector<8x256xf32>
    %c17 = arith.constant 17 : index
    %c0_235 = arith.constant 0 : index
    %c0_236 = arith.constant 0 : index
    %443 = vector.load %arg1[%c17, %c0_235, %c0_236] : memref<21x8x1xf32, #tpu.memory_space<vmem>>, vector<1x8x1xf32>
    %444 = vector.shape_cast %443 : vector<1x8x1xf32> to vector<8x1xf32>
    %c17_237 = arith.constant 17 : index
    %c0_238 = arith.constant 0 : index
    %c0_239 = arith.constant 0 : index
    %445 = vector.load %arg2[%c17_237, %c0_238, %c0_239] : memref<21x8x1xf32, #tpu.memory_space<vmem>>, vector<1x8x1xf32>
    %446 = vector.shape_cast %445 : vector<1x8x1xf32> to vector<8x1xf32>
    %447 = vector.broadcast %444 : vector<8x1xf32> to vector<8x256xf32>
    %448 = arith.mulf %447, %2 : vector<8x256xf32>
    %449 = vector.broadcast %446 : vector<8x1xf32> to vector<8x256xf32>
    %450 = arith.mulf %449, %5 : vector<8x256xf32>
    %451 = arith.addf %448, %450 : vector<8x256xf32>
    %452 = arith.addf %451, %8 : vector<8x256xf32>
    %cst_240 = arith.constant 0.000000e+00 : f32
    %453 = vector.broadcast %cst_240 : f32 to vector<8x256xf32>
    %454 = arith.maximumf %452, %453 : vector<8x256xf32>
    %455 = arith.truncf %454 : vector<8x256xf32> to vector<8x256xbf16>
    %cst_241 = arith.constant dense<0.000000e+00> : vector<8x128xf32>
    %456 = tpu.matmul %455, %15, %cst_241 {dimension_numbers = #tpu.dot_dimension_numbers<[1], [0], [0], [1], [0, 0, 1, 1], [], []>} : vector<8x256xbf16>, vector<256x128xbf16>, vector<8x128xf32> -> vector<8x128xf32>
    %457 = arith.addf %456, %11 : vector<8x128xf32>
    %cst_242 = arith.constant 0.000000e+00 : f32
    %458 = vector.broadcast %cst_242 : f32 to vector<8x128xf32>
    %459 = arith.maximumf %457, %458 : vector<8x128xf32>
    %460 = arith.truncf %459 : vector<8x128xf32> to vector<8x128xbf16>
    %cst_243 = arith.constant dense<0.000000e+00> : vector<8x128xf32>
    %461 = tpu.matmul %460, %16, %cst_243 {dimension_numbers = #tpu.dot_dimension_numbers<[1], [0], [0], [1], [0, 0, 1, 1], [], []>} : vector<8x128xbf16>, vector<128x128xbf16>, vector<8x128xf32> -> vector<8x128xf32>
    %462 = arith.addf %461, %14 : vector<8x128xf32>
    %463 = arith.truncf %462 : vector<8x128xf32> to vector<8x128xbf16>
    %c17_244 = arith.constant 17 : index
    %c0_245 = arith.constant 0 : index
    %c0_246 = arith.constant 0 : index
    %464 = vector.load %arg9[%c17_244, %c0_245, %c0_246] : memref<21x128x256xbf16, #tpu.memory_space<vmem>>, vector<1x128x256xbf16>
    %465 = vector.shape_cast %464 : vector<1x128x256xbf16> to vector<128x256xbf16>
    %cst_247 = arith.constant dense<0.000000e+00> : vector<8x256xf32>
    %466 = tpu.matmul %463, %465, %cst_247 {dimension_numbers = #tpu.dot_dimension_numbers<[1], [0], [0], [1], [0, 0, 1, 1], [], []>} : vector<8x128xbf16>, vector<128x256xbf16>, vector<8x256xf32> -> vector<8x256xf32>
    %467 = arith.addf %442, %466 : vector<8x256xf32>
    %c18 = arith.constant 18 : index
    %c0_248 = arith.constant 0 : index
    %c0_249 = arith.constant 0 : index
    %468 = vector.load %arg1[%c18, %c0_248, %c0_249] : memref<21x8x1xf32, #tpu.memory_space<vmem>>, vector<1x8x1xf32>
    %469 = vector.shape_cast %468 : vector<1x8x1xf32> to vector<8x1xf32>
    %c18_250 = arith.constant 18 : index
    %c0_251 = arith.constant 0 : index
    %c0_252 = arith.constant 0 : index
    %470 = vector.load %arg2[%c18_250, %c0_251, %c0_252] : memref<21x8x1xf32, #tpu.memory_space<vmem>>, vector<1x8x1xf32>
    %471 = vector.shape_cast %470 : vector<1x8x1xf32> to vector<8x1xf32>
    %472 = vector.broadcast %469 : vector<8x1xf32> to vector<8x256xf32>
    %473 = arith.mulf %472, %2 : vector<8x256xf32>
    %474 = vector.broadcast %471 : vector<8x1xf32> to vector<8x256xf32>
    %475 = arith.mulf %474, %5 : vector<8x256xf32>
    %476 = arith.addf %473, %475 : vector<8x256xf32>
    %477 = arith.addf %476, %8 : vector<8x256xf32>
    %cst_253 = arith.constant 0.000000e+00 : f32
    %478 = vector.broadcast %cst_253 : f32 to vector<8x256xf32>
    %479 = arith.maximumf %477, %478 : vector<8x256xf32>
    %480 = arith.truncf %479 : vector<8x256xf32> to vector<8x256xbf16>
    %cst_254 = arith.constant dense<0.000000e+00> : vector<8x128xf32>
    %481 = tpu.matmul %480, %15, %cst_254 {dimension_numbers = #tpu.dot_dimension_numbers<[1], [0], [0], [1], [0, 0, 1, 1], [], []>} : vector<8x256xbf16>, vector<256x128xbf16>, vector<8x128xf32> -> vector<8x128xf32>
    %482 = arith.addf %481, %11 : vector<8x128xf32>
    %cst_255 = arith.constant 0.000000e+00 : f32
    %483 = vector.broadcast %cst_255 : f32 to vector<8x128xf32>
    %484 = arith.maximumf %482, %483 : vector<8x128xf32>
    %485 = arith.truncf %484 : vector<8x128xf32> to vector<8x128xbf16>
    %cst_256 = arith.constant dense<0.000000e+00> : vector<8x128xf32>
    %486 = tpu.matmul %485, %16, %cst_256 {dimension_numbers = #tpu.dot_dimension_numbers<[1], [0], [0], [1], [0, 0, 1, 1], [], []>} : vector<8x128xbf16>, vector<128x128xbf16>, vector<8x128xf32> -> vector<8x128xf32>
    %487 = arith.addf %486, %14 : vector<8x128xf32>
    %488 = arith.truncf %487 : vector<8x128xf32> to vector<8x128xbf16>
    %c18_257 = arith.constant 18 : index
    %c0_258 = arith.constant 0 : index
    %c0_259 = arith.constant 0 : index
    %489 = vector.load %arg9[%c18_257, %c0_258, %c0_259] : memref<21x128x256xbf16, #tpu.memory_space<vmem>>, vector<1x128x256xbf16>
    %490 = vector.shape_cast %489 : vector<1x128x256xbf16> to vector<128x256xbf16>
    %cst_260 = arith.constant dense<0.000000e+00> : vector<8x256xf32>
    %491 = tpu.matmul %488, %490, %cst_260 {dimension_numbers = #tpu.dot_dimension_numbers<[1], [0], [0], [1], [0, 0, 1, 1], [], []>} : vector<8x128xbf16>, vector<128x256xbf16>, vector<8x256xf32> -> vector<8x256xf32>
    %492 = arith.addf %467, %491 : vector<8x256xf32>
    %c19 = arith.constant 19 : index
    %c0_261 = arith.constant 0 : index
    %c0_262 = arith.constant 0 : index
    %493 = vector.load %arg1[%c19, %c0_261, %c0_262] : memref<21x8x1xf32, #tpu.memory_space<vmem>>, vector<1x8x1xf32>
    %494 = vector.shape_cast %493 : vector<1x8x1xf32> to vector<8x1xf32>
    %c19_263 = arith.constant 19 : index
    %c0_264 = arith.constant 0 : index
    %c0_265 = arith.constant 0 : index
    %495 = vector.load %arg2[%c19_263, %c0_264, %c0_265] : memref<21x8x1xf32, #tpu.memory_space<vmem>>, vector<1x8x1xf32>
    %496 = vector.shape_cast %495 : vector<1x8x1xf32> to vector<8x1xf32>
    %497 = vector.broadcast %494 : vector<8x1xf32> to vector<8x256xf32>
    %498 = arith.mulf %497, %2 : vector<8x256xf32>
    %499 = vector.broadcast %496 : vector<8x1xf32> to vector<8x256xf32>
    %500 = arith.mulf %499, %5 : vector<8x256xf32>
    %501 = arith.addf %498, %500 : vector<8x256xf32>
    %502 = arith.addf %501, %8 : vector<8x256xf32>
    %cst_266 = arith.constant 0.000000e+00 : f32
    %503 = vector.broadcast %cst_266 : f32 to vector<8x256xf32>
    %504 = arith.maximumf %502, %503 : vector<8x256xf32>
    %505 = arith.truncf %504 : vector<8x256xf32> to vector<8x256xbf16>
    %cst_267 = arith.constant dense<0.000000e+00> : vector<8x128xf32>
    %506 = tpu.matmul %505, %15, %cst_267 {dimension_numbers = #tpu.dot_dimension_numbers<[1], [0], [0], [1], [0, 0, 1, 1], [], []>} : vector<8x256xbf16>, vector<256x128xbf16>, vector<8x128xf32> -> vector<8x128xf32>
    %507 = arith.addf %506, %11 : vector<8x128xf32>
    %cst_268 = arith.constant 0.000000e+00 : f32
    %508 = vector.broadcast %cst_268 : f32 to vector<8x128xf32>
    %509 = arith.maximumf %507, %508 : vector<8x128xf32>
    %510 = arith.truncf %509 : vector<8x128xf32> to vector<8x128xbf16>
    %cst_269 = arith.constant dense<0.000000e+00> : vector<8x128xf32>
    %511 = tpu.matmul %510, %16, %cst_269 {dimension_numbers = #tpu.dot_dimension_numbers<[1], [0], [0], [1], [0, 0, 1, 1], [], []>} : vector<8x128xbf16>, vector<128x128xbf16>, vector<8x128xf32> -> vector<8x128xf32>
    %512 = arith.addf %511, %14 : vector<8x128xf32>
    %513 = arith.truncf %512 : vector<8x128xf32> to vector<8x128xbf16>
    %c19_270 = arith.constant 19 : index
    %c0_271 = arith.constant 0 : index
    %c0_272 = arith.constant 0 : index
    %514 = vector.load %arg9[%c19_270, %c0_271, %c0_272] : memref<21x128x256xbf16, #tpu.memory_space<vmem>>, vector<1x128x256xbf16>
    %515 = vector.shape_cast %514 : vector<1x128x256xbf16> to vector<128x256xbf16>
    %cst_273 = arith.constant dense<0.000000e+00> : vector<8x256xf32>
    %516 = tpu.matmul %513, %515, %cst_273 {dimension_numbers = #tpu.dot_dimension_numbers<[1], [0], [0], [1], [0, 0, 1, 1], [], []>} : vector<8x128xbf16>, vector<128x256xbf16>, vector<8x256xf32> -> vector<8x256xf32>
    %517 = arith.addf %492, %516 : vector<8x256xf32>
    %c20 = arith.constant 20 : index
    %c0_274 = arith.constant 0 : index
    %c0_275 = arith.constant 0 : index
    %518 = vector.load %arg1[%c20, %c0_274, %c0_275] : memref<21x8x1xf32, #tpu.memory_space<vmem>>, vector<1x8x1xf32>
    %519 = vector.shape_cast %518 : vector<1x8x1xf32> to vector<8x1xf32>
    %c20_276 = arith.constant 20 : index
    %c0_277 = arith.constant 0 : index
    %c0_278 = arith.constant 0 : index
    %520 = vector.load %arg2[%c20_276, %c0_277, %c0_278] : memref<21x8x1xf32, #tpu.memory_space<vmem>>, vector<1x8x1xf32>
    %521 = vector.shape_cast %520 : vector<1x8x1xf32> to vector<8x1xf32>
    %522 = vector.broadcast %519 : vector<8x1xf32> to vector<8x256xf32>
    %523 = arith.mulf %522, %2 : vector<8x256xf32>
    %524 = vector.broadcast %521 : vector<8x1xf32> to vector<8x256xf32>
    %525 = arith.mulf %524, %5 : vector<8x256xf32>
    %526 = arith.addf %523, %525 : vector<8x256xf32>
    %527 = arith.addf %526, %8 : vector<8x256xf32>
    %cst_279 = arith.constant 0.000000e+00 : f32
    %528 = vector.broadcast %cst_279 : f32 to vector<8x256xf32>
    %529 = arith.maximumf %527, %528 : vector<8x256xf32>
    %530 = arith.truncf %529 : vector<8x256xf32> to vector<8x256xbf16>
    %cst_280 = arith.constant dense<0.000000e+00> : vector<8x128xf32>
    %531 = tpu.matmul %530, %15, %cst_280 {dimension_numbers = #tpu.dot_dimension_numbers<[1], [0], [0], [1], [0, 0, 1, 1], [], []>} : vector<8x256xbf16>, vector<256x128xbf16>, vector<8x128xf32> -> vector<8x128xf32>
    %532 = arith.addf %531, %11 : vector<8x128xf32>
    %cst_281 = arith.constant 0.000000e+00 : f32
    %533 = vector.broadcast %cst_281 : f32 to vector<8x128xf32>
    %534 = arith.maximumf %532, %533 : vector<8x128xf32>
    %535 = arith.truncf %534 : vector<8x128xf32> to vector<8x128xbf16>
    %cst_282 = arith.constant dense<0.000000e+00> : vector<8x128xf32>
    %536 = tpu.matmul %535, %16, %cst_282 {dimension_numbers = #tpu.dot_dimension_numbers<[1], [0], [0], [1], [0, 0, 1, 1], [], []>} : vector<8x128xbf16>, vector<128x128xbf16>, vector<8x128xf32> -> vector<8x128xf32>
    %537 = arith.addf %536, %14 : vector<8x128xf32>
    %538 = arith.truncf %537 : vector<8x128xf32> to vector<8x128xbf16>
    %c20_283 = arith.constant 20 : index
    %c0_284 = arith.constant 0 : index
    %c0_285 = arith.constant 0 : index
    %539 = vector.load %arg9[%c20_283, %c0_284, %c0_285] : memref<21x128x256xbf16, #tpu.memory_space<vmem>>, vector<1x128x256xbf16>
    %540 = vector.shape_cast %539 : vector<1x128x256xbf16> to vector<128x256xbf16>
    %cst_286 = arith.constant dense<0.000000e+00> : vector<8x256xf32>
    %541 = tpu.matmul %538, %540, %cst_286 {dimension_numbers = #tpu.dot_dimension_numbers<[1], [0], [0], [1], [0, 0, 1, 1], [], []>} : vector<8x128xbf16>, vector<128x256xbf16>, vector<8x256xf32> -> vector<8x256xf32>
    %542 = arith.addf %517, %541 : vector<8x256xf32>
    %c0_287 = arith.constant 0 : index
    %c0_288 = arith.constant 0 : index
    %543 = vector.load %arg10[%c0_287, %c0_288] : memref<1x256xf32, #tpu.memory_space<vmem>>, vector<1x256xf32>
    %544 = vector.broadcast %543 : vector<1x256xf32> to vector<8x256xf32>
    %545 = arith.addf %542, %544 : vector<8x256xf32>
    %cst_289 = arith.constant 0.000000e+00 : f32
    %546 = vector.broadcast %cst_289 : f32 to vector<8x256xf32>
    %547 = arith.maximumf %545, %546 : vector<8x256xf32>
    %548 = arith.truncf %547 : vector<8x256xf32> to vector<8x256xbf16>
    %c0_290 = arith.constant 0 : index
    %c0_291 = arith.constant 0 : index
    %549 = vector.load %arg11[%c0_290, %c0_291] : memref<256x128xbf16, #tpu.memory_space<vmem>>, vector<256x128xbf16>
    %cst_292 = arith.constant dense<0.000000e+00> : vector<8x128xf32>
    %550 = tpu.matmul %548, %549, %cst_292 {dimension_numbers = #tpu.dot_dimension_numbers<[1], [0], [0], [1], [0, 0, 1, 1], [], []>} : vector<8x256xbf16>, vector<256x128xbf16>, vector<8x128xf32> -> vector<8x128xf32>
    %c0_293 = arith.constant 0 : index
    %c0_294 = arith.constant 0 : index
    %551 = vector.load %arg12[%c0_293, %c0_294] : memref<1x128xf32, #tpu.memory_space<vmem>>, vector<1x128xf32>
    %552 = vector.broadcast %551 : vector<1x128xf32> to vector<8x128xf32>
    %553 = arith.addf %550, %552 : vector<8x128xf32>
    %cst_295 = arith.constant 0.000000e+00 : f32
    %554 = vector.broadcast %cst_295 : f32 to vector<8x128xf32>
    %555 = arith.maximumf %553, %554 : vector<8x128xf32>
    %556 = arith.truncf %555 : vector<8x128xf32> to vector<8x128xbf16>
    %c0_296 = arith.constant 0 : index
    %c0_297 = arith.constant 0 : index
    %557 = vector.load %arg13[%c0_296, %c0_297] : memref<128x128xbf16, #tpu.memory_space<vmem>>, vector<128x128xbf16>
    %cst_298 = arith.constant dense<0.000000e+00> : vector<8x128xf32>
    %558 = tpu.matmul %556, %557, %cst_298 {dimension_numbers = #tpu.dot_dimension_numbers<[1], [0], [0], [1], [0, 0, 1, 1], [], []>} : vector<8x128xbf16>, vector<128x128xbf16>, vector<8x128xf32> -> vector<8x128xf32>
    %c0_299 = arith.constant 0 : index
    %c0_300 = arith.constant 0 : index
    %559 = vector.load %arg14[%c0_299, %c0_300] : memref<1x128xf32, #tpu.memory_space<vmem>>, vector<1x128xf32>
    %560 = vector.broadcast %559 : vector<1x128xf32> to vector<8x128xf32>
    %561 = arith.addf %558, %560 : vector<8x128xf32>
    %c0_301 = arith.constant 0 : index
    %c0_302 = arith.constant 0 : index
    %562 = vector.load %arg15[%c0_301, %c0_302] : memref<8x128xf32, #tpu.memory_space<vmem>>, vector<8x128xf32>
    tpu.vector_store %arg15[%c0_301, %c0_302], %561 {strides = array<i32>} : memref<8x128xf32, #tpu.memory_space<vmem>>, vector<8x128xf32>,
    return
  }
  func.func @transform_0(%arg0: i32) -> (i32, i32, i32) {
    %c0_i32 = arith.constant 0 : i32
    %c0_i32_0 = arith.constant 0 : i32
    %c0_i32_1 = arith.constant 0 : i32
    return %c0_i32, %arg0, %c0_i32_0 : i32, i32, i32
  }
  func.func @transform_1(%arg0: i32) -> (i32, i32, i32) {
    %c0_i32 = arith.constant 0 : i32
    %c0_i32_0 = arith.constant 0 : i32
    %c0_i32_1 = arith.constant 0 : i32
    return %c0_i32, %arg0, %c0_i32_0 : i32, i32, i32
  }
  func.func @transform_2(%arg0: i32) -> (i32, i32) {
    %c0_i32 = arith.constant 0 : i32
    %c0_i32_0 = arith.constant 0 : i32
    %c0_i32_1 = arith.constant 0 : i32
    return %c0_i32, %c0_i32_0 : i32, i32
  }
  func.func @transform_3(%arg0: i32) -> (i32, i32) {
    %c0_i32 = arith.constant 0 : i32
    %c0_i32_0 = arith.constant 0 : i32
    %c0_i32_1 = arith.constant 0 : i32
    return %c0_i32, %c0_i32_0 : i32, i32
  }
  func.func @transform_4(%arg0: i32) -> (i32, i32) {
    %c0_i32 = arith.constant 0 : i32
    %c0_i32_0 = arith.constant 0 : i32
    %c0_i32_1 = arith.constant 0 : i32
    return %c0_i32, %c0_i32_0 : i32, i32
  }
  func.func @transform_5(%arg0: i32) -> (i32, i32) {
    %c0_i32 = arith.constant 0 : i32
    %c0_i32_0 = arith.constant 0 : i32
    %c0_i32_1 = arith.constant 0 : i32
    return %c0_i32, %c0_i32_0 : i32, i32
  }
  func.func @transform_6(%arg0: i32) -> (i32, i32) {
    %c0_i32 = arith.constant 0 : i32
    %c0_i32_0 = arith.constant 0 : i32
    %c0_i32_1 = arith.constant 0 : i32
    return %c0_i32, %c0_i32_0 : i32, i32
  }
  func.func @transform_7(%arg0: i32) -> (i32, i32) {
    %c0_i32 = arith.constant 0 : i32
    %c0_i32_0 = arith.constant 0 : i32
    %c0_i32_1 = arith.constant 0 : i32
    return %c0_i32, %c0_i32_0 : i32, i32
  }
  func.func @transform_8(%arg0: i32) -> (i32, i32, i32) {
    %c0_i32 = arith.constant 0 : i32
    %c0_i32_0 = arith.constant 0 : i32
    %c0_i32_1 = arith.constant 0 : i32
    %c0_i32_2 = arith.constant 0 : i32
    return %c0_i32, %c0_i32_0, %c0_i32_1 : i32, i32, i32
  }
  func.func @transform_9(%arg0: i32) -> (i32, i32) {
    %c0_i32 = arith.constant 0 : i32
    %c0_i32_0 = arith.constant 0 : i32
    %c0_i32_1 = arith.constant 0 : i32
    return %c0_i32, %c0_i32_0 : i32, i32
  }
  func.func @transform_10(%arg0: i32) -> (i32, i32) {
    %c0_i32 = arith.constant 0 : i32
    %c0_i32_0 = arith.constant 0 : i32
    %c0_i32_1 = arith.constant 0 : i32
    return %c0_i32, %c0_i32_0 : i32, i32
  }
  func.func @transform_11(%arg0: i32) -> (i32, i32) {
    %c0_i32 = arith.constant 0 : i32
    %c0_i32_0 = arith.constant 0 : i32
    %c0_i32_1 = arith.constant 0 : i32
    return %c0_i32, %c0_i32_0 : i32, i32
  }
  func.func @transform_12(%arg0: i32) -> (i32, i32) {
    %c0_i32 = arith.constant 0 : i32
    %c0_i32_0 = arith.constant 0 : i32
    %c0_i32_1 = arith.constant 0 : i32
    return %c0_i32, %c0_i32_0 : i32, i32
  }
  func.func @transform_13(%arg0: i32) -> (i32, i32) {
    %c0_i32 = arith.constant 0 : i32
    %c0_i32_0 = arith.constant 0 : i32
    %c0_i32_1 = arith.constant 0 : i32
    return %c0_i32, %c0_i32_0 : i32, i32
  }
  func.func @transform_14(%arg0: i32) -> (i32, i32) {
    %c0_i32 = arith.constant 0 : i32
    %c0_i32_0 = arith.constant 0 : i32
    return %arg0, %c0_i32 : i32, i32
  }
}

</mosaic_0001>

<bundles_post_ra>
// kernel: tpu_custom_call.1
= control target key start
LH: loop header
LB: loop body
LE: loop exit
PB: predicated region body
PF: predicated region fallthrough
CT: control target
= control target key end

     0   :  { %19 = vsyncpa [#allocation3], 0  ;;  %s10166_s0 = inlined_call_operand.vmem [shape: f32[21,8,1], index: 0, kind: input, shape index: {}]   ;;  %s10167_s1 = inlined_call_operand.vmem [shape: f32[21,8,1], index: 1, kind: input, shape index: {}]   ;;  %s10168_s2 = inlined_call_operand.hbm [shape: f32[2,256], index: 2, kind: input, shape index: {}]   ;;  %s10169_s3 = inlined_call_operand.hbm [shape: f32[1,256], index: 3, kind: input, shape index: {}]   ;;  %s10170_s4 = inlined_call_operand.hbm [shape: bf16[256,128], index: 4, kind: input, shape index: {}]   ;;  %s10171_s5 = inlined_call_operand.hbm [shape: f32[1,128], index: 5, kind: input, shape index: {}]   ;;  %s10172_s6 = inlined_call_operand.hbm [shape: bf16[128,128], index: 6, kind: input, shape index: {}]   ;;  %s10173_s7 = inlined_call_operand.hbm [shape: f32[1,128], index: 7, kind: input, shape index: {}]   ;;  %s10174_s8 = inlined_call_operand.hbm [shape: bf16[21,128,256], index: 8, kind: input, shape index: {}]   ;;  %s10175_s9 = inlined_call_operand.hbm [shape: f32[1,256], index: 9, kind: input, shape index: {}]   ;;  %s10176_s10 = inlined_call_operand.hbm [shape: bf16[256,128], index: 10, kind: input, shape index: {}]   ;;  %s10177_s11 = inlined_call_operand.hbm [shape: f32[1,128], index: 11, kind: input, shape index: {}]   ;;  %s10178_s12 = inlined_call_operand.hbm [shape: bf16[128,128], index: 12, kind: input, shape index: {}]   ;;  %s10179_s13 = inlined_call_operand.hbm [shape: f32[1,128], index: 13, kind: input, shape index: {}]   ;;  %s10180_s14 = inlined_call_operand.hbm [shape: f32[8,128], index: 14, kind: output, shape index: {}]  }
   0x1   :  { %20 = vsyncpa [#allocation6], 0 }
   0x2   :  { %21 = vsyncpa [#allocation9], 0 }
   0x3   :  { %22 = vsyncpa [#allocation12], 0 }
   0x4   :  { %23 = vsyncpa [#allocation15], 0 }
   0x5   :  { %24 = vsyncpa [#allocation18], 0 }
   0x6   :  { %25 = vsyncpa [#allocation21], 0 }
   0x7   :  { %26 = vsyncpa [#allocation4], 0  ;;  %s8517_s29 = smov [#allocation5]   ;;  %s8518_s15 = smov [#allocation8]  }
   0x8   :  { %s47_s30 = sshll.u32 %s8517_s29, 4  ;;  %s69_s16 = sshll.u32 %s8518_s15, 4  ;;  %s48_s30 = int_to_ptr.vmem [resolvable:$true] %s47_s30  ;;  %s70_s16 = int_to_ptr.vmem [resolvable:$true] %s69_s16 }
   0x9   :  { %s8215_s19 = scalar_lea.hbm %s10169_s3, 32 }
   0xa   :  { %p8216_p0 = scmp.ne.s32.totalorder %s10169_s3, %s8215_s19  ;;  %p8219_p1 = scmp.lt.u32.totalorder %s8215_s19, %s10169_s3 }
   0xc   :  { %p8221_p2 = pnand %p8219_p1, %p8216_p0 }
   0xe   :  { %8224 = shalt.err (!%p8221_p2)
}
   0xf   :  { %s8225_s24 = scalar_lea.vmem %s48_s30, 32  ;;  %p8230_p4 = scmp.lt.s32.totalorder %s48_s30, %s48_s30 }
  0x10   :  { %p8226_p3 = scmp.ne.s32.totalorder %s48_s30, %s8225_s24  ;;  %p8231_p5 = scmp.lt.s32.totalorder %s8225_s24, %s8225_s24 }
  0x12   :  { %p8232_p6 = por %p8231_p5, %p8230_p4 }
  0x14   :  { %p8233_p7 = pnand %p8232_p6, %p8226_p3 }
  0x16   :  { %8236 = shalt.err (!%p8233_p7)
}
  0x17   :  { %50 = dma.hbm_to_vmem [thread:$0]  %s10169_s3, 32, %s48_s30, [#allocation6]  }
  0x18   :  { %s8237_s29 = scalar_lea.hbm %s10171_s5, 16 }
  0x19   :  { %p8238_p8 = scmp.ne.s32.totalorder %s10171_s5, %s8237_s29  ;;  %p8241_p9 = scmp.lt.u32.totalorder %s8237_s29, %s10171_s5 }
  0x1b   :  { %p8243_p10 = pnand %p8241_p9, %p8238_p8 }
  0x1d   :  { %8246 = shalt.err (!%p8243_p10)
}
  0x1e   :  { %s8247_s20 = scalar_lea.vmem %s70_s16, 16  ;;  %s8251_s21 = scalar_lea.vmem %s70_s16, 32 }
  0x1f   :  { %p8248_p11 = scmp.ne.s32.totalorder %s70_s16, %s8247_s20  ;;  %p8252_p12 = scmp.lt.s32.totalorder %s70_s16, %s70_s16 }
  0x20   :  { %p8253_p13 = scmp.lt.s32.totalorder %s8251_s21, %s8247_s20 }
  0x22   :  { %p8254_p0 = por %p8253_p13, %p8252_p12 }
  0x24   :  { %p8255_p1 = pnand %p8254_p0, %p8248_p11 }
  0x26   :  { %8258 = shalt.err (!%p8255_p1)
}
  0x27   :  { %72 = dma.hbm_to_vmem [thread:$0]  %s10171_s5, 16, %s70_s16, [#allocation9]  }
  0x28   :  { %s8519_s22 = smov [#allocation11]   ;;  %s8520_s24 = smov [#allocation14]  }
  0x29   :  { %s91_s23 = sshll.u32 %s8519_s22, 4  ;;  %s113_s25 = sshll.u32 %s8520_s24, 4  ;;  %s92_s23 = int_to_ptr.vmem [resolvable:$true] %s91_s23  ;;  %s114_s25 = int_to_ptr.vmem [resolvable:$true] %s113_s25 }
  0x2a   :  { %s8259_s28 = scalar_lea.hbm %s10173_s7, 16 }
  0x2b   :  { %p8260_p2 = scmp.ne.s32.totalorder %s10173_s7, %s8259_s28  ;;  %p8263_p3 = scmp.lt.u32.totalorder %s8259_s28, %s10173_s7 }
  0x2d   :  { %p8265_p4 = pnand %p8263_p3, %p8260_p2 }
  0x2f   :  { %8268 = shalt.err (!%p8265_p4)
}
  0x30   :  { %s8269_s5 = scalar_lea.vmem %s92_s23, 16  ;;  %s8273_s16 = scalar_lea.vmem %s92_s23, 32 }
  0x31   :  { %p8270_p5 = scmp.ne.s32.totalorder %s92_s23, %s8269_s5  ;;  %p8274_p6 = scmp.lt.s32.totalorder %s92_s23, %s92_s23 }
  0x32   :  { %p8275_p7 = scmp.lt.s32.totalorder %s8273_s16, %s8269_s5 }
  0x34   :  { %p8276_p8 = por %p8275_p7, %p8274_p6 }
  0x36   :  { %p8277_p9 = pnand %p8276_p8, %p8270_p5 }
  0x38   :  { %8280 = shalt.err (!%p8277_p9)
}
  0x39   :  { %94 = dma.hbm_to_vmem [thread:$0]  %s10173_s7, 16, %s92_s23, [#allocation12]  }
  0x3a   :  { %s8281_s30 = scalar_lea.hbm %s10175_s9, 32 }
  0x3b   :  { %p8282_p10 = scmp.ne.s32.totalorder %s10175_s9, %s8281_s30  ;;  %p8285_p11 = scmp.lt.u32.totalorder %s8281_s30, %s10175_s9 }
  0x3d   :  { %p8287_p12 = pnand %p8285_p11, %p8282_p10 }
  0x3f   :  { %8290 = shalt.err (!%p8287_p12)
}
  0x40   :  { %s8291_s28 = scalar_lea.vmem %s114_s25, 32  ;;  %p8296_p0 = scmp.lt.s32.totalorder %s114_s25, %s114_s25 }
  0x41   :  { %p8292_p13 = scmp.ne.s32.totalorder %s114_s25, %s8291_s28  ;;  %p8297_p1 = scmp.lt.s32.totalorder %s8291_s28, %s8291_s28 }
  0x43   :  { %p8298_p2 = por %p8297_p1, %p8296_p0 }
  0x45   :  { %p8299_p3 = pnand %p8298_p2, %p8292_p13 }
  0x47   :  { %8302 = shalt.err (!%p8299_p3)
}
  0x48   :  { %116 = dma.hbm_to_vmem [thread:$0]  %s10175_s9, 32, %s114_s25, [#allocation15]  }
  0x49   :  { %s8521_s29 = smov [#allocation17]   ;;  %s8522_s17 = smov [#allocation2]  }
  0x4a   :  { %s135_s15 = sshll.u32 %s8521_s29, 4  ;;  %s37_s18 = sshll.u32 %s8522_s17, 4  ;;  %s136_s15 = int_to_ptr.vmem [resolvable:$true] %s135_s15  ;;  %s38_s18 = int_to_ptr.vmem [resolvable:$true] %s37_s18 }
  0x4b   :  { %s8303_s19 = scalar_lea.hbm %s10177_s11, 16 }
  0x4c   :  { %p8304_p4 = scmp.ne.s32.totalorder %s10177_s11, %s8303_s19  ;;  %p8307_p5 = scmp.lt.u32.totalorder %s8303_s19, %s10177_s11 }
  0x4e   :  { %p8309_p6 = pnand %p8307_p5, %p8304_p4 }
  0x50   :  { %8312 = shalt.err (!%p8309_p6)
}
  0x51   :  { %s8313_s9 = scalar_lea.vmem %s136_s15, 16  ;;  %s8317_s25 = scalar_lea.vmem %s136_s15, 32 }
  0x52   :  { %p8314_p7 = scmp.ne.s32.totalorder %s136_s15, %s8313_s9  ;;  %p8318_p8 = scmp.lt.s32.totalorder %s136_s15, %s136_s15 }
  0x53   :  { %p8319_p9 = scmp.lt.s32.totalorder %s8317_s25, %s8313_s9 }
  0x55   :  { %p8320_p10 = por %p8319_p9, %p8318_p8 }
  0x57   :  { %p8321_p11 = pnand %p8320_p10, %p8314_p7 }
  0x59   :  { %8324 = shalt.err (!%p8321_p11)
}
  0x5a   :  { %138 = dma.hbm_to_vmem [thread:$0]  %s10177_s11, 16, %s136_s15, [#allocation18]  }
  0x5b   :  { %s8325_s28 = scalar_lea.hbm %s10168_s2, 64 }
  0x5c   :  { %p8326_p12 = scmp.ne.s32.totalorder %s10168_s2, %s8325_s28  ;;  %p8329_p13 = scmp.lt.u32.totalorder %s8325_s28, %s10168_s2 }
  0x5e   :  { %p8331_p0 = pnand %p8329_p13, %p8326_p12 }
  0x60   :  { %8334 = shalt.err (!%p8331_p0)
}
  0x61   :  { %s8335_s5 = scalar_lea.vmem %s38_s18, 64  ;;  %p8340_p2 = scmp.lt.s32.totalorder %s38_s18, %s38_s18 }
  0x62   :  { %p8336_p1 = scmp.ne.s32.totalorder %s38_s18, %s8335_s5  ;;  %p8341_p3 = scmp.lt.s32.totalorder %s8335_s5, %s8335_s5 }
  0x64   :  { %p8342_p4 = por %p8341_p3, %p8340_p2 }
  0x66   :  { %p8343_p5 = pnand %p8342_p4, %p8336_p1 }
  0x68   :  { %8346 = shalt.err (!%p8343_p5)
}
  0x69   :  { %40 = dma.hbm_to_vmem [thread:$0]  %s10168_s2, 64, %s38_s18, [#allocation3]  }
  0x6a   :  { %s8523_s16 = smov [#allocation7]   ;;  %s8347_s3 = scalar_lea.hbm %s10170_s4, 2048 }
  0x6b   :  { %s56_s19 = sshll.u32 %s8523_s16, 4  ;;  %p8348_p6 = scmp.ne.s32.totalorder %s10170_s4, %s8347_s3  ;;  %s57_s19 = int_to_ptr.vmem [resolvable:$true] %s56_s19 }
  0x6c   :  { %p8351_p7 = scmp.lt.u32.totalorder %s8347_s3, %s10170_s4 }
  0x6e   :  { %p8353_p8 = pnand %p8351_p7, %p8348_p6 }
  0x70   :  { %8356 = shalt.err (!%p8353_p8)
}
  0x71   :  { %s8357_s24 = scalar_lea.vmem %s57_s19, 2048  ;;  %p8362_p10 = scmp.lt.s32.totalorder %s57_s19, %s57_s19 }
  0x72   :  { %p8358_p9 = scmp.ne.s32.totalorder %s57_s19, %s8357_s24  ;;  %p8363_p11 = scmp.lt.s32.totalorder %s8357_s24, %s8357_s24 }
  0x74   :  { %p8364_p12 = por %p8363_p11, %p8362_p10 }
  0x76   :  { %p8365_p13 = pnand %p8364_p12, %p8358_p9 }
  0x78   :  { %8368 = shalt.err (!%p8365_p13)
}
  0x79   :  { %s8524_s2 = smov 64   ;;  %s8525_s18 = smov 4  }
  0x7a   :  { %62 = dma.hbm_to_vmem [thread:$0]  %s10170_s4, 2048, %s57_s19, [#allocation6], %s8524_s2, %s8524_s2, %s8525_s18  }
  0x7b   :  { %s8526_s28 = smov [#allocation10]   ;;  %s8527_s23 = smov [#allocation13]  }
  0x7c   :  { %s78_s7 = sshll.u32 %s8526_s28, 4  ;;  %s100_s29 = sshll.u32 %s8527_s23, 4  ;;  %s79_s7 = int_to_ptr.vmem [resolvable:$true] %s78_s7  ;;  %s101_s29 = int_to_ptr.vmem [resolvable:$true] %s100_s29 }
  0x7d   :  { %s8369_s11 = scalar_lea.hbm %s10172_s6, 1024 }
  0x7e   :  { %p8370_p0 = scmp.ne.s32.totalorder %s10172_s6, %s8369_s11  ;;  %p8373_p1 = scmp.lt.u32.totalorder %s8369_s11, %s10172_s6 }
  0x80   :  { %p8375_p2 = pnand %p8373_p1, %p8370_p0 }
  0x82   :  { %8378 = shalt.err (!%p8375_p2)
}
  0x83   :  { %s8379_s4 = scalar_lea.vmem %s79_s7, 1024  ;;  %p8384_p4 = scmp.lt.s32.totalorder %s79_s7, %s79_s7 }
  0x84   :  { %p8380_p3 = scmp.ne.s32.totalorder %s79_s7, %s8379_s4  ;;  %p8385_p5 = scmp.lt.s32.totalorder %s8379_s4, %s8379_s4 }
  0x86   :  { %p8386_p6 = por %p8385_p5, %p8384_p4 }
  0x88   :  { %p8387_p7 = pnand %p8386_p6, %p8380_p3 }
  0x8a   :  { %8390 = shalt.err (!%p8387_p7)
}
  0x8b   :  { %84 = dma.hbm_to_vmem [thread:$0]  %s10172_s6, 1024, %s79_s7, [#allocation9], %s8524_s2, %s8524_s2, %s8525_s18  }
  0x8c   :  { %s8391_s25 = scalar_lea.hbm %s10174_s8, 43008 }
  0x8d   :  { %p8392_p8 = scmp.ne.s32.totalorder %s10174_s8, %s8391_s25  ;;  %p8395_p9 = scmp.lt.u32.totalorder %s8391_s25, %s10174_s8 }
  0x8f   :  { %p8397_p10 = pnand %p8395_p9, %p8392_p8 }
  0x91   :  { %8400 = shalt.err (!%p8397_p10)
}
  0x92   :  { %s8401_s28 = scalar_lea.vmem %s101_s29, 43008  ;;  %p8406_p12 = scmp.lt.s32.totalorder %s101_s29, %s101_s29 }
  0x93   :  { %p8402_p11 = scmp.ne.s32.totalorder %s101_s29, %s8401_s28  ;;  %p8407_p13 = scmp.lt.s32.totalorder %s8401_s28, %s8401_s28 }
  0x95   :  { %p8408_p0 = por %p8407_p13, %p8406_p12 }
  0x97   :  { %p8409_p1 = pnand %p8408_p0, %p8402_p11 }
  0x99   :  { %8412 = shalt.err (!%p8409_p1)
}
  0x9a   :  { %s8528_s6 = smov 128   ;;  %s8529_s7 = smov 8  }
  0x9b   :  { %106 = dma.hbm_to_vmem [thread:$0]  %s10174_s8, 43008, %s101_s29, [#allocation12], %s8528_s6, %s8528_s6, %s8529_s7  }
  0x9c   :  { %s8530_s5 = smov [#allocation16]   ;;  %s8531_s15 = smov [#allocation19]  }
  0x9d   :  { %s122_s11 = sshll.u32 %s8530_s5, 4  ;;  %s144_s16 = sshll.u32 %s8531_s15, 4  ;;  %s123_s11 = int_to_ptr.vmem [resolvable:$true] %s122_s11  ;;  %s145_s16 = int_to_ptr.vmem [resolvable:$true] %s144_s16 }
  0x9e   :  { %s8413_s4 = scalar_lea.hbm %s10176_s10, 2048 }
  0x9f   :  { %p8414_p2 = scmp.ne.s32.totalorder %s10176_s10, %s8413_s4  ;;  %p8417_p3 = scmp.lt.u32.totalorder %s8413_s4, %s10176_s10 }
  0xa1   :  { %p8419_p4 = pnand %p8417_p3, %p8414_p2 }
  0xa3   :  { %8422 = shalt.err (!%p8419_p4)
}
  0xa4   :  { %s8423_s8 = scalar_lea.vmem %s123_s11, 2048  ;;  %p8428_p6 = scmp.lt.s32.totalorder %s123_s11, %s123_s11 }
  0xa5   :  { %p8424_p5 = scmp.ne.s32.totalorder %s123_s11, %s8423_s8  ;;  %p8429_p7 = scmp.lt.s32.totalorder %s8423_s8, %s8423_s8 }
  0xa7   :  { %p8430_p8 = por %p8429_p7, %p8428_p6 }
  0xa9   :  { %p8431_p9 = pnand %p8430_p8, %p8424_p5 }
  0xab   :  { %8434 = shalt.err (!%p8431_p9)
}
  0xac   :  { %128 = dma.hbm_to_vmem [thread:$0]  %s10176_s10, 2048, %s123_s11, [#allocation15], %s8524_s2, %s8524_s2, %s8525_s18  }
  0xad   :  { %s8435_s26 = scalar_lea.hbm %s10178_s12, 1024 }
  0xae   :  { %p8436_p10 = scmp.ne.s32.totalorder %s10178_s12, %s8435_s26  ;;  %p8439_p11 = scmp.lt.u32.totalorder %s8435_s26, %s10178_s12 }
  0xb0   :  { %p8441_p12 = pnand %p8439_p11, %p8436_p10 }
  0xb2   :  { %8444 = shalt.err (!%p8441_p12)
}
  0xb3   :  { %s8445_s23 = scalar_lea.vmem %s145_s16, 1024  ;;  %p8450_p0 = scmp.lt.s32.totalorder %s145_s16, %s145_s16 }
  0xb4   :  { %p8446_p13 = scmp.ne.s32.totalorder %s145_s16, %s8445_s23  ;;  %p8451_p1 = scmp.lt.s32.totalorder %s8445_s23, %s8445_s23 }
  0xb6   :  { %p8452_p2 = por %p8451_p1, %p8450_p0 }
  0xb8   :  { %p8453_p3 = pnand %p8452_p2, %p8446_p13 }
  0xba   :  { %8456 = shalt.err (!%p8453_p3)
}
  0xbb   :  { %150 = dma.hbm_to_vmem [thread:$0]  %s10178_s12, 1024, %s145_s16, [#allocation18], %s8524_s2, %s8524_s2, %s8525_s18  }
  0xbc   :  { %s8532_s5 = smov [#allocation20]   ;;  %s8457_s21 = scalar_lea.hbm %s10179_s13, 16 }
  0xbd   :  { %s157_s11 = sshll.u32 %s8532_s5, 4  ;;  %p8458_p4 = scmp.ne.s32.totalorder %s10179_s13, %s8457_s21  ;;  %s158_s11 = int_to_ptr.vmem [resolvable:$true] %s157_s11 }
  0xbe   :  { %p8461_p5 = scmp.lt.u32.totalorder %s8457_s21, %s10179_s13 }
  0xc0   :  { %p8463_p6 = pnand %p8461_p5, %p8458_p4 }
  0xc2   :  { %8466 = shalt.err (!%p8463_p6)
}
  0xc3   :  { %s8467_s9 = scalar_lea.vmem %s158_s11, 16  ;;  %s8471_s12 = scalar_lea.vmem %s158_s11, 32 }
  0xc4   :  { %p8468_p7 = scmp.ne.s32.totalorder %s158_s11, %s8467_s9  ;;  %p8472_p8 = scmp.lt.s32.totalorder %s158_s11, %s158_s11 }
  0xc5   :  { %p8473_p9 = scmp.lt.s32.totalorder %s8471_s12, %s8467_s9 }
  0xc7   :  { %p8474_p10 = por %p8473_p9, %p8472_p8 }
  0xc9   :  { %p8475_p11 = pnand %p8474_p10, %p8468_p7 }
  0xcb   :  { %8478 = shalt.err (!%p8475_p11)
}
  0xcc   :  { %160 = dma.hbm_to_vmem [thread:$0]  %s10179_s13, 16, %s158_s11, [#allocation21]  }
  0xcd   :  { %8501 = dma.done.wait [#allocation3], 64  }
  0xce   :  { %8502 = vsyncadd [#allocation3], 4294967232 }
  0xcf   :  { %8503 = dma.done.wait [#allocation6], 2080  }
  0xd0   :  { %8504 = vsyncadd [#allocation6], 4294965216 }
  0xd1   :  { %8505 = dma.done.wait [#allocation9], 1040  }
  0xd2   :  { %8506 = vsyncadd [#allocation9], 4294966256 }
  0xd3   :  { %8507 = dma.done.wait [#allocation12], 43024  }
  0xd4   :  { %8508 = vsyncadd [#allocation12], 4294924272 }
  0xd5   :  { %8509 = dma.done.wait [#allocation15], 2080  }
  0xd6   :  { %8510 = vsyncadd [#allocation15], 4294965216 }
  0xd7   :  { %8511 = dma.done.wait [#allocation18], 1040  }
  0xd8   :  { %8512 = vsyncadd [#allocation18], 4294966256 }
  0xd9   :  { %8513 = dma.done.wait [#allocation21], 16  }
  0xda   :  { %8514 = vsyncadd [#allocation21], 4294967280  ;;  %v8533_v0 = vmov 0   ;;  %v6017_v1 = vld [vmem:[%s10166_s0 + $0x8] sm:$0xff]  ;;  %v297_v2 = vld [vmem:[%s10166_s0] sm:$0xff]  ;;  %v8534_v60 = vmov 0.0  }
  0xdb   :  { %7562 = vset.pattern.permute.xlu1 %v8533_v0  ;;  %7561 = vset.pattern.permute.xlu0 %v8533_v0  ;;  %v6018_v3 = vld [vmem:[%s10167_s1 + $0x8] sm:$0xff]  ;;  %v298_v4 = vld [vmem:[%s10167_s1] sm:$0xff]  ;;  %v6052_v5 = vld [vmem:[%s10167_s1 + $0x10] sm:$0xff]  ;;  %vm8535_vm0 = vmmov 0  }
  0xdc   :  { %570 = vperm.xlu1 %7562, %v6017_v1   ;;  %301 = vperm.xlu0 %7561, %v297_v2   ;;  %v6051_v6 = vld [vmem:[%s10166_s0 + $0x10] sm:$0xff]  ;;  %v6070_v7 = vld [vmem:[%s10167_s1 + $0x18] sm:$0xff]  ;;  %v6088_v9 = vld [vmem:[%s10167_s1 + $0x20] sm:$0xff] }
  0xdd   :  { %v6069_v8 = vld [vmem:[%s10166_s0 + $0x18] sm:$0xff]  ;;  %v6087_v10 = vld [vmem:[%s10166_s0 + $0x20] sm:$0xff]  ;;  %v8800_v11 = vld [vmem:[#allocation7 + $0x40] sm:$0xff]   ;;  %7101 = vmatprep.subr.bf16.mxu1 %v8534_v60  ;;  %7117 = vmatprep.mubr.msk.bf16.mxu1 %vm8535_vm0, %v8534_v60 }
  0xde   :  { %v7564_v12 = vld [vmem:[#allocation7] sm:$0xff]   ;;  %6419 = vmatprep.subr.bf16.mxu0 %v8800_v11  ;;  %v7565_v14 = vld [vmem:[#allocation7 + $0x48] sm:$0xff]   ;;  %v7567_v17 = vld [vmem:[#allocation7 + $0x50] sm:$0xff]  }
  0xdf   :  { %v6106_v13 = vld [vmem:[%s10167_s1 + $0x28] sm:$0xff]  ;;  %6420 = vmatpush3.bf16.msra.mxu0 %v7564_v12  ;;  %v7566_v16 = vld [vmem:[#allocation7 + $0x8] sm:$0xff]   ;;  %v7568_v20 = vld [vmem:[#allocation7 + $0x10] sm:$0xff]  }
  0xe0   :  { %577 = vperm.xlu1 %7562, %v6018_v3   ;;  %308 = vperm.xlu0 %7561, %v298_v4   ;;  %v6105_v15 = vld [vmem:[%s10166_s0 + $0x28] sm:$0xff]  ;;  %v6124_v18 = vld [vmem:[%s10167_s1 + $0x30] sm:$0xff]  ;;  %v6142_v22 = vld [vmem:[%s10167_s1 + $0x38] sm:$0xff]  ;;  %v200_v3 = vlaneseq }
  0xe1   :  { %6421 = vmatprep.subr.bf16.mxu0 %v7565_v14  ;;  %v6123_v19 = vld [vmem:[%s10166_s0 + $0x30] sm:$0xff]  ;;  %v7569_v21 = vld [vmem:[#allocation7 + $0x58] sm:$0xff]   ;;  %v6141_v23 = vld [vmem:[%s10166_s0 + $0x38] sm:$0xff] }
  0xe2   :  { %v7570_v24 = vld [vmem:[#allocation7 + $0x18] sm:$0xff]   ;;  %v7571_v25 = vld [vmem:[#allocation7 + $0x60] sm:$0xff]   ;;  %v7573_v29 = vld [vmem:[#allocation7 + $0x68] sm:$0xff]   ;;  %v201_v4 = vshrl.u32 %v200_v3, 7 }
  0xe3   :  { %6422 = vmatpush3.bf16.msra.mxu0 %v7566_v16  ;;  %v6160_v26 = vld [vmem:[%s10167_s1 + $0x40] sm:$0xff]  ;;  %v7572_v28 = vld [vmem:[#allocation7 + $0x20] sm:$0xff]   ;;  %v7574_v32 = vld [vmem:[#allocation7 + $0x28] sm:$0xff]  }
  0xe4   :  { %945 = vperm.xlu1 %7562, %v6052_v5   ;;  %938 = vperm.xlu0 %7561, %v6051_v6   ;;  %v6159_v27 = vld [vmem:[%s10166_s0 + $0x40] sm:$0xff]  ;;  %v6178_v30 = vld [vmem:[%s10167_s1 + $0x48] sm:$0xff]  ;;  %v6196_v34 = vld [vmem:[%s10167_s1 + $0x50] sm:$0xff]  ;;  %v8931_v6 = vsub.s32 0, %v201_v4 }
  0xe5   :  { %6423 = vmatprep.subr.bf16.mxu0 %v7567_v17  ;;  %v6177_v31 = vld [vmem:[%s10166_s0 + $0x48] sm:$0xff]  ;;  %v7575_v33 = vld [vmem:[#allocation7 + $0x70] sm:$0xff]   ;;  %v6195_v35 = vld [vmem:[%s10166_s0 + $0x50] sm:$0xff] }
  0xe6   :  { %v7576_v36 = vld [vmem:[#allocation7 + $0x30] sm:$0xff]   ;;  %v8839_v37 = vld [vmem:[#allocation7 + $0x78] sm:$0xff]   ;;  %v6268_v45 = vld [vmem:[%s10167_s1 + $0x70] sm:$0xff] }
  0xe7   :  { %6424 = vmatpush3.bf16.msra.mxu0 %v7568_v20  ;;  %v6214_v38 = vld [vmem:[%s10167_s1 + $0x58] sm:$0xff]  ;;  %v8847_v40 = vld [vmem:[#allocation7 + $0x38] sm:$0xff]   ;;  %v6267_v46 = vld [vmem:[%s10166_s0 + $0x70] sm:$0xff] }
  0xe8   :  { %1194 = vperm.xlu1 %7562, %v6070_v7   ;;  %1187 = vperm.xlu0 %7561, %v6069_v8   ;;  %v6213_v39 = vld [vmem:[%s10166_s0 + $0x58] sm:$0xff]  ;;  %v6232_v41 = vld [vmem:[%s10167_s1 + $0x60] sm:$0xff]  ;;  %v6250_v43 = vld [vmem:[%s10167_s1 + $0x68] sm:$0xff]  ;;  %v8933_v8 = vsub.s32 1, %v201_v4 }
  0xe9   :  { %6425 = vmatprep.subr.bf16.mxu0 %v7569_v21  ;;  %v6231_v42 = vld [vmem:[%s10166_s0 + $0x60] sm:$0xff]  ;;  %v6249_v44 = vld [vmem:[%s10166_s0 + $0x68] sm:$0xff]  ;;  %v6286_v47 = vld [vmem:[%s10167_s1 + $0x78] sm:$0xff] }
  0xea   :  { %v6285_v48 = vld [vmem:[%s10166_s0 + $0x78] sm:$0xff]  ;;  %v6304_v49 = vld [vmem:[%s10167_s1 + $0x80] sm:$0xff]  ;;  %v6322_v51 = vld [vmem:[%s10167_s1 + $0x88] sm:$0xff] }
  0xeb   :  { %6426 = vmatpush3.bf16.msra.mxu0 %v7570_v24  ;;  %v6303_v50 = vld [vmem:[%s10166_s0 + $0x80] sm:$0xff]  ;;  %v6321_v52 = vld [vmem:[%s10166_s0 + $0x88] sm:$0xff]  ;;  %v6340_v53 = vld [vmem:[%s10167_s1 + $0x90] sm:$0xff] }
  0xec   :  { %1443 = vperm.xlu1 %7562, %v6088_v9   ;;  %1436 = vperm.xlu0 %7561, %v6087_v10   ;;  %v6339_v54 = vld [vmem:[%s10166_s0 + $0x90] sm:$0xff]  ;;  %v6358_v55 = vld [vmem:[%s10167_s1 + $0x98] sm:$0xff]  ;;  %v6376_v57 = vld [vmem:[%s10167_s1 + $0xa0] sm:$0xff] }
  0xed   :  { %6427 = vmatprep.subr.bf16.mxu0 %v7571_v25  ;;  %v6357_v56 = vld [vmem:[%s10166_s0 + $0x98] sm:$0xff]  ;;  %v6375_v58 = vld [vmem:[%s10166_s0 + $0xa0] sm:$0xff]  ;;  %v8906_v59 = vld [vmem:[#allocation10] sm:$0xff]   ;;  %s8536_s0 = smov [#allocation22]  }
  0xee   :  { %v8909_v61 = vld [vmem:[#allocation10 + $0x8] sm:$0xff]   ;;  %7102 = vmatpush3.bf16.msra.mxu1 %v8906_v59  ;;  %v8913_v62 = vld [vmem:[#allocation10 + $0x10] sm:$0xff]   ;;  %v8917_v63 = vld [vmem:[#allocation10 + $0x18] sm:$0xff]   ;;  %s5976_s1 = sshll.u32 %s8536_s0, 4  ;;  %s5977_s1 = int_to_ptr.vmem [resolvable:$true] %s5976_s1 }
  0xef   :  { %6428 = vmatpush3.bf16.msra.mxu0 %v7572_v28  ;;  %7103 = vmatprep.subr.bf16.mxu1 %v8534_v60  ;;  %v8921_v1 = vld [vmem:[#allocation10 + $0x20] sm:$0xff]   ;;  %v8925_v2 = vld [vmem:[#allocation10 + $0x28] sm:$0xff]   ;;  %v198_v5 = vld [vmem:[#allocation2] ss:$2 sm:$0x3]  ;;  %s8479_s13 = scalar_lea.vmem %s5977_s1, 128  ;;  %p8484_p13 = scmp.lt.s32.totalorder %s5977_s1, %s5977_s1 }
  0xf0   :  { %1692 = vperm.xlu1 %7562, %v6106_v13   ;;  %1685 = vperm.xlu0 %7561, %v6105_v15   ;;  %v211_v7 = vld [vmem:[#allocation2 + $0x1] ss:$2 sm:$0x3]  ;;  %v8936_v10 = vrot.slane %v198_v5, %v8931_v6  ;;  %v8939_v12 = vrot.slane %v198_v5, %v8933_v8  ;;  %v223_v15 = vld [vmem:[#allocation5] sm:$0x3]  ;;  %v9007_v3 = vld [vmem:[#allocation10 + $0x30] sm:$0xff]   ;;  %p8480_p12 = scmp.ne.s32.totalorder %s5977_s1, %s8479_s13  ;;  %p8485_p0 = scmp.lt.s32.totalorder %s8479_s13, %s8479_s13 }
  0xf1   :  { %6429 = vmatprep.subr.bf16.mxu0 %v7573_v29  ;;  %v8942_v13 = vrot.slane %v211_v7, %v8931_v6  ;;  %v8945_v14 = vrot.slane %v211_v7, %v8933_v8  ;;  %v8954_v24 = vrot.slane %v223_v15, %v8931_v6  ;;  %v8957_v25 = vrot.slane %v223_v15, %v8933_v8  ;;  %v9011_v4 = vld [vmem:[#allocation10 + $0x38] sm:$0xff]  }
  0xf2   :  { %7104 = vmatpush3.bf16.msra.mxu1 %v8909_v61  ;;  %p8486_p1 = por %p8485_p0, %p8484_p13 }
  0xf3   :  { %6430 = vmatpush3.bf16.msra.mxu0 %v7574_v32  ;;  %7105 = vmatprep.subr.bf16.mxu1 %v8534_v60 }
  0xf4   :  { %1941 = vperm.xlu1 %7562, %v6124_v18   ;;  %1934 = vperm.xlu0 %7561, %v6123_v19   ;;  %p8487_p2 = pnand %p8486_p1, %p8480_p12 }
  0xf5   :  { %6431 = vmatprep.subr.bf16.mxu0 %v7575_v33 }
  0xf6   :  { %7106 = vmatpush3.bf16.msra.mxu1 %v8913_v62 }
  0xf7   :  { %6432 = vmatpush3.bf16.msra.mxu0 %v7576_v36  ;;  %7107 = vmatprep.subr.bf16.mxu1 %v8534_v60 }
  0xf8   :  { %2190 = vperm.xlu1 %7562, %v6142_v22   ;;  %2183 = vperm.xlu0 %7561, %v6141_v23  }
  0xf9   :  { %6433 = vmatprep.subr.bf16.mxu0 %v8839_v37 }
  0xfa   :  { %7108 = vmatpush3.bf16.msra.mxu1 %v8917_v63 }
  0xfb   :  { %6434 = vmatpush3.bf16.msra.mxu0 %v8847_v40  ;;  %7109 = vmatprep.subr.bf16.mxu1 %v8534_v60 }
  0xfc   :  { %2439 = vperm.xlu1 %7562, %v6160_v26   ;;  %2432 = vperm.xlu0 %7561, %v6159_v27  }
  0xfd   :  { %6450 = vmatprep.subr.bf16.mxu0 %v8800_v11 }
  0xfe   :  { %7110 = vmatpush3.bf16.msra.mxu1 %v8921_v1 }
  0xff   :  { %7111 = vmatprep.subr.bf16.mxu1 %v8534_v60 }
 0x100   :  { %2688 = vperm.xlu1 %7562, %v6178_v30   ;;  %2681 = vperm.xlu0 %7561, %v6177_v31  }
 0x102   :  { %7112 = vmatpush3.bf16.msra.mxu1 %v8925_v2 }
 0x103   :  { %7113 = vmatprep.subr.bf16.mxu1 %v8534_v60 }
 0x104   :  { %2937 = vperm.xlu1 %7562, %v6196_v34   ;;  %2930 = vperm.xlu0 %7561, %v6195_v35  }
 0x106   :  { %7114 = vmatpush3.bf16.msra.mxu1 %v9007_v3 }
 0x107   :  { %7115 = vmatprep.subr.bf16.mxu1 %v8534_v60 }
 0x108   :  { %3186 = vperm.xlu1 %7562, %v6214_v38   ;;  %3179 = vperm.xlu0 %7561, %v6213_v39   ;;  %v8962_v39 = vld [vmem:[#allocation7] sm:$0xff]  }
 0x10a   :  { %7116 = vmatpush3.bf16.msra.mxu1 %v9011_v4 }
 0x10b   :  { %7121 = vmatprep.subr.bf16.mxu1 %v8534_v60 }
 0x10c   :  { %3435 = vperm.xlu1 %7562, %v6232_v41   ;;  %3428 = vperm.xlu0 %7561, %v6231_v42   ;;  %v8965_v41 = vld [vmem:[#allocation7 + $0x48] sm:$0xff]  }
 0x10d   :  { %v8968_v42 = vld [vmem:[#allocation7 + $0x8] sm:$0xff]  }
 0x110   :  { %3684 = vperm.xlu1 %7562, %v6250_v43   ;;  %3677 = vperm.xlu0 %7561, %v6249_v44   ;;  %v8971_v43 = vld [vmem:[#allocation7 + $0x50] sm:$0xff]  }
 0x111   :  { %v8974_v44 = vld [vmem:[#allocation7 + $0x10] sm:$0xff]  }
 0x114   :  { %3933 = vperm.xlu1 %7562, %v6268_v45   ;;  %3926 = vperm.xlu0 %7561, %v6267_v46   ;;  %v8977_v45 = vld [vmem:[#allocation7 + $0x58] sm:$0xff]  }
 0x115   :  { %v8980_v46 = vld [vmem:[#allocation7 + $0x18] sm:$0xff]  }
 0x118   :  { %4182 = vperm.xlu1 %7562, %v6286_v47   ;;  %4175 = vperm.xlu0 %7561, %v6285_v48  }
 0x11c   :  { %4431 = vperm.xlu1 %7562, %v6304_v49   ;;  %4424 = vperm.xlu0 %7561, %v6303_v50   ;;  %v8985_v49 = vld [vmem:[#allocation7 + $0x60] sm:$0xff]  }
 0x11d   :  { %v8988_v50 = vld [vmem:[#allocation7 + $0x20] sm:$0xff]  }
 0x120   :  { %4680 = vperm.xlu1 %7562, %v6322_v51   ;;  %4673 = vperm.xlu0 %7561, %v6321_v52   ;;  %v8991_v52 = vld [vmem:[#allocation7 + $0x68] sm:$0xff]  }
 0x124   :  { %4929 = vperm.xlu1 %7562, %v6340_v53   ;;  %4922 = vperm.xlu0 %7561, %v6339_v54   ;;  %v8994_v53 = vld [vmem:[#allocation7 + $0x28] sm:$0xff]  }
 0x128   :  { %5178 = vperm.xlu1 %7562, %v6358_v55   ;;  %5171 = vperm.xlu0 %7561, %v6357_v56   ;;  %v8998_v55 = vld [vmem:[#allocation7 + $0x70] sm:$0xff]  }
 0x129   :  { %v9001_v56 = vld [vmem:[#allocation7 + $0x30] sm:$0xff]  }
 0x12c   :  { %5427 = vperm.xlu1 %7562, %v6376_v57   ;;  %5420 = vperm.xlu0 %7561, %v6375_v58  }
 0x15b   :  { %v571_v9 = vpop.permute.xlu1 %570  ;;  %v302_v11 = vpop.permute.xlu0 %301 }
 0x15c   :  { %v574_v16 = vmul.f32 %v571_v9, %v8939_v12  ;;  %v304_v17 = vmul.f32 %v302_v11, %v8936_v10  ;;  %v305_v20 = vmul.f32 %v302_v11, %v8939_v12  ;;  %v573_v47 = vmul.f32 %v571_v9, %v8936_v10 }
 0x15f   :  { %v578_v18 = vpop.permute.xlu1 %577  ;;  %v309_v19 = vpop.permute.xlu0 %308 }
 0x160   :  { %v581_v21 = vmul.f32 %v578_v18, %v8945_v14  ;;  %v311_v22 = vmul.f32 %v309_v19, %v8942_v13  ;;  %v312_v23 = vmul.f32 %v309_v19, %v8945_v14  ;;  %v580_v48 = vmul.f32 %v578_v18, %v8942_v13 }
 0x162   :  { %v583_v26 = vadd.f32 %v581_v21, %v574_v16  ;;  %v313_v27 = vadd.f32 %v311_v22, %v304_v17  ;;  %v314_v28 = vadd.f32 %v312_v23, %v305_v20  ;;  %v582_v51 = vadd.f32 %v580_v48, %v573_v47  ;;  %v7604_v47 = vld [vmem:[#allocation13 + $0x54] ss:$8 sps:$4 sm:$0xff]   ;;  %v7602_v48 = vld [vmem:[#allocation13 + $0x50] ss:$8 sps:$4 sm:$0xff]  }
 0x164   :  { %v316_v29 = vadd.f32 %v314_v28, %v8957_v25  ;;  %v315_v30 = vadd.f32 %v313_v27, %v8954_v24  ;;  %v585_v31 = vadd.f32 %v583_v26, %v8957_v25  ;;  %v584_v54 = vadd.f32 %v582_v51, %v8954_v24  ;;  %v7589_v26 = vld [vmem:[#allocation13 + $0x4] ss:$8 sps:$4 sm:$0xff]   ;;  %v7587_v28 = vld [vmem:[#allocation13] ss:$8 sps:$4 sm:$0xff]  }
 0x165   :  { %v7607_v51 = vld [vmem:[#allocation13 + $0x64] ss:$8 sps:$4 sm:$0xff]  }
 0x166   :  { %v318_v32 = vmax.f32 %v316_v29, 0.0  ;;  %v317_v33 = vmax.f32 %v315_v30, 0.0  ;;  %v587_v34 = vmax.f32 %v585_v31, 0.0  ;;  %v586_v57 = vmax.f32 %v584_v54, 0.0  ;;  %v7592_v30 = vld [vmem:[#allocation13 + $0x14] ss:$8 sps:$4 sm:$0xff]  }
 0x167   :  { %v7590_v31 = vld [vmem:[#allocation13 + $0x10] ss:$8 sps:$4 sm:$0xff]   ;;  %v7605_v54 = vld [vmem:[#allocation13 + $0x60] ss:$8 sps:$4 sm:$0xff]  }
 0x168   :  { %v320_v35 = vpack.c.bf16 %v318_v32, %v318_v32  ;;  %v319_v36 = vpack.c.bf16 %v317_v33, %v317_v33  ;;  %v589_v38 = vpack.c.bf16 %v587_v34, %v587_v34  ;;  %v588_v58 = vpack.c.bf16 %v586_v57, %v586_v57  ;;  %v7595_v32 = vld [vmem:[#allocation13 + $0x24] ss:$8 sps:$4 sm:$0xff]   ;;  %v7593_v33 = vld [vmem:[#allocation13 + $0x20] ss:$8 sps:$4 sm:$0xff]   ;;  %v7598_v34 = vld [vmem:[#allocation13 + $0x34] ss:$8 sps:$4 sm:$0xff]  }
 0x169   :  { %v7610_v57 = vld [vmem:[#allocation13 + $0x74] ss:$8 sps:$4 sm:$0xff]  }
 0x16a   :  { %449 = vmatprep.mubr.bf16.mxu0 %v320_v35  ;;  %v7596_v35 = vld [vmem:[#allocation13 + $0x30] ss:$8 sps:$4 sm:$0xff]  }
 0x16b   :  { %450 = vmatmul.mubr.bf16.vlgmr.msra.gmra.mrb[0].mxu0 %v319_v36  ;;  %v7601_v36 = vld [vmem:[#allocation13 + $0x44] ss:$8 sps:$4 sm:$0xff]  }
 0x16c   :  { %6451 = vmatpush3.bf16.msra.mxu0 %v8962_v39  ;;  %622 = vmatprep.mubr.bf16.mxu0 %v589_v38  ;;  %v7599_v38 = vld [vmem:[#allocation13 + $0x40] ss:$8 sps:$4 sm:$0xff]  }
 0x16d   :  { %6452 = vmatprep.subr.bf16.mxu0 %v8965_v41 }
 0x170   :  { %6453 = vmatpush3.bf16.msra.mxu0 %v8968_v42 }
 0x171   :  { %6454 = vmatprep.subr.bf16.mxu0 %v8971_v43 }
 0x174   :  { %6455 = vmatpush3.bf16.msra.mxu0 %v8974_v44 }
 0x175   :  { %6456 = vmatprep.subr.bf16.mxu0 %v8977_v45 }
 0x178   :  { %6457 = vmatpush3.bf16.msra.mxu0 %v8980_v46 }
 0x179   :  { %6458 = vmatprep.subr.bf16.mxu0 %v8985_v49 }
 0x17c   :  { %6459 = vmatpush3.bf16.msra.mxu0 %v8988_v50 }
 0x17d   :  { %6460 = vmatprep.subr.bf16.mxu0 %v8991_v52 }
 0x180   :  { %6461 = vmatpush3.bf16.msra.mxu0 %v8994_v53 }
 0x181   :  { %6462 = vmatprep.subr.bf16.mxu0 %v8998_v55 }
 0x184   :  { %6463 = vmatpush3.bf16.msra.mxu0 %v9001_v56 }
 0x185   :  { %6464 = vmatprep.subr.bf16.mxu0 %v8839_v37 }
 0x188   :  { %6465 = vmatpush3.bf16.msra.mxu0 %v8847_v40  ;;  %v9017_v40 = vld [vmem:[#allocation8] ss:$0 sm:$0xff] }
 0x18b   :  { %623 = vmatmul.mubr.bf16.vlgmr.msra.gmra.mrb[4].mxu0 %v588_v58  ;;  %v7608_v58 = vld [vmem:[#allocation13 + $0x70] ss:$8 sps:$4 sm:$0xff]  }
 0x18c   :  { %802 = vmatprep.mubr.bf16.mxu0 %v8533_v0 }
 0x23e   :  { %v6435_v37 = vpop.f32.mrb[0].mxu0 }
 0x23f   :  { %v6436_v5 = vpop.f32.mrb[1].mxu0 }
 0x240   :  { %v6437_v7 = vadd.f32 %v6436_v5, %v6435_v37  ;;  %v6438_v9 = vpop.f32.mrb[2].mxu0  ;;  %v7613_v37 = vld [vmem:[#allocation13 + $0x84] ss:$8 sps:$4 sm:$0xff]   ;;  %v7611_v5 = vld [vmem:[#allocation13 + $0x80] ss:$8 sps:$4 sm:$0xff]  }
 0x241   :  { %v6439_v11 = vpop.f32.mrb[3].mxu0  ;;  %770 = vmatprep.subr.bf16.mxu0 %v7613_v37  ;;  %v7616_v9 = vld [vmem:[#allocation13 + $0x94] ss:$8 sps:$4 sm:$0xff]  }
 0x242   :  { %v452_v15 = vadd.f32 %v6437_v7, %v9017_v40  ;;  %771 = vmatpush1.bf16.msra.mxu0 %v7611_v5  ;;  %v7614_v7 = vld [vmem:[#allocation13 + $0x90] ss:$8 sps:$4 sm:$0xff]   ;;  %v7619_v11 = vld [vmem:[#allocation13 + $0xa4] ss:$8 sps:$4 sm:$0xff]  }
 0x243   :  { %772 = vmatprep.subr.bf16.mxu0 %v7616_v9 }
 0x244   :  { %v457_v16 = vmax.f32 %v452_v15, 0.0  ;;  %v7617_v15 = vld [vmem:[#allocation13 + $0xa0] ss:$8 sps:$4 sm:$0xff]  }
 0x246   :  { %v458_v17 = vpack.c.bf16 %v457_v16, %v457_v16  ;;  %773 = vmatpush1.bf16.msra.mxu0 %v7614_v7  ;;  %v7622_v16 = vld [vmem:[#allocation13 + $0xb4] ss:$8 sps:$4 sm:$0xff]  }
 0x247   :  { %774 = vmatprep.subr.bf16.mxu0 %v7619_v11 }
 0x248   :  { %7118 = vmatmul.mubr.bf16.vlgmr.msra.gmra.mrb[0].mxu1 %v458_v17  ;;  %v7620_v17 = vld [vmem:[#allocation13 + $0xb0] ss:$8 sps:$4 sm:$0xff]  }
 0x249   :  { %7122 = vmatpush3.bf16.msra.mxu1 %v8906_v59  ;;  %7137 = vmatprep.mubr.msk.bf16.mxu1 %vm8535_vm0, %v8534_v60 }
 0x24a   :  { %7123 = vmatprep.subr.bf16.mxu1 %v8534_v60  ;;  %775 = vmatpush1.bf16.msra.mxu0 %v7617_v15  ;;  %v9084_v15 = vld [vmem:[#allocation7 + $0x78] sm:$0xff]  }
 0x24b   :  { %776 = vmatprep.subr.bf16.mxu0 %v7622_v16  ;;  %v9087_v16 = vld [vmem:[#allocation7 + $0x38] sm:$0xff]  }
 0x24d   :  { %7124 = vmatpush3.bf16.msra.mxu1 %v8909_v61 }
 0x24e   :  { %7125 = vmatprep.subr.bf16.mxu1 %v8534_v60  ;;  %777 = vmatpush1.bf16.msra.mxu0 %v7620_v17 }
 0x251   :  { %7126 = vmatpush3.bf16.msra.mxu1 %v8913_v62 }
 0x252   :  { %7127 = vmatprep.subr.bf16.mxu1 %v8534_v60 }
 0x255   :  { %7128 = vmatpush3.bf16.msra.mxu1 %v8917_v63 }
 0x256   :  { %7129 = vmatprep.subr.bf16.mxu1 %v8534_v60 }
 0x259   :  { %7130 = vmatpush3.bf16.msra.mxu1 %v8921_v1 }
 0x25a   :  { %7131 = vmatprep.subr.bf16.mxu1 %v8534_v60 }
 0x25d   :  { %7132 = vmatpush3.bf16.msra.mxu1 %v8925_v2 }
 0x25e   :  { %v6466_v18 = vpop.f32.mrb[4].mxu0  ;;  %7133 = vmatprep.subr.bf16.mxu1 %v8534_v60 }
 0x25f   :  { %v6467_v19 = vpop.f32.mrb[5].mxu0 }
 0x260   :  { %v6468_v20 = vadd.f32 %v6467_v19, %v6466_v18  ;;  %v6469_v21 = vpop.f32.mrb[6].mxu0  ;;  %v7625_v18 = vld [vmem:[#allocation13 + $0xc4] ss:$8 sps:$4 sm:$0xff]   ;;  %v7623_v19 = vld [vmem:[#allocation13 + $0xc0] ss:$8 sps:$4 sm:$0xff]  }
 0x261   :  { %v6470_v22 = vpop.f32.mrb[7].mxu0  ;;  %7134 = vmatpush3.bf16.msra.mxu1 %v9007_v3  ;;  %778 = vmatprep.subr.bf16.mxu0 %v7625_v18  ;;  %v7626_v21 = vld [vmem:[#allocation13 + $0xd0] ss:$8 sps:$4 sm:$0xff]   ;;  %v7635_v18 = vld [vmem:[#allocation13 + $0x100] ss:$8 sps:$4 sm:$0xff]  }
 0x262   :  { %v625_v23 = vadd.f32 %v6468_v20, %v9017_v40  ;;  %7135 = vmatprep.subr.bf16.mxu1 %v8534_v60  ;;  %v7628_v20 = vld [vmem:[#allocation13 + $0xd4] ss:$8 sps:$4 sm:$0xff]   ;;  %779 = vmatpush1.bf16.msra.mxu0 %v7623_v19  ;;  %v7631_v22 = vld [vmem:[#allocation13 + $0xe4] ss:$8 sps:$4 sm:$0xff]  }
 0x263   :  { %780 = vmatprep.subr.bf16.mxu0 %v7628_v20  ;;  %v7637_v19 = vld [vmem:[#allocation13 + $0x104] ss:$8 sps:$4 sm:$0xff]   ;;  %v7640_v20 = vld [vmem:[#allocation13 + $0x114] ss:$8 sps:$4 sm:$0xff]  }
 0x264   :  { %v630_v27 = vmax.f32 %v625_v23, 0.0  ;;  %v7629_v23 = vld [vmem:[#allocation13 + $0xe0] ss:$8 sps:$4 sm:$0xff]  }
 0x265   :  { %7136 = vmatpush3.bf16.msra.mxu1 %v9011_v4 }
 0x266   :  { %v631_v29 = vpack.c.bf16 %v630_v27, %v630_v27  ;;  %891 = vmatprep.subr.bf16.mxu1 %v7589_v26  ;;  %781 = vmatpush1.bf16.msra.mxu0 %v7626_v21  ;;  %v7634_v26 = vld [vmem:[#allocation13 + $0xf4] ss:$8 sps:$4 sm:$0xff]   ;;  %v7632_v27 = vld [vmem:[#allocation13 + $0xf0] ss:$8 sps:$4 sm:$0xff]  }
 0x267   :  { %782 = vmatprep.subr.bf16.mxu0 %v7631_v22  ;;  %v7638_v21 = vld [vmem:[#allocation13 + $0x110] ss:$8 sps:$4 sm:$0xff]   ;;  %v7643_v22 = vld [vmem:[#allocation13 + $0x124] ss:$8 sps:$4 sm:$0xff]  }
 0x268   :  { %7138 = vmatmul.mubr.bf16.vlgmr.msra.gmra.mrb[4].mxu1 %v631_v29  ;;  %v9043_v29 = vld [vmem:[#allocation11] ss:$0 sm:$0xff] }
 0x269   :  { %892 = vmatpush1.bf16.msra.mxu1 %v7587_v28  ;;  %923 = vmatprep.mubr.bf16.mxu1 %v8533_v0  ;;  %v9040_v28 = vld [vmem:[#allocation7 + $0x40] sm:$0xff]  }
 0x26a   :  { %893 = vmatprep.subr.bf16.mxu1 %v7592_v30  ;;  %783 = vmatpush1.bf16.msra.mxu0 %v7629_v23  ;;  %v7641_v23 = vld [vmem:[#allocation13 + $0x120] ss:$8 sps:$4 sm:$0xff]  }
 0x26b   :  { %784 = vmatprep.subr.bf16.mxu0 %v7634_v26  ;;  %v7646_v26 = vld [vmem:[#allocation13 + $0x134] ss:$8 sps:$4 sm:$0xff]  }
 0x26d   :  { %894 = vmatpush1.bf16.msra.mxu1 %v7590_v31 }
 0x26e   :  { %895 = vmatprep.subr.bf16.mxu1 %v7595_v32  ;;  %785 = vmatpush1.bf16.msra.mxu0 %v7632_v27  ;;  %v7644_v27 = vld [vmem:[#allocation13 + $0x130] ss:$8 sps:$4 sm:$0xff]  }
 0x26f   :  { %6481 = vmatprep.subr.bf16.mxu0 %v9040_v28 }
 0x271   :  { %896 = vmatpush1.bf16.msra.mxu1 %v7593_v33 }
 0x272   :  { %897 = vmatprep.subr.bf16.mxu1 %v7598_v34 }
 0x275   :  { %898 = vmatpush1.bf16.msra.mxu1 %v7596_v35 }
 0x276   :  { %899 = vmatprep.subr.bf16.mxu1 %v7601_v36  ;;  %v946_v36 = vpop.permute.xlu1 %945 }
 0x277   :  { %v948_v37 = vmul.f32 %v946_v36, %v8942_v13 }
 0x279   :  { %900 = vmatpush1.bf16.msra.mxu1 %v7599_v38  ;;  %v939_v38 = vpop.permute.xlu0 %938 }
 0x27a   :  { %901 = vmatprep.subr.bf16.mxu1 %v7604_v47  ;;  %v942_v47 = vmul.f32 %v939_v38, %v8939_v12  ;;  %v941_v5 = vmul.f32 %v939_v38, %v8936_v10  ;;  %v7653_v38 = vld [vmem:[#allocation13 + $0x160] ss:$8 sps:$4 sm:$0xff]  }
 0x27c   :  { %v950_v7 = vadd.f32 %v948_v37, %v941_v5 }
 0x27d   :  { %902 = vmatpush1.bf16.msra.mxu1 %v7602_v48 }
 0x27e   :  { %903 = vmatprep.subr.bf16.mxu1 %v7607_v51  ;;  %v952_v9 = vadd.f32 %v950_v7, %v8954_v24 }
 0x280   :  { %v954_v11 = vmax.f32 %v952_v9, 0.0 }
 0x281   :  { %904 = vmatpush1.bf16.msra.mxu1 %v7605_v54 }
 0x282   :  { %905 = vmatprep.subr.bf16.mxu1 %v7610_v57  ;;  %v956_v17 = vpack.c.bf16 %v954_v11, %v954_v11 }
 0x285   :  { %906 = vmatpush1.bf16.msra.mxu1 %v7608_v58 }
 0x286   :  { %7141 = vmatprep.subr.bf16.mxu1 %v8534_v60 }
 0x31b   :  { %v541_v30 = vpop.f32.mrb[0].mxu1 }
 0x31c   :  { %v542_v31 = vadd.f32 %v9043_v29, %v541_v30  ;;  %v7119_v32 = vpop.f32.mrb[1].mxu1  ;;  %v7649_v30 = vld [vmem:[#allocation13 + $0x144] ss:$8 sps:$4 sm:$0xff]  }
 0x31d   :  { %v544_v33 = vpop.f32.mrb[2].mxu1  ;;  %v7652_v32 = vld [vmem:[#allocation13 + $0x154] ss:$8 sps:$4 sm:$0xff]  }
 0x31e   :  { %v547_v34 = vpack.c.bf16 %v542_v31, %v542_v31  ;;  %v7120_v35 = vpop.f32.mrb[3].mxu1  ;;  %v7647_v31 = vld [vmem:[#allocation13 + $0x140] ss:$8 sps:$4 sm:$0xff]   ;;  %v7650_v33 = vld [vmem:[#allocation13 + $0x150] ss:$8 sps:$4 sm:$0xff]  }
 0x320   :  { %924 = vmatmul.mubr.bf16.vlgmr.msra.gmra.mrb[8].mxu1 %v547_v34  ;;  %v7655_v34 = vld [vmem:[#allocation13 + $0x164] ss:$8 sps:$4 sm:$0xff]  }
 0x321   :  { %7142 = vmatpush3.bf16.msra.mxu1 %v8906_v59  ;;  %7157 = vmatprep.mubr.msk.bf16.mxu1 %vm8535_vm0, %v8534_v60  ;;  %v949_v59 = vmul.f32 %v946_v36, %v8945_v14 }
 0x322   :  { %7143 = vmatprep.subr.bf16.mxu1 %v8534_v60 }
 0x325   :  { %7144 = vmatpush3.bf16.msra.mxu1 %v8909_v61  ;;  %v951_v61 = vadd.f32 %v949_v59, %v942_v47 }
 0x326   :  { %7145 = vmatprep.subr.bf16.mxu1 %v8534_v60 }
 0x329   :  { %7146 = vmatpush3.bf16.msra.mxu1 %v8913_v62  ;;  %v953_v62 = vadd.f32 %v951_v61, %v8957_v25 }
 0x32a   :  { %7147 = vmatprep.subr.bf16.mxu1 %v8534_v60 }
 0x32b   :  { %v955_v48 = vmax.f32 %v953_v62, 0.0 }
 0x32d   :  { %7148 = vmatpush3.bf16.msra.mxu1 %v8917_v63 }
 0x32e   :  { %7149 = vmatprep.subr.bf16.mxu1 %v8534_v60 }
 0x331   :  { %7150 = vmatpush3.bf16.msra.mxu1 %v8921_v1 }
 0x332   :  { %7151 = vmatprep.subr.bf16.mxu1 %v8534_v60 }
 0x335   :  { %7152 = vmatpush3.bf16.msra.mxu1 %v8925_v2  ;;  %v957_v2 = vpack.c.bf16 %v955_v48, %v955_v48 }
 0x336   :  { %7153 = vmatprep.subr.bf16.mxu1 %v8534_v60 }
 0x339   :  { %7154 = vmatpush3.bf16.msra.mxu1 %v9007_v3 }
 0x33a   :  { %7155 = vmatprep.subr.bf16.mxu1 %v8534_v60 }
 0x33b   :  { %v666_v63 = vpop.f32.mrb[4].mxu1 }
 0x33c   :  { %v667_v51 = vadd.f32 %v9043_v29, %v666_v63  ;;  %v7139_v54 = vpop.f32.mrb[5].mxu1 }
 0x33d   :  { %v669_v57 = vpop.f32.mrb[6].mxu1  ;;  %7156 = vmatpush3.bf16.msra.mxu1 %v9011_v4 }
 0x33e   :  { %v672_v1 = vpack.c.bf16 %v667_v51, %v667_v51  ;;  %v7140_v58 = vpop.f32.mrb[7].mxu1  ;;  %6512 = vmatprep.subr.bf16.mxu1 %v9040_v28  ;;  %v1195_v57 = vpop.permute.xlu1 %1194 }
 0x33f   :  { %v1198_v58 = vmul.f32 %v1195_v57, %v8945_v14 }
 0x340   :  { %803 = vmatmul.mubr.bf16.vlgmr.msra.gmra.mrb[8].mxu0 %v672_v1  ;;  %v1188_v1 = vpop.permute.xlu0 %1187 }
 0x341   :  { %6482 = vmatpush3.bf16.msra.mxu0 %v8962_v39  ;;  %990 = vmatprep.mubr.bf16.mxu0 %v957_v2  ;;  %v1191_v2 = vmul.f32 %v1188_v1, %v8939_v12 }
 0x342   :  { %6483 = vmatprep.subr.bf16.mxu0 %v8965_v41 }
 0x343   :  { %v1200_v37 = vadd.f32 %v1198_v58, %v1191_v2  ;;  %v1444_v58 = vpop.permute.xlu1 %1443 }
 0x344   :  { %v1437_v2 = vpop.permute.xlu0 %1436 }
 0x345   :  { %6484 = vmatpush3.bf16.msra.mxu0 %v8968_v42  ;;  %v1202_v9 = vadd.f32 %v1200_v37, %v8957_v25  ;;  %v9138_v37 = vld [vmem:[#allocation10 + $0x20] sm:$0xff]  }
 0x346   :  { %6485 = vmatprep.subr.bf16.mxu0 %v8971_v43 }
 0x349   :  { %6486 = vmatpush3.bf16.msra.mxu0 %v8974_v44 }
 0x34a   :  { %6487 = vmatprep.subr.bf16.mxu0 %v8977_v45 }
 0x34d   :  { %6488 = vmatpush3.bf16.msra.mxu0 %v8980_v46 }
 0x34e   :  { %6489 = vmatprep.subr.bf16.mxu0 %v8985_v49 }
 0x351   :  { %6490 = vmatpush3.bf16.msra.mxu0 %v8988_v50 }
 0x352   :  { %6491 = vmatprep.subr.bf16.mxu0 %v8991_v52 }
 0x355   :  { %6492 = vmatpush3.bf16.msra.mxu0 %v8994_v53 }
 0x356   :  { %6493 = vmatprep.subr.bf16.mxu0 %v8998_v55 }
 0x359   :  { %6494 = vmatpush3.bf16.msra.mxu0 %v9001_v56 }
 0x35a   :  { %6495 = vmatprep.subr.bf16.mxu0 %v9084_v15 }
 0x35d   :  { %6496 = vmatpush3.bf16.msra.mxu0 %v9087_v16 }
 0x35e   :  { %1138 = vmatprep.subr.bf16.mxu0 %v7637_v19 }
 0x360   :  { %991 = vmatmul.mubr.bf16.vlgmr.msra.gmra.mrb[12].mxu0 %v956_v17 }
 0x361   :  { %1170 = vmatprep.mubr.bf16.mxu0 %v8533_v0  ;;  %1139 = vmatpush1.bf16.msra.mxu0 %v7635_v18 }
 0x362   :  { %1140 = vmatprep.subr.bf16.mxu0 %v7640_v20  ;;  %v1204_v20 = vmax.f32 %v1202_v9, 0.0  ;;  %v9144_v9 = vld [vmem:[#allocation10 + $0x28] sm:$0xff]  }
 0x365   :  { %1141 = vmatpush1.bf16.msra.mxu0 %v7638_v21 }
 0x366   :  { %1142 = vmatprep.subr.bf16.mxu0 %v7643_v22 }
 0x369   :  { %1143 = vmatpush1.bf16.msra.mxu0 %v7641_v23  ;;  %v1206_v23 = vpack.c.bf16 %v1204_v20, %v1204_v20 }
 0x36a   :  { %1144 = vmatprep.subr.bf16.mxu0 %v7646_v26  ;;  %v1197_v26 = vmul.f32 %v1195_v57, %v8942_v13  ;;  %v9130_v57 = vld [vmem:[#allocation10 + $0x10] sm:$0xff]  }
 0x36d   :  { %1145 = vmatpush1.bf16.msra.mxu0 %v7644_v27  ;;  %v1190_v27 = vmul.f32 %v1188_v1, %v8936_v10  ;;  %v9134_v1 = vld [vmem:[#allocation10 + $0x18] sm:$0xff]  }
 0x36e   :  { %1146 = vmatprep.subr.bf16.mxu0 %v7649_v30 }
 0x36f   :  { %v1199_v30 = vadd.f32 %v1197_v26, %v1190_v27 }
 0x371   :  { %1147 = vmatpush1.bf16.msra.mxu0 %v7647_v31  ;;  %v1201_v31 = vadd.f32 %v1199_v30, %v8954_v24 }
 0x372   :  { %1148 = vmatprep.subr.bf16.mxu0 %v7652_v32 }
 0x373   :  { %v1203_v32 = vmax.f32 %v1201_v31, 0.0 }
 0x375   :  { %1149 = vmatpush1.bf16.msra.mxu0 %v7650_v33  ;;  %v1205_v33 = vpack.c.bf16 %v1203_v32, %v1203_v32  ;;  %v1446_v32 = vmul.f32 %v1444_v58, %v8942_v13 }
 0x376   :  { %1150 = vmatprep.subr.bf16.mxu0 %v7655_v34  ;;  %v7658_v34 = vld [vmem:[#allocation13 + $0x174] ss:$8 sps:$4 sm:$0xff]  }
 0x379   :  { %1151 = vmatpush1.bf16.msra.mxu0 %v7653_v38 }
 0x37a   :  { %1152 = vmatprep.subr.bf16.mxu0 %v7658_v34 }
 0x3f3   :  { %v925_v35 = vpop.f32.mrb[8].mxu1 }
 0x3f4   :  { %v927_v36 = vpop.f32.mrb[9].mxu1 }
 0x3f5   :  { %v929_v59 = vpop.f32.mrb[10].mxu1 }
 0x3f6   :  { %v930_v47 = vpop.f32.mrb[11].mxu1 }
 0x413   :  { %v804_v61 = vpop.f32.mrb[8].mxu0 }
 0x414   :  { %v9091_v62 = vadd.f32 %v925_v35, %v804_v61  ;;  %v806_v63 = vpop.f32.mrb[9].mxu0  ;;  %v7656_v35 = vld [vmem:[#allocation13 + $0x170] ss:$8 sps:$4 sm:$0xff]  }
 0x415   :  { %v9093_v48 = vadd.f32 %v927_v36, %v806_v63  ;;  %v808_v51 = vpop.f32.mrb[10].mxu0  ;;  %1153 = vmatpush1.bf16.msra.mxu0 %v7656_v35 }
 0x416   :  { %v809_v54 = vpop.f32.mrb[11].mxu0  ;;  %7161 = vmatprep.subr.bf16.mxu0 %v8534_v60  ;;  %v9120_v51 = vld [vmem:[#allocation10] sm:$0xff]  }
 0x417   :  { %v9126_v54 = vld [vmem:[#allocation10 + $0x8] sm:$0xff]  }
 0x433   :  { %v6497_v5 = vpop.f32.mrb[12].mxu0 }
 0x434   :  { %v6498_v7 = vpop.f32.mrb[13].mxu0 }
 0x435   :  { %v6499_v11 = vadd.f32 %v6498_v7, %v6497_v5  ;;  %v6500_v17 = vpop.f32.mrb[14].mxu0  ;;  %v1447_v5 = vmul.f32 %v1444_v58, %v8945_v14  ;;  %v1440_v7 = vmul.f32 %v1437_v2, %v8939_v12  ;;  %v7667_v58 = vld [vmem:[#allocation13 + $0x1a4] ss:$8 sps:$4 sm:$0xff]  }
 0x436   :  { %v6501_v18 = vpop.f32.mrb[15].mxu0 }
 0x437   :  { %v993_v19 = vadd.f32 %v6499_v11, %v9017_v40  ;;  %v1449_v11 = vadd.f32 %v1447_v5, %v1440_v7  ;;  %v7670_v5 = vld [vmem:[#allocation13 + $0x1b4] ss:$8 sps:$4 sm:$0xff]   ;;  %v7668_v7 = vld [vmem:[#allocation13 + $0x1b0] ss:$8 sps:$4 sm:$0xff]  }
 0x439   :  { %v998_v21 = vmax.f32 %v993_v19, 0.0  ;;  %v1451_v19 = vadd.f32 %v1449_v11, %v8957_v25  ;;  %v7673_v11 = vld [vmem:[#allocation13 + $0x1c4] ss:$8 sps:$4 sm:$0xff]  }
 0x43b   :  { %v999_v22 = vpack.c.bf16 %v998_v21, %v998_v21  ;;  %v1453_v26 = vmax.f32 %v1451_v19, 0.0  ;;  %v7674_v19 = vld [vmem:[#allocation13 + $0x1d0] ss:$8 sps:$4 sm:$0xff]  }
 0x43d   :  { %7158 = vmatmul.mubr.bf16.vlgmr.msra.gmra.mrb[12].mxu1 %v999_v22  ;;  %v1455_v31 = vpack.c.bf16 %v1453_v26, %v1453_v26 }
 0x43e   :  { %6513 = vmatpush3.bf16.msra.mxu1 %v8962_v39  ;;  %1239 = vmatprep.mubr.bf16.mxu1 %v1206_v23 }
 0x43f   :  { %6514 = vmatprep.subr.bf16.mxu1 %v8965_v41 }
 0x442   :  { %6515 = vmatpush3.bf16.msra.mxu1 %v8968_v42 }
 0x443   :  { %6516 = vmatprep.subr.bf16.mxu1 %v8971_v43 }
 0x446   :  { %6517 = vmatpush3.bf16.msra.mxu1 %v8974_v44 }
 0x447   :  { %6518 = vmatprep.subr.bf16.mxu1 %v8977_v45 }
 0x44a   :  { %6519 = vmatpush3.bf16.msra.mxu1 %v8980_v46 }
 0x44b   :  { %6520 = vmatprep.subr.bf16.mxu1 %v8985_v49 }
 0x44e   :  { %6521 = vmatpush3.bf16.msra.mxu1 %v8988_v50 }
 0x44f   :  { %6522 = vmatprep.subr.bf16.mxu1 %v8991_v52 }
 0x452   :  { %6523 = vmatpush3.bf16.msra.mxu1 %v8994_v53 }
 0x453   :  { %6524 = vmatprep.subr.bf16.mxu1 %v8998_v55 }
 0x456   :  { %6525 = vmatpush3.bf16.msra.mxu1 %v9001_v56 }
 0x457   :  { %6526 = vmatprep.subr.bf16.mxu1 %v9084_v15 }
 0x45a   :  { %6527 = vmatpush3.bf16.msra.mxu1 %v9087_v16 }
 0x45d   :  { %1240 = vmatmul.mubr.bf16.vlgmr.msra.gmra.mrb[16].mxu1 %v1205_v33  ;;  %v1439_v33 = vmul.f32 %v1437_v2, %v8936_v10  ;;  %v7665_v2 = vld [vmem:[#allocation13 + $0x1a0] ss:$8 sps:$4 sm:$0xff]  }
 0x45e   :  { %1419 = vmatprep.mubr.bf16.mxu1 %v8533_v0 }
 0x45f   :  { %v1448_v34 = vadd.f32 %v1446_v32, %v1439_v33 }
 0x461   :  { %v1450_v35 = vadd.f32 %v1448_v34, %v8954_v24 }
 0x510   :  { %v1034_v36 = vpop.f32.mrb[12].mxu1 }
 0x511   :  { %v1035_v38 = vadd.f32 %v9043_v29, %v1034_v36  ;;  %v7159_v59 = vpop.f32.mrb[13].mxu1  ;;  %v1452_v36 = vmax.f32 %v1450_v35, 0.0 }
 0x512   :  { %v1037_v47 = vpop.f32.mrb[14].mxu1  ;;  %v7659_v59 = vld [vmem:[#allocation13 + $0x180] ss:$8 sps:$4 sm:$0xff]  }
 0x513   :  { %v1040_v61 = vpack.c.bf16 %v1035_v38, %v1035_v38  ;;  %v7160_v63 = vpop.f32.mrb[15].mxu1  ;;  %v1454_v38 = vpack.c.bf16 %v1452_v36, %v1452_v36  ;;  %v7661_v47 = vld [vmem:[#allocation13 + $0x184] ss:$8 sps:$4 sm:$0xff]  }
 0x514   :  { %1387 = vmatprep.subr.bf16.mxu1 %v7661_v47  ;;  %v7662_v63 = vld [vmem:[#allocation13 + $0x190] ss:$8 sps:$4 sm:$0xff]  }
 0x515   :  { %1171 = vmatmul.mubr.bf16.vlgmr.msra.gmra.mrb[16].mxu0 %v1040_v61  ;;  %v7664_v61 = vld [vmem:[#allocation13 + $0x194] ss:$8 sps:$4 sm:$0xff]   ;;  %1388 = vmatpush1.bf16.msra.mxu1 %v7659_v59 }
 0x516   :  { %7162 = vmatpush3.bf16.msra.mxu0 %v9120_v51  ;;  %7177 = vmatprep.mubr.msk.bf16.mxu0 %vm8535_vm0, %v8534_v60 }
 0x517   :  { %7163 = vmatprep.subr.bf16.mxu0 %v8534_v60  ;;  %1389 = vmatprep.subr.bf16.mxu1 %v7664_v61 }
 0x519   :  { %1390 = vmatpush1.bf16.msra.mxu1 %v7662_v63 }
 0x51a   :  { %7164 = vmatpush3.bf16.msra.mxu0 %v9126_v54  ;;  %1391 = vmatprep.subr.bf16.mxu1 %v7667_v58 }
 0x51b   :  { %7165 = vmatprep.subr.bf16.mxu0 %v8534_v60 }
 0x51d   :  { %1392 = vmatpush1.bf16.msra.mxu1 %v7665_v2 }
 0x51e   :  { %7166 = vmatpush3.bf16.msra.mxu0 %v9130_v57  ;;  %1393 = vmatprep.subr.bf16.mxu1 %v7670_v5 }
 0x51f   :  { %7167 = vmatprep.subr.bf16.mxu0 %v8534_v60 }
 0x521   :  { %1394 = vmatpush1.bf16.msra.mxu1 %v7668_v7 }
 0x522   :  { %7168 = vmatpush3.bf16.msra.mxu0 %v9134_v1  ;;  %1395 = vmatprep.subr.bf16.mxu1 %v7673_v11 }
 0x523   :  { %7169 = vmatprep.subr.bf16.mxu0 %v8534_v60 }
 0x526   :  { %7170 = vmatpush3.bf16.msra.mxu0 %v9138_v37 }
 0x527   :  { %7171 = vmatprep.subr.bf16.mxu0 %v8534_v60 }
 0x52a   :  { %7172 = vmatpush3.bf16.msra.mxu0 %v9144_v9 }
 0x52b   :  { %7173 = vmatprep.subr.bf16.mxu0 %v8534_v60 }
 0x52e   :  { %7174 = vmatpush3.bf16.msra.mxu0 %v9007_v3 }
 0x52f   :  { %7175 = vmatprep.subr.bf16.mxu0 %v8534_v60 }
 0x530   :  { %v6528_v17 = vpop.f32.mrb[16].mxu1 }
 0x531   :  { %v6529_v18 = vpop.f32.mrb[17].mxu1 }
 0x532   :  { %v6530_v20 = vadd.f32 %v6529_v18, %v6528_v17  ;;  %v6531_v21 = vpop.f32.mrb[18].mxu1  ;;  %7176 = vmatpush3.bf16.msra.mxu0 %v9011_v4  ;;  %v7671_v17 = vld [vmem:[#allocation13 + $0x1c0] ss:$8 sps:$4 sm:$0xff]   ;;  %v7676_v18 = vld [vmem:[#allocation13 + $0x1d4] ss:$8 sps:$4 sm:$0xff]  }
 0x533   :  { %v6532_v22 = vpop.f32.mrb[19].mxu1  ;;  %6543 = vmatprep.subr.bf16.mxu0 %v9040_v28  ;;  %1396 = vmatpush1.bf16.msra.mxu1 %v7671_v17  ;;  %v7677_v21 = vld [vmem:[#allocation13 + $0x1e0] ss:$8 sps:$4 sm:$0xff]  }
 0x534   :  { %v1242_v23 = vadd.f32 %v6530_v20, %v9017_v40  ;;  %1397 = vmatprep.subr.bf16.mxu1 %v7676_v18  ;;  %v7679_v20 = vld [vmem:[#allocation13 + $0x1e4] ss:$8 sps:$4 sm:$0xff]   ;;  %v7682_v22 = vld [vmem:[#allocation13 + $0x1f4] ss:$8 sps:$4 sm:$0xff]  }
 0x536   :  { %v1247_v27 = vmax.f32 %v1242_v23, 0.0  ;;  %v7680_v23 = vld [vmem:[#allocation13 + $0x1f0] ss:$8 sps:$4 sm:$0xff]  }
 0x537   :  { %1398 = vmatpush1.bf16.msra.mxu1 %v7674_v19 }
 0x538   :  { %v1248_v30 = vpack.c.bf16 %v1247_v27, %v1247_v27  ;;  %1399 = vmatprep.subr.bf16.mxu1 %v7679_v20 }
 0x53a   :  { %7178 = vmatmul.mubr.bf16.vlgmr.msra.gmra.mrb[20].mxu0 %v1248_v30 }
 0x53b   :  { %6544 = vmatpush3.bf16.msra.mxu0 %v8962_v39  ;;  %1488 = vmatprep.mubr.bf16.mxu0 %v1455_v31 }
 0x53c   :  { %6545 = vmatprep.subr.bf16.mxu0 %v8965_v41  ;;  %1400 = vmatpush1.bf16.msra.mxu1 %v7677_v21 }
 0x53d   :  { %1401 = vmatprep.subr.bf16.mxu1 %v7682_v22 }
 0x53f   :  { %6546 = vmatpush3.bf16.msra.mxu0 %v8968_v42 }
 0x540   :  { %6547 = vmatprep.subr.bf16.mxu0 %v8971_v43  ;;  %1402 = vmatpush1.bf16.msra.mxu1 %v7680_v23 }
 0x541   :  { %7181 = vmatprep.subr.bf16.mxu1 %v8534_v60 }
 0x543   :  { %6548 = vmatpush3.bf16.msra.mxu0 %v8974_v44 }
 0x544   :  { %6549 = vmatprep.subr.bf16.mxu0 %v8977_v45 }
 0x547   :  { %6550 = vmatpush3.bf16.msra.mxu0 %v8980_v46 }
 0x548   :  { %6551 = vmatprep.subr.bf16.mxu0 %v8985_v49 }
 0x54b   :  { %6552 = vmatpush3.bf16.msra.mxu0 %v8988_v50 }
 0x54c   :  { %6553 = vmatprep.subr.bf16.mxu0 %v8991_v52 }
 0x54f   :  { %6554 = vmatpush3.bf16.msra.mxu0 %v8994_v53 }
 0x550   :  { %6555 = vmatprep.subr.bf16.mxu0 %v8998_v55 }
 0x553   :  { %6556 = vmatpush3.bf16.msra.mxu0 %v9001_v56 }
 0x554   :  { %6557 = vmatprep.subr.bf16.mxu0 %v9084_v15 }
 0x557   :  { %6558 = vmatpush3.bf16.msra.mxu0 %v9087_v16 }
 0x55a   :  { %1489 = vmatmul.mubr.bf16.vlgmr.msra.gmra.mrb[24].mxu0 %v1454_v38 }
 0x55b   :  { %1668 = vmatprep.mubr.bf16.mxu0 %v8533_v0 }
 0x5e8   :  { %v1172_v26 = vpop.f32.mrb[16].mxu0 }
 0x5e9   :  { %v9175_v27 = vadd.f32 %v1172_v26, %v9091_v62  ;;  %v1174_v30 = vpop.f32.mrb[17].mxu0  ;;  %v1693_v62 = vpop.permute.xlu1 %1692 }
 0x5ea   :  { %v9178_v31 = vadd.f32 %v1174_v30, %v9093_v48  ;;  %v1176_v32 = vpop.f32.mrb[18].mxu0  ;;  %v1686_v48 = vpop.permute.xlu0 %1685  ;;  %v1696_v61 = vmul.f32 %v1693_v62, %v8945_v14  ;;  %v1695_v26 = vmul.f32 %v1693_v62, %v8942_v13 }
 0x5eb   :  { %v1177_v33 = vpop.f32.mrb[19].mxu0  ;;  %v1689_v63 = vmul.f32 %v1686_v48, %v8939_v12  ;;  %v1688_v30 = vmul.f32 %v1686_v48, %v8936_v10  ;;  %v7695_v32 = vld [vmem:[#allocation13 + $0x240] ss:$8 sps:$4 sm:$0xff]  }
 0x5ec   :  { %v7700_v33 = vld [vmem:[#allocation13 + $0x254] ss:$8 sps:$4 sm:$0xff]  }
 0x5ed   :  { %v1698_v58 = vadd.f32 %v1696_v61, %v1689_v63 }
 0x5ef   :  { %v1700_v7 = vadd.f32 %v1698_v58, %v8957_v25 }
 0x5f1   :  { %v1702_v20 = vmax.f32 %v1700_v7, 0.0 }
 0x5f3   :  { %v1704_v23 = vpack.c.bf16 %v1702_v20, %v1702_v20 }
 0x60d   :  { %v1283_v34 = vpop.f32.mrb[20].mxu0 }
 0x60e   :  { %v1284_v35 = vadd.f32 %v9043_v29, %v1283_v34  ;;  %v7179_v36 = vpop.f32.mrb[21].mxu0  ;;  %v7698_v34 = vld [vmem:[#allocation13 + $0x250] ss:$8 sps:$4 sm:$0xff]  }
 0x60f   :  { %v1286_v38 = vpop.f32.mrb[22].mxu0  ;;  %v7701_v36 = vld [vmem:[#allocation13 + $0x260] ss:$8 sps:$4 sm:$0xff]  }
 0x610   :  { %v1289_v59 = vpack.c.bf16 %v1284_v35, %v1284_v35  ;;  %v7180_v47 = vpop.f32.mrb[23].mxu0  ;;  %v7703_v35 = vld [vmem:[#allocation13 + $0x264] ss:$8 sps:$4 sm:$0xff]   ;;  %v7706_v38 = vld [vmem:[#allocation13 + $0x274] ss:$8 sps:$4 sm:$0xff]  }
 0x612   :  { %1420 = vmatmul.mubr.bf16.vlgmr.msra.gmra.mrb[20].mxu1 %v1289_v59  ;;  %v7704_v59 = vld [vmem:[#allocation13 + $0x270] ss:$8 sps:$4 sm:$0xff]  }
 0x613   :  { %7182 = vmatpush3.bf16.msra.mxu1 %v9120_v51  ;;  %7197 = vmatprep.mubr.msk.bf16.mxu1 %vm8535_vm0, %v8534_v60 }
 0x614   :  { %7183 = vmatprep.subr.bf16.mxu1 %v8534_v60 }
 0x617   :  { %7184 = vmatpush3.bf16.msra.mxu1 %v9126_v54 }
 0x618   :  { %7185 = vmatprep.subr.bf16.mxu1 %v8534_v60 }
 0x61b   :  { %7186 = vmatpush3.bf16.msra.mxu1 %v9130_v57 }
 0x61c   :  { %7187 = vmatprep.subr.bf16.mxu1 %v8534_v60 }
 0x61f   :  { %7188 = vmatpush3.bf16.msra.mxu1 %v9134_v1 }
 0x620   :  { %7189 = vmatprep.subr.bf16.mxu1 %v8534_v60 }
 0x623   :  { %7190 = vmatpush3.bf16.msra.mxu1 %v9138_v37 }
 0x624   :  { %7191 = vmatprep.subr.bf16.mxu1 %v8534_v60 }
 0x627   :  { %7192 = vmatpush3.bf16.msra.mxu1 %v9144_v9 }
 0x628   :  { %7193 = vmatprep.subr.bf16.mxu1 %v8534_v60 }
 0x62b   :  { %7194 = vmatpush3.bf16.msra.mxu1 %v9007_v3 }
 0x62c   :  { %7195 = vmatprep.subr.bf16.mxu1 %v8534_v60 }
 0x62d   :  { %v6559_v2 = vpop.f32.mrb[24].mxu0 }
 0x62e   :  { %v6560_v5 = vpop.f32.mrb[25].mxu0 }
 0x62f   :  { %v6561_v11 = vadd.f32 %v6560_v5, %v6559_v2  ;;  %v6562_v17 = vpop.f32.mrb[26].mxu0  ;;  %7196 = vmatpush3.bf16.msra.mxu1 %v9011_v4 }
 0x630   :  { %v6563_v18 = vpop.f32.mrb[27].mxu0  ;;  %6574 = vmatprep.subr.bf16.mxu1 %v9040_v28 }
 0x631   :  { %v1491_v19 = vadd.f32 %v6561_v11, %v9017_v40 }
 0x633   :  { %v1496_v21 = vmax.f32 %v1491_v19, 0.0 }
 0x635   :  { %v1497_v22 = vpack.c.bf16 %v1496_v21, %v1496_v21 }
 0x637   :  { %7198 = vmatmul.mubr.bf16.vlgmr.msra.gmra.mrb[24].mxu1 %v1497_v22 }
 0x638   :  { %6575 = vmatpush3.bf16.msra.mxu1 %v8962_v39  ;;  %1737 = vmatprep.mubr.bf16.mxu1 %v1704_v23  ;;  %v1697_v39 = vadd.f32 %v1695_v26, %v1688_v30 }
 0x639   :  { %6576 = vmatprep.subr.bf16.mxu1 %v8965_v41 }
 0x63a   :  { %v1699_v41 = vadd.f32 %v1697_v39, %v8954_v24 }
 0x63c   :  { %6577 = vmatpush3.bf16.msra.mxu1 %v8968_v42  ;;  %v1701_v42 = vmax.f32 %v1699_v41, 0.0 }
 0x63d   :  { %6578 = vmatprep.subr.bf16.mxu1 %v8971_v43 }
 0x63e   :  { %v1703_v43 = vpack.c.bf16 %v1701_v42, %v1701_v42 }
 0x640   :  { %6579 = vmatpush3.bf16.msra.mxu1 %v8974_v44  ;;  %v7683_v44 = vld [vmem:[#allocation13 + $0x200] ss:$8 sps:$4 sm:$0xff]  }
 0x641   :  { %6580 = vmatprep.subr.bf16.mxu1 %v8977_v45  ;;  %v7685_v45 = vld [vmem:[#allocation13 + $0x204] ss:$8 sps:$4 sm:$0xff]  }
 0x642   :  { %1636 = vmatprep.subr.bf16.mxu0 %v7685_v45 }
 0x643   :  { %1637 = vmatpush1.bf16.msra.mxu0 %v7683_v44 }
 0x644   :  { %6581 = vmatpush3.bf16.msra.mxu1 %v8980_v46  ;;  %v7688_v46 = vld [vmem:[#allocation13 + $0x214] ss:$8 sps:$4 sm:$0xff]  }
 0x645   :  { %6582 = vmatprep.subr.bf16.mxu1 %v8985_v49  ;;  %v7686_v49 = vld [vmem:[#allocation13 + $0x210] ss:$8 sps:$4 sm:$0xff]   ;;  %1638 = vmatprep.subr.bf16.mxu0 %v7688_v46 }
 0x647   :  { %1639 = vmatpush1.bf16.msra.mxu0 %v7686_v49  ;;  %v9255_v49 = vld [vmem:[#allocation7 + $0x48] sm:$0xff]  }
 0x648   :  { %6583 = vmatpush3.bf16.msra.mxu1 %v8988_v50  ;;  %v7691_v50 = vld [vmem:[#allocation13 + $0x224] ss:$8 sps:$4 sm:$0xff]  }
 0x649   :  { %6584 = vmatprep.subr.bf16.mxu1 %v8991_v52  ;;  %v7689_v52 = vld [vmem:[#allocation13 + $0x220] ss:$8 sps:$4 sm:$0xff]   ;;  %1640 = vmatprep.subr.bf16.mxu0 %v7691_v50  ;;  %v9261_v50 = vld [vmem:[#allocation7 + $0x50] sm:$0xff]  }
 0x64b   :  { %1641 = vmatpush1.bf16.msra.mxu0 %v7689_v52  ;;  %v9267_v52 = vld [vmem:[#allocation7 + $0x58] sm:$0xff]  }
 0x64c   :  { %6585 = vmatpush3.bf16.msra.mxu1 %v8994_v53  ;;  %v7694_v53 = vld [vmem:[#allocation13 + $0x234] ss:$8 sps:$4 sm:$0xff]  }
 0x64d   :  { %6586 = vmatprep.subr.bf16.mxu1 %v8998_v55  ;;  %v7692_v55 = vld [vmem:[#allocation13 + $0x230] ss:$8 sps:$4 sm:$0xff]   ;;  %1642 = vmatprep.subr.bf16.mxu0 %v7694_v53 }
 0x64e   :  { %v9270_v53 = vld [vmem:[#allocation7 + $0x18] sm:$0xff]  }
 0x64f   :  { %1643 = vmatpush1.bf16.msra.mxu0 %v7692_v55 }
 0x650   :  { %6587 = vmatpush3.bf16.msra.mxu1 %v9001_v56  ;;  %v7697_v56 = vld [vmem:[#allocation13 + $0x244] ss:$8 sps:$4 sm:$0xff]  }
 0x651   :  { %6588 = vmatprep.subr.bf16.mxu1 %v9084_v15  ;;  %1644 = vmatprep.subr.bf16.mxu0 %v7697_v56 }
 0x653   :  { %1645 = vmatpush1.bf16.msra.mxu0 %v7695_v32  ;;  %v9275_v32 = vld [vmem:[#allocation7 + $0x60] sm:$0xff]  }
 0x654   :  { %6589 = vmatpush3.bf16.msra.mxu1 %v9087_v16  ;;  %1646 = vmatprep.subr.bf16.mxu0 %v7700_v33  ;;  %v9278_v33 = vld [vmem:[#allocation7 + $0x20] sm:$0xff]  }
 0x657   :  { %1738 = vmatmul.mubr.bf16.vlgmr.msra.gmra.mrb[28].mxu1 %v1703_v43  ;;  %1647 = vmatpush1.bf16.msra.mxu0 %v7698_v34 }
 0x658   :  { %1917 = vmatprep.mubr.bf16.mxu1 %v8533_v0  ;;  %1648 = vmatprep.subr.bf16.mxu0 %v7703_v35  ;;  %v9281_v35 = vld [vmem:[#allocation7 + $0x68] sm:$0xff]  }
 0x65b   :  { %1649 = vmatpush1.bf16.msra.mxu0 %v7701_v36  ;;  %v9284_v36 = vld [vmem:[#allocation7 + $0x28] sm:$0xff]  }
 0x65c   :  { %1650 = vmatprep.subr.bf16.mxu0 %v7706_v38 }
 0x65f   :  { %1651 = vmatpush1.bf16.msra.mxu0 %v7704_v59  ;;  %v9288_v59 = vld [vmem:[#allocation7 + $0x70] sm:$0xff]  }
 0x660   :  { %7201 = vmatprep.subr.bf16.mxu0 %v8534_v60 }
 0x6e5   :  { %v1421_v47 = vpop.f32.mrb[20].mxu1 }
 0x6e6   :  { %v9224_v62 = vadd.f32 %v1421_v47, %v9175_v27  ;;  %v1423_v48 = vpop.f32.mrb[21].mxu1  ;;  %v1942_v27 = vpop.permute.xlu1 %1941  ;;  %v9291_v47 = vld [vmem:[#allocation7 + $0x30] sm:$0xff]  }
 0x6e7   :  { %v9227_v61 = vadd.f32 %v1423_v48, %v9178_v31  ;;  %v1425_v63 = vpop.f32.mrb[22].mxu1  ;;  %v1935_v31 = vpop.permute.xlu0 %1934  ;;  %v1945_v19 = vmul.f32 %v1942_v27, %v8945_v14  ;;  %v1944_v55 = vmul.f32 %v1942_v27, %v8942_v13  ;;  %v7716_v27 = vld [vmem:[#allocation13 + $0x2b0] ss:$8 sps:$4 sm:$0xff]  }
 0x6e8   :  { %v1426_v58 = vpop.f32.mrb[23].mxu1  ;;  %v1938_v20 = vmul.f32 %v1935_v31, %v8939_v12  ;;  %v1937_v56 = vmul.f32 %v1935_v31, %v8936_v10  ;;  %v7721_v31 = vld [vmem:[#allocation13 + $0x2c4] ss:$8 sps:$4 sm:$0xff]  }
 0x6e9   :  { %v7707_v58 = vld [vmem:[#allocation13 + $0x280] ss:$8 sps:$4 sm:$0xff]  }
 0x6ea   :  { %v1947_v21 = vadd.f32 %v1945_v19, %v1938_v20  ;;  %v1946_v34 = vadd.f32 %v1944_v55, %v1937_v56  ;;  %v7719_v19 = vld [vmem:[#allocation13 + $0x2c0] ss:$8 sps:$4 sm:$0xff]   ;;  %v7724_v20 = vld [vmem:[#allocation13 + $0x2d4] ss:$8 sps:$4 sm:$0xff]  }
 0x6ec   :  { %v1949_v26 = vadd.f32 %v1947_v21, %v8957_v25  ;;  %v1948_v38 = vadd.f32 %v1946_v34, %v8954_v24  ;;  %v7722_v21 = vld [vmem:[#allocation13 + $0x2d0] ss:$8 sps:$4 sm:$0xff]  }
 0x6ee   :  { %v1951_v43 = vmax.f32 %v1949_v26, 0.0  ;;  %v1950_v48 = vmax.f32 %v1948_v38, 0.0  ;;  %v7730_v26 = vld [vmem:[#allocation13 + $0x2f4] ss:$8 sps:$4 sm:$0xff]  }
 0x6f0   :  { %v1953_v46 = vpack.c.bf16 %v1951_v43, %v1951_v43  ;;  %v1952_v63 = vpack.c.bf16 %v1950_v48, %v1950_v48 }
 0x70a   :  { %v1532_v2 = vpop.f32.mrb[24].mxu1 }
 0x70b   :  { %v1533_v5 = vadd.f32 %v9043_v29, %v1532_v2  ;;  %v7199_v7 = vpop.f32.mrb[25].mxu1  ;;  %v7709_v2 = vld [vmem:[#allocation13 + $0x284] ss:$8 sps:$4 sm:$0xff]  }
 0x70c   :  { %v1535_v11 = vpop.f32.mrb[26].mxu1  ;;  %1885 = vmatprep.subr.bf16.mxu1 %v7709_v2  ;;  %v7710_v7 = vld [vmem:[#allocation13 + $0x290] ss:$8 sps:$4 sm:$0xff]  }
 0x70d   :  { %v1538_v17 = vpack.c.bf16 %v1533_v5, %v1533_v5  ;;  %v7200_v18 = vpop.f32.mrb[27].mxu1  ;;  %v7712_v5 = vld [vmem:[#allocation13 + $0x294] ss:$8 sps:$4 sm:$0xff]   ;;  %1886 = vmatpush1.bf16.msra.mxu1 %v7707_v58  ;;  %v7715_v11 = vld [vmem:[#allocation13 + $0x2a4] ss:$8 sps:$4 sm:$0xff]  }
 0x70e   :  { %1887 = vmatprep.subr.bf16.mxu1 %v7712_v5  ;;  %v7718_v18 = vld [vmem:[#allocation13 + $0x2b4] ss:$8 sps:$4 sm:$0xff]  }
 0x70f   :  { %1669 = vmatmul.mubr.bf16.vlgmr.msra.gmra.mrb[28].mxu0 %v1538_v17  ;;  %v7713_v17 = vld [vmem:[#allocation13 + $0x2a0] ss:$8 sps:$4 sm:$0xff]   ;;  %v9321_v2 = vld [vmem:[#allocation10 + $0x30] sm:$0xff]  }
 0x710   :  { %7202 = vmatpush3.bf16.msra.mxu0 %v9120_v51  ;;  %7217 = vmatprep.mubr.msk.bf16.mxu0 %vm8535_vm0, %v8534_v60 }
 0x711   :  { %7203 = vmatprep.subr.bf16.mxu0 %v8534_v60  ;;  %1888 = vmatpush1.bf16.msra.mxu1 %v7710_v7 }
 0x712   :  { %1889 = vmatprep.subr.bf16.mxu1 %v7715_v11 }
 0x714   :  { %7204 = vmatpush3.bf16.msra.mxu0 %v9126_v54 }
 0x715   :  { %7205 = vmatprep.subr.bf16.mxu0 %v8534_v60  ;;  %1890 = vmatpush1.bf16.msra.mxu1 %v7713_v17 }
 0x716   :  { %1891 = vmatprep.subr.bf16.mxu1 %v7718_v18 }
 0x718   :  { %7206 = vmatpush3.bf16.msra.mxu0 %v9130_v57 }
 0x719   :  { %7207 = vmatprep.subr.bf16.mxu0 %v8534_v60  ;;  %1892 = vmatpush1.bf16.msra.mxu1 %v7716_v27  ;;  %v9326_v27 = vld [vmem:[#allocation10 + $0x38] sm:$0xff]  }
 0x71a   :  { %1893 = vmatprep.subr.bf16.mxu1 %v7721_v31 }
 0x71c   :  { %7208 = vmatpush3.bf16.msra.mxu0 %v9134_v1 }
 0x71d   :  { %7209 = vmatprep.subr.bf16.mxu0 %v8534_v60  ;;  %1894 = vmatpush1.bf16.msra.mxu1 %v7719_v19  ;;  %v9330_v19 = vld [vmem:[#allocation8] ss:$0 sm:$0xff] }
 0x71e   :  { %1895 = vmatprep.subr.bf16.mxu1 %v7724_v20 }
 0x720   :  { %7210 = vmatpush3.bf16.msra.mxu0 %v9138_v37 }
 0x721   :  { %7211 = vmatprep.subr.bf16.mxu0 %v8534_v60  ;;  %1896 = vmatpush1.bf16.msra.mxu1 %v7722_v21 }
 0x724   :  { %7212 = vmatpush3.bf16.msra.mxu0 %v9144_v9 }
 0x725   :  { %7213 = vmatprep.subr.bf16.mxu0 %v8534_v60 }
 0x728   :  { %7214 = vmatpush3.bf16.msra.mxu0 %v9007_v3  ;;  %v9252_v3 = vld [vmem:[#allocation7] sm:$0xff]  }
 0x729   :  { %7215 = vmatprep.subr.bf16.mxu0 %v8534_v60 }
 0x72a   :  { %v6590_v22 = vpop.f32.mrb[28].mxu1 }
 0x72b   :  { %v6591_v23 = vpop.f32.mrb[29].mxu1 }
 0x72c   :  { %v6592_v30 = vadd.f32 %v6591_v23, %v6590_v22  ;;  %v6593_v39 = vpop.f32.mrb[30].mxu1  ;;  %7216 = vmatpush3.bf16.msra.mxu0 %v9011_v4  ;;  %v9258_v4 = vld [vmem:[#allocation7 + $0x8] sm:$0xff]  }
 0x72d   :  { %v6594_v41 = vpop.f32.mrb[31].mxu1  ;;  %6605 = vmatprep.subr.bf16.mxu0 %v9040_v28  ;;  %v7727_v22 = vld [vmem:[#allocation13 + $0x2e4] ss:$8 sps:$4 sm:$0xff]   ;;  %v7725_v23 = vld [vmem:[#allocation13 + $0x2e0] ss:$8 sps:$4 sm:$0xff]  }
 0x72e   :  { %v1740_v42 = vadd.f32 %v6592_v30, %v9017_v40  ;;  %v9264_v40 = vld [vmem:[#allocation7 + $0x10] sm:$0xff]   ;;  %1897 = vmatprep.subr.bf16.mxu1 %v7727_v22 }
 0x72f   :  { %1898 = vmatpush1.bf16.msra.mxu1 %v7725_v23  ;;  %v7728_v30 = vld [vmem:[#allocation13 + $0x2f0] ss:$8 sps:$4 sm:$0xff]  }
 0x730   :  { %v1745_v44 = vmax.f32 %v1740_v42, 0.0  ;;  %1899 = vmatprep.subr.bf16.mxu1 %v7730_v26 }
 0x732   :  { %v1746_v45 = vpack.c.bf16 %v1745_v44, %v1745_v44 }
 0x733   :  { %1900 = vmatpush1.bf16.msra.mxu1 %v7728_v30 }
 0x734   :  { %7218 = vmatmul.mubr.bf16.vlgmr.msra.gmra.mrb[32].mxu0 %v1746_v45  ;;  %7221 = vmatprep.subr.bf16.mxu1 %v8534_v60 }
 0x735   :  { %6606 = vmatpush3.bf16.msra.mxu0 %v9252_v3  ;;  %1986 = vmatprep.mubr.bf16.mxu0 %v1953_v46 }
 0x736   :  { %6607 = vmatprep.subr.bf16.mxu0 %v9255_v49 }
 0x739   :  { %6608 = vmatpush3.bf16.msra.mxu0 %v9258_v4 }
 0x73a   :  { %6609 = vmatprep.subr.bf16.mxu0 %v9261_v50 }
 0x73d   :  { %6610 = vmatpush3.bf16.msra.mxu0 %v9264_v40 }
 0x73e   :  { %6611 = vmatprep.subr.bf16.mxu0 %v9267_v52 }
 0x741   :  { %6612 = vmatpush3.bf16.msra.mxu0 %v9270_v53 }
 0x742   :  { %6613 = vmatprep.subr.bf16.mxu0 %v9275_v32 }
 0x745   :  { %6614 = vmatpush3.bf16.msra.mxu0 %v9278_v33 }
 0x746   :  { %6615 = vmatprep.subr.bf16.mxu0 %v9281_v35 }
 0x749   :  { %6616 = vmatpush3.bf16.msra.mxu0 %v9284_v36 }
 0x74a   :  { %6617 = vmatprep.subr.bf16.mxu0 %v9288_v59 }
 0x74d   :  { %6618 = vmatpush3.bf16.msra.mxu0 %v9291_v47 }
 0x74e   :  { %6619 = vmatprep.subr.bf16.mxu0 %v9084_v15 }
 0x751   :  { %6620 = vmatpush3.bf16.msra.mxu0 %v9087_v16 }
 0x754   :  { %1987 = vmatmul.mubr.bf16.vlgmr.msra.gmra.mrb[36].mxu0 %v1952_v63 }
 0x755   :  { %2166 = vmatprep.mubr.bf16.mxu0 %v8533_v0 }
 0x7e2   :  { %v1670_v39 = vpop.f32.mrb[28].mxu0 }
 0x7e3   :  { %v9299_v41 = vadd.f32 %v1670_v39, %v9224_v62  ;;  %v1672_v42 = vpop.f32.mrb[29].mxu0  ;;  %v2184_v62 = vpop.permute.xlu0 %2183 }
 0x7e4   :  { %v9302_v43 = vadd.f32 %v1672_v42, %v9227_v61  ;;  %v1674_v44 = vpop.f32.mrb[30].mxu0  ;;  %v2187_v63 = vmul.f32 %v2184_v62, %v8939_v12  ;;  %v2186_v30 = vmul.f32 %v2184_v62, %v8936_v10  ;;  %v7743_v62 = vld [vmem:[#allocation13 + $0x340] ss:$8 sps:$4 sm:$0xff]  }
 0x7e5   :  { %v1675_v45 = vpop.f32.mrb[31].mxu0 }
 0x807   :  { %v1781_v46 = vpop.f32.mrb[32].mxu0 }
 0x808   :  { %v1782_v55 = vadd.f32 %v9043_v29, %v1781_v46  ;;  %v7219_v56 = vpop.f32.mrb[33].mxu0  ;;  %v2191_v29 = vpop.permute.xlu1 %2190  ;;  %v7731_v46 = vld [vmem:[#allocation13 + $0x300] ss:$8 sps:$4 sm:$0xff]  }
 0x809   :  { %v1784_v34 = vpop.f32.mrb[34].mxu0  ;;  %v2194_v61 = vmul.f32 %v2191_v29, %v8945_v14  ;;  %v7736_v56 = vld [vmem:[#allocation13 + $0x314] ss:$8 sps:$4 sm:$0xff]  }
 0x80a   :  { %v1787_v38 = vpack.c.bf16 %v1782_v55, %v1782_v55  ;;  %v7220_v48 = vpop.f32.mrb[35].mxu0  ;;  %v7733_v55 = vld [vmem:[#allocation13 + $0x304] ss:$8 sps:$4 sm:$0xff]   ;;  %v7734_v34 = vld [vmem:[#allocation13 + $0x310] ss:$8 sps:$4 sm:$0xff]  }
 0x80b   :  { %v2196_v58 = vadd.f32 %v2194_v61, %v2187_v63  ;;  %2134 = vmatprep.subr.bf16.mxu0 %v7733_v55  ;;  %v7737_v48 = vld [vmem:[#allocation13 + $0x320] ss:$8 sps:$4 sm:$0xff]   ;;  %v7748_v61 = vld [vmem:[#allocation13 + $0x354] ss:$8 sps:$4 sm:$0xff]   ;;  %v7746_v63 = vld [vmem:[#allocation13 + $0x350] ss:$8 sps:$4 sm:$0xff]  }
 0x80c   :  { %1918 = vmatmul.mubr.bf16.vlgmr.msra.gmra.mrb[32].mxu1 %v1787_v38  ;;  %2135 = vmatpush1.bf16.msra.mxu0 %v7731_v46  ;;  %v7739_v38 = vld [vmem:[#allocation13 + $0x324] ss:$8 sps:$4 sm:$0xff]  }
 0x80d   :  { %7222 = vmatpush3.bf16.msra.mxu1 %v9120_v51  ;;  %7237 = vmatprep.mubr.msk.bf16.mxu1 %vm8535_vm0, %v8534_v60  ;;  %v2198_v11 = vadd.f32 %v2196_v58, %v8957_v25  ;;  %v7751_v58 = vld [vmem:[#allocation13 + $0x364] ss:$8 sps:$4 sm:$0xff]  }
 0x80e   :  { %7223 = vmatprep.subr.bf16.mxu1 %v8534_v60  ;;  %2136 = vmatprep.subr.bf16.mxu0 %v7736_v56 }
 0x80f   :  { %v2200_v21 = vmax.f32 %v2198_v11, 0.0  ;;  %v7752_v11 = vld [vmem:[#allocation13 + $0x370] ss:$8 sps:$4 sm:$0xff]  }
 0x810   :  { %2137 = vmatpush1.bf16.msra.mxu0 %v7734_v34  ;;  %v9382_v34 = vld [vmem:[#allocation7 + $0x40] sm:$0xff]  }
 0x811   :  { %7224 = vmatpush3.bf16.msra.mxu1 %v9126_v54  ;;  %v2202_v26 = vpack.c.bf16 %v2200_v21, %v2200_v21  ;;  %2138 = vmatprep.subr.bf16.mxu0 %v7739_v38 }
 0x812   :  { %7225 = vmatprep.subr.bf16.mxu1 %v8534_v60 }
 0x814   :  { %2139 = vmatpush1.bf16.msra.mxu0 %v7737_v48 }
 0x815   :  { %7226 = vmatpush3.bf16.msra.mxu1 %v9130_v57 }
 0x816   :  { %7227 = vmatprep.subr.bf16.mxu1 %v8534_v60 }
 0x819   :  { %7228 = vmatpush3.bf16.msra.mxu1 %v9134_v1 }
 0x81a   :  { %7229 = vmatprep.subr.bf16.mxu1 %v8534_v60 }
 0x81d   :  { %7230 = vmatpush3.bf16.msra.mxu1 %v9138_v37 }
 0x81e   :  { %7231 = vmatprep.subr.bf16.mxu1 %v8534_v60 }
 0x821   :  { %7232 = vmatpush3.bf16.msra.mxu1 %v9144_v9 }
 0x822   :  { %7233 = vmatprep.subr.bf16.mxu1 %v8534_v60 }
 0x825   :  { %7234 = vmatpush3.bf16.msra.mxu1 %v9321_v2 }
 0x826   :  { %7235 = vmatprep.subr.bf16.mxu1 %v8534_v60 }
 0x827   :  { %v6621_v5 = vpop.f32.mrb[36].mxu0 }
 0x828   :  { %v6622_v7 = vpop.f32.mrb[37].mxu0 }
 0x829   :  { %v6623_v17 = vadd.f32 %v6622_v7, %v6621_v5  ;;  %v6624_v18 = vpop.f32.mrb[38].mxu0  ;;  %7236 = vmatpush3.bf16.msra.mxu1 %v9326_v27  ;;  %v7749_v5 = vld [vmem:[#allocation13 + $0x360] ss:$8 sps:$4 sm:$0xff]   ;;  %v7754_v7 = vld [vmem:[#allocation13 + $0x374] ss:$8 sps:$4 sm:$0xff]  }
 0x82a   :  { %v6625_v31 = vpop.f32.mrb[39].mxu0  ;;  %6636 = vmatprep.subr.bf16.mxu1 %v9040_v28  ;;  %v2193_v28 = vmul.f32 %v2191_v29, %v8942_v13  ;;  %v7742_v29 = vld [vmem:[#allocation13 + $0x334] ss:$8 sps:$4 sm:$0xff]  }
 0x82b   :  { %v1989_v20 = vadd.f32 %v9330_v19, %v6623_v17  ;;  %2140 = vmatprep.subr.bf16.mxu0 %v7742_v29 }
 0x82c   :  { %v2195_v39 = vadd.f32 %v2193_v28, %v2186_v30 }
 0x82d   :  { %v1994_v22 = vmax.f32 %v1989_v20, 0.0 }
 0x82e   :  { %v2197_v42 = vadd.f32 %v2195_v39, %v8954_v24 }
 0x82f   :  { %v1995_v23 = vpack.c.bf16 %v1994_v22, %v1994_v22 }
 0x830   :  { %v2199_v44 = vmax.f32 %v2197_v42, 0.0 }
 0x831   :  { %7238 = vmatmul.mubr.bf16.vlgmr.msra.gmra.mrb[36].mxu1 %v1995_v23 }
 0x832   :  { %6637 = vmatpush3.bf16.msra.mxu1 %v9252_v3  ;;  %2235 = vmatprep.mubr.bf16.mxu1 %v2202_v26  ;;  %v2201_v45 = vpack.c.bf16 %v2199_v44, %v2199_v44  ;;  %v9359_v26 = vld [vmem:[#allocation11] ss:$0 sm:$0xff] }
 0x833   :  { %6638 = vmatprep.subr.bf16.mxu1 %v9255_v49 }
 0x836   :  { %6639 = vmatpush3.bf16.msra.mxu1 %v9258_v4 }
 0x837   :  { %6640 = vmatprep.subr.bf16.mxu1 %v9261_v50 }
 0x83a   :  { %6641 = vmatpush3.bf16.msra.mxu1 %v9264_v40 }
 0x83b   :  { %6642 = vmatprep.subr.bf16.mxu1 %v9267_v52 }
 0x83e   :  { %6643 = vmatpush3.bf16.msra.mxu1 %v9270_v53 }
 0x83f   :  { %6644 = vmatprep.subr.bf16.mxu1 %v9275_v32 }
 0x842   :  { %6645 = vmatpush3.bf16.msra.mxu1 %v9278_v33 }
 0x843   :  { %6646 = vmatprep.subr.bf16.mxu1 %v9281_v35 }
 0x846   :  { %6647 = vmatpush3.bf16.msra.mxu1 %v9284_v36 }
 0x847   :  { %6648 = vmatprep.subr.bf16.mxu1 %v9288_v59 }
 0x84a   :  { %6649 = vmatpush3.bf16.msra.mxu1 %v9291_v47 }
 0x84b   :  { %6650 = vmatprep.subr.bf16.mxu1 %v9084_v15  ;;  %v7740_v15 = vld [vmem:[#allocation13 + $0x330] ss:$8 sps:$4 sm:$0xff]  }
 0x84c   :  { %2141 = vmatpush1.bf16.msra.mxu0 %v7740_v15 }
 0x84e   :  { %6651 = vmatpush3.bf16.msra.mxu1 %v9087_v16  ;;  %v7745_v16 = vld [vmem:[#allocation13 + $0x344] ss:$8 sps:$4 sm:$0xff]  }
 0x84f   :  { %2142 = vmatprep.subr.bf16.mxu0 %v7745_v16 }
 0x850   :  { %2143 = vmatpush1.bf16.msra.mxu0 %v7743_v62 }
 0x851   :  { %2236 = vmatmul.mubr.bf16.vlgmr.msra.gmra.mrb[40].mxu1 %v2201_v45  ;;  %2144 = vmatprep.subr.bf16.mxu0 %v7748_v61 }
 0x852   :  { %2415 = vmatprep.mubr.bf16.mxu1 %v8533_v0 }
 0x854   :  { %2145 = vmatpush1.bf16.msra.mxu0 %v7746_v63 }
 0x855   :  { %2146 = vmatprep.subr.bf16.mxu0 %v7751_v58 }
 0x858   :  { %2147 = vmatpush1.bf16.msra.mxu0 %v7749_v5  ;;  %v9402_v5 = vld [vmem:[#allocation7 + $0x78] sm:$0xff]  }
 0x859   :  { %2148 = vmatprep.subr.bf16.mxu0 %v7754_v7  ;;  %v9405_v7 = vld [vmem:[#allocation7 + $0x38] sm:$0xff]  }
 0x85c   :  { %2149 = vmatpush1.bf16.msra.mxu0 %v7752_v11 }
 0x85d   :  { %7241 = vmatprep.subr.bf16.mxu0 %v8534_v60 }
 0x8df   :  { %v1919_v17 = vpop.f32.mrb[32].mxu1 }
 0x8e0   :  { %v9354_v18 = vadd.f32 %v1919_v17, %v9299_v41  ;;  %v1921_v31 = vpop.f32.mrb[33].mxu1  ;;  %v2440_v41 = vpop.permute.xlu1 %2439  ;;  %v7755_v17 = vld [vmem:[#allocation13 + $0x380] ss:$8 sps:$4 sm:$0xff]  }
 0x8e1   :  { %v9357_v20 = vadd.f32 %v1921_v31, %v9302_v43  ;;  %v1923_v21 = vpop.f32.mrb[34].mxu1  ;;  %v2433_v43 = vpop.permute.xlu0 %2432  ;;  %v2442_v16 = vmul.f32 %v2440_v41, %v8942_v13  ;;  %v7757_v31 = vld [vmem:[#allocation13 + $0x384] ss:$8 sps:$4 sm:$0xff]  }
 0x8e2   :  { %v1924_v22 = vpop.f32.mrb[35].mxu1  ;;  %v2435_v62 = vmul.f32 %v2433_v43, %v8936_v10  ;;  %v7760_v21 = vld [vmem:[#allocation13 + $0x394] ss:$8 sps:$4 sm:$0xff]   ;;  %2383 = vmatprep.subr.bf16.mxu1 %v7757_v31 }
 0x8e3   :  { %2384 = vmatpush1.bf16.msra.mxu1 %v7755_v17  ;;  %v7758_v22 = vld [vmem:[#allocation13 + $0x390] ss:$8 sps:$4 sm:$0xff]   ;;  %v9435_v17 = vld [vmem:[#allocation10 + $0x20] sm:$0xff]  }
 0x8e4   :  { %v2444_v61 = vadd.f32 %v2442_v16, %v2435_v62  ;;  %2385 = vmatprep.subr.bf16.mxu1 %v7760_v21 }
 0x8e6   :  { %v2446_v63 = vadd.f32 %v2444_v61, %v8954_v24  ;;  %v9417_v61 = vld [vmem:[#allocation10] sm:$0xff]  }
 0x8e7   :  { %2386 = vmatpush1.bf16.msra.mxu1 %v7758_v22  ;;  %v9441_v22 = vld [vmem:[#allocation10 + $0x28] sm:$0xff]  }
 0x8e8   :  { %v2448_v58 = vmax.f32 %v2446_v63, 0.0  ;;  %v9431_v63 = vld [vmem:[#allocation10 + $0x18] sm:$0xff]  }
 0x8ea   :  { %v2450_v11 = vpack.c.bf16 %v2448_v58, %v2448_v58  ;;  %v2689_v58 = vpop.permute.xlu1 %2688 }
 0x8eb   :  { %v2692_v31 = vmul.f32 %v2689_v58, %v8945_v14 }
 0x904   :  { %v2030_v23 = vpop.f32.mrb[36].mxu1 }
 0x905   :  { %v2031_v28 = vadd.f32 %v9359_v26, %v2030_v23  ;;  %v7239_v30 = vpop.f32.mrb[37].mxu1  ;;  %v7763_v23 = vld [vmem:[#allocation13 + $0x3a4] ss:$8 sps:$4 sm:$0xff]  }
 0x906   :  { %v2033_v39 = vpop.f32.mrb[38].mxu1  ;;  %2387 = vmatprep.subr.bf16.mxu1 %v7763_v23  ;;  %v7766_v30 = vld [vmem:[#allocation13 + $0x3b4] ss:$8 sps:$4 sm:$0xff]  }
 0x907   :  { %v2036_v42 = vpack.c.bf16 %v2031_v28, %v2031_v28  ;;  %v7240_v44 = vpop.f32.mrb[39].mxu1  ;;  %v7761_v28 = vld [vmem:[#allocation13 + $0x3a0] ss:$8 sps:$4 sm:$0xff]   ;;  %v7764_v39 = vld [vmem:[#allocation13 + $0x3b0] ss:$8 sps:$4 sm:$0xff]  }
 0x908   :  { %2388 = vmatpush1.bf16.msra.mxu1 %v7761_v28  ;;  %v7767_v44 = vld [vmem:[#allocation13 + $0x3c0] ss:$8 sps:$4 sm:$0xff]  }
 0x909   :  { %2167 = vmatmul.mubr.bf16.vlgmr.msra.gmra.mrb[40].mxu0 %v2036_v42  ;;  %2389 = vmatprep.subr.bf16.mxu1 %v7766_v30  ;;  %v7769_v42 = vld [vmem:[#allocation13 + $0x3c4] ss:$8 sps:$4 sm:$0xff]  }
 0x90a   :  { %7242 = vmatpush3.bf16.msra.mxu0 %v9120_v51  ;;  %7257 = vmatprep.mubr.msk.bf16.mxu0 %vm8535_vm0, %v8534_v60  ;;  %v2443_v51 = vmul.f32 %v2440_v41, %v8945_v14  ;;  %v7772_v41 = vld [vmem:[#allocation13 + $0x3d4] ss:$8 sps:$4 sm:$0xff]  }
 0x90b   :  { %7243 = vmatprep.subr.bf16.mxu0 %v8534_v60 }
 0x90c   :  { %2390 = vmatpush1.bf16.msra.mxu1 %v7764_v39 }
 0x90d   :  { %2391 = vmatprep.subr.bf16.mxu1 %v7769_v42 }
 0x90e   :  { %7244 = vmatpush3.bf16.msra.mxu0 %v9126_v54  ;;  %v2436_v54 = vmul.f32 %v2433_v43, %v8939_v12  ;;  %v7770_v43 = vld [vmem:[#allocation13 + $0x3d0] ss:$8 sps:$4 sm:$0xff]  }
 0x90f   :  { %7245 = vmatprep.subr.bf16.mxu0 %v8534_v60 }
 0x910   :  { %2392 = vmatpush1.bf16.msra.mxu1 %v7767_v44 }
 0x911   :  { %2393 = vmatprep.subr.bf16.mxu1 %v7772_v41 }
 0x912   :  { %7246 = vmatpush3.bf16.msra.mxu0 %v9130_v57  ;;  %v2445_v57 = vadd.f32 %v2443_v51, %v2436_v54  ;;  %v7775_v51 = vld [vmem:[#allocation13 + $0x3e4] ss:$8 sps:$4 sm:$0xff]   ;;  %v7773_v54 = vld [vmem:[#allocation13 + $0x3e0] ss:$8 sps:$4 sm:$0xff]  }
 0x913   :  { %7247 = vmatprep.subr.bf16.mxu0 %v8534_v60 }
 0x914   :  { %v2447_v46 = vadd.f32 %v2445_v57, %v8957_v25  ;;  %2394 = vmatpush1.bf16.msra.mxu1 %v7770_v43  ;;  %v7778_v57 = vld [vmem:[#allocation13 + $0x3f4] ss:$8 sps:$4 sm:$0xff]  }
 0x915   :  { %2395 = vmatprep.subr.bf16.mxu1 %v7775_v51 }
 0x916   :  { %7248 = vmatpush3.bf16.msra.mxu0 %v9134_v1  ;;  %v2449_v38 = vmax.f32 %v2447_v46, 0.0 }
 0x917   :  { %7249 = vmatprep.subr.bf16.mxu0 %v8534_v60 }
 0x918   :  { %v2451_v15 = vpack.c.bf16 %v2449_v38, %v2449_v38  ;;  %2396 = vmatpush1.bf16.msra.mxu1 %v7773_v54 }
 0x919   :  { %2397 = vmatprep.subr.bf16.mxu1 %v7778_v57 }
 0x91a   :  { %7250 = vmatpush3.bf16.msra.mxu0 %v9138_v37 }
 0x91b   :  { %7251 = vmatprep.subr.bf16.mxu0 %v8534_v60 }
 0x91e   :  { %7252 = vmatpush3.bf16.msra.mxu0 %v9144_v9 }
 0x91f   :  { %7253 = vmatprep.subr.bf16.mxu0 %v8534_v60 }
 0x922   :  { %7254 = vmatpush3.bf16.msra.mxu0 %v9321_v2 }
 0x923   :  { %7255 = vmatprep.subr.bf16.mxu0 %v8534_v60 }
 0x924   :  { %v6652_v1 = vpop.f32.mrb[40].mxu1 }
 0x925   :  { %v6653_v45 = vpop.f32.mrb[41].mxu1 }
 0x926   :  { %v6654_v37 = vadd.f32 %v6653_v45, %v6652_v1  ;;  %v6655_v55 = vpop.f32.mrb[42].mxu1  ;;  %7256 = vmatpush3.bf16.msra.mxu0 %v9326_v27  ;;  %v7776_v1 = vld [vmem:[#allocation13 + $0x3f0] ss:$8 sps:$4 sm:$0xff]  }
 0x927   :  { %v6656_v56 = vpop.f32.mrb[43].mxu1  ;;  %6667 = vmatprep.subr.bf16.mxu0 %v9382_v34  ;;  %2398 = vmatpush1.bf16.msra.mxu1 %v7776_v1 }
 0x928   :  { %v2238_v9 = vadd.f32 %v9330_v19, %v6654_v37  ;;  %7261 = vmatprep.subr.bf16.mxu1 %v8534_v60 }
 0x92a   :  { %v2243_v48 = vmax.f32 %v2238_v9, 0.0 }
 0x92c   :  { %v2244_v29 = vpack.c.bf16 %v2243_v48, %v2243_v48 }
 0x92e   :  { %7258 = vmatmul.mubr.bf16.vlgmr.msra.gmra.mrb[44].mxu0 %v2244_v29 }
 0x92f   :  { %6668 = vmatpush3.bf16.msra.mxu0 %v9252_v3  ;;  %2484 = vmatprep.mubr.bf16.mxu0 %v2451_v15 }
 0x930   :  { %6669 = vmatprep.subr.bf16.mxu0 %v9255_v49 }
 0x933   :  { %6670 = vmatpush3.bf16.msra.mxu0 %v9258_v4 }
 0x934   :  { %6671 = vmatprep.subr.bf16.mxu0 %v9261_v50 }
 0x937   :  { %6672 = vmatpush3.bf16.msra.mxu0 %v9264_v40 }
 0x938   :  { %6673 = vmatprep.subr.bf16.mxu0 %v9267_v52 }
 0x93b   :  { %6674 = vmatpush3.bf16.msra.mxu0 %v9270_v53 }
 0x93c   :  { %6675 = vmatprep.subr.bf16.mxu0 %v9275_v32 }
 0x93f   :  { %6676 = vmatpush3.bf16.msra.mxu0 %v9278_v33 }
 0x940   :  { %6677 = vmatprep.subr.bf16.mxu0 %v9281_v35 }
 0x943   :  { %6678 = vmatpush3.bf16.msra.mxu0 %v9284_v36 }
 0x944   :  { %6679 = vmatprep.subr.bf16.mxu0 %v9288_v59 }
 0x947   :  { %6680 = vmatpush3.bf16.msra.mxu0 %v9291_v47 }
 0x948   :  { %6681 = vmatprep.subr.bf16.mxu0 %v9402_v5 }
 0x94b   :  { %6682 = vmatpush3.bf16.msra.mxu0 %v9405_v7 }
 0x94e   :  { %2485 = vmatmul.mubr.bf16.vlgmr.msra.gmra.mrb[48].mxu0 %v2450_v11  ;;  %v2682_v11 = vpop.permute.xlu0 %2681 }
 0x94f   :  { %2664 = vmatprep.mubr.bf16.mxu0 %v8533_v0  ;;  %v2685_v21 = vmul.f32 %v2682_v11, %v8939_v12 }
 0x951   :  { %v2694_v23 = vadd.f32 %v2692_v31, %v2685_v21  ;;  %v7790_v31 = vld [vmem:[#allocation13 + $0x434] ss:$8 sps:$4 sm:$0xff]   ;;  %v7788_v21 = vld [vmem:[#allocation13 + $0x430] ss:$8 sps:$4 sm:$0xff]  }
 0x953   :  { %v2696_v39 = vadd.f32 %v2694_v23, %v8957_v25  ;;  %v7793_v23 = vld [vmem:[#allocation13 + $0x444] ss:$8 sps:$4 sm:$0xff]  }
 0x955   :  { %v2698_v51 = vmax.f32 %v2696_v39, 0.0  ;;  %v7794_v39 = vld [vmem:[#allocation13 + $0x450] ss:$8 sps:$4 sm:$0xff]  }
 0x957   :  { %v2700_v1 = vpack.c.bf16 %v2698_v51, %v2698_v51 }
 0x9dc   :  { %v2168_v45 = vpop.f32.mrb[40].mxu0 }
 0x9dd   :  { %v9411_v46 = vadd.f32 %v2168_v45, %v9354_v18  ;;  %v2170_v37 = vpop.f32.mrb[41].mxu0  ;;  %v9423_v18 = vld [vmem:[#allocation10 + $0x8] sm:$0xff]   ;;  %v2691_v45 = vmul.f32 %v2689_v58, %v8942_v13 }
 0x9de   :  { %v9414_v55 = vadd.f32 %v2170_v37, %v9357_v20  ;;  %v2172_v56 = vpop.f32.mrb[42].mxu0  ;;  %v9427_v20 = vld [vmem:[#allocation10 + $0x10] sm:$0xff]   ;;  %v2684_v37 = vmul.f32 %v2682_v11, %v8936_v10  ;;  %v7785_v11 = vld [vmem:[#allocation13 + $0x420] ss:$8 sps:$4 sm:$0xff]  }
 0x9df   :  { %v2173_v9 = vpop.f32.mrb[43].mxu0  ;;  %v7787_v58 = vld [vmem:[#allocation13 + $0x424] ss:$8 sps:$4 sm:$0xff]  }
 0x9e0   :  { %v2693_v56 = vadd.f32 %v2691_v45, %v2684_v37 }
 0x9e2   :  { %v2695_v9 = vadd.f32 %v2693_v56, %v8954_v24 }
 0xa01   :  { %v2279_v38 = vpop.f32.mrb[44].mxu0 }
 0xa02   :  { %v2280_v48 = vadd.f32 %v9359_v26, %v2279_v38  ;;  %v7259_v29 = vpop.f32.mrb[45].mxu0  ;;  %v2697_v38 = vmax.f32 %v2695_v9, 0.0 }
 0xa03   :  { %v2282_v15 = vpop.f32.mrb[46].mxu0  ;;  %v7779_v29 = vld [vmem:[#allocation13 + $0x400] ss:$8 sps:$4 sm:$0xff]  }
 0xa04   :  { %v2285_v16 = vpack.c.bf16 %v2280_v48, %v2280_v48  ;;  %v7260_v62 = vpop.f32.mrb[47].mxu0  ;;  %v2699_v48 = vpack.c.bf16 %v2697_v38, %v2697_v38  ;;  %v7781_v15 = vld [vmem:[#allocation13 + $0x404] ss:$8 sps:$4 sm:$0xff]  }
 0xa05   :  { %2632 = vmatprep.subr.bf16.mxu0 %v7781_v15  ;;  %v7782_v62 = vld [vmem:[#allocation13 + $0x410] ss:$8 sps:$4 sm:$0xff]  }
 0xa06   :  { %2416 = vmatmul.mubr.bf16.vlgmr.msra.gmra.mrb[44].mxu1 %v2285_v16  ;;  %v7784_v16 = vld [vmem:[#allocation13 + $0x414] ss:$8 sps:$4 sm:$0xff]   ;;  %2633 = vmatpush1.bf16.msra.mxu0 %v7779_v29 }
 0xa07   :  { %7262 = vmatpush3.bf16.msra.mxu1 %v9417_v61  ;;  %7277 = vmatprep.mubr.msk.bf16.mxu1 %vm8535_vm0, %v8534_v60 }
 0xa08   :  { %7263 = vmatprep.subr.bf16.mxu1 %v8534_v60  ;;  %2634 = vmatprep.subr.bf16.mxu0 %v7784_v16 }
 0xa0a   :  { %2635 = vmatpush1.bf16.msra.mxu0 %v7782_v62 }
 0xa0b   :  { %7264 = vmatpush3.bf16.msra.mxu1 %v9423_v18  ;;  %2636 = vmatprep.subr.bf16.mxu0 %v7787_v58 }
 0xa0c   :  { %7265 = vmatprep.subr.bf16.mxu1 %v8534_v60 }
 0xa0e   :  { %2637 = vmatpush1.bf16.msra.mxu0 %v7785_v11 }
 0xa0f   :  { %7266 = vmatpush3.bf16.msra.mxu1 %v9427_v20  ;;  %2638 = vmatprep.subr.bf16.mxu0 %v7790_v31 }
 0xa10   :  { %7267 = vmatprep.subr.bf16.mxu1 %v8534_v60 }
 0xa12   :  { %2639 = vmatpush1.bf16.msra.mxu0 %v7788_v21 }
 0xa13   :  { %7268 = vmatpush3.bf16.msra.mxu1 %v9431_v63  ;;  %2640 = vmatprep.subr.bf16.mxu0 %v7793_v23 }
 0xa14   :  { %7269 = vmatprep.subr.bf16.mxu1 %v8534_v60 }
 0xa17   :  { %7270 = vmatpush3.bf16.msra.mxu1 %v9435_v17 }
 0xa18   :  { %7271 = vmatprep.subr.bf16.mxu1 %v8534_v60 }
 0xa1b   :  { %7272 = vmatpush3.bf16.msra.mxu1 %v9441_v22 }
 0xa1c   :  { %7273 = vmatprep.subr.bf16.mxu1 %v8534_v60 }
 0xa1f   :  { %7274 = vmatpush3.bf16.msra.mxu1 %v9321_v2 }
 0xa20   :  { %7275 = vmatprep.subr.bf16.mxu1 %v8534_v60 }
 0xa21   :  { %v6683_v28 = vpop.f32.mrb[48].mxu0 }
 0xa22   :  { %v6684_v30 = vpop.f32.mrb[49].mxu0 }
 0xa23   :  { %v6685_v42 = vadd.f32 %v6684_v30, %v6683_v28  ;;  %v6686_v44 = vpop.f32.mrb[50].mxu0  ;;  %7276 = vmatpush3.bf16.msra.mxu1 %v9326_v27  ;;  %v7791_v28 = vld [vmem:[#allocation13 + $0x440] ss:$8 sps:$4 sm:$0xff]   ;;  %v7796_v30 = vld [vmem:[#allocation13 + $0x454] ss:$8 sps:$4 sm:$0xff]  }
 0xa24   :  { %v6687_v41 = vpop.f32.mrb[51].mxu0  ;;  %6698 = vmatprep.subr.bf16.mxu1 %v9382_v34  ;;  %2641 = vmatpush1.bf16.msra.mxu0 %v7791_v28  ;;  %v7797_v44 = vld [vmem:[#allocation13 + $0x460] ss:$8 sps:$4 sm:$0xff]  }
 0xa25   :  { %v2487_v43 = vadd.f32 %v9330_v19, %v6685_v42  ;;  %2642 = vmatprep.subr.bf16.mxu0 %v7796_v30  ;;  %v7799_v42 = vld [vmem:[#allocation13 + $0x464] ss:$8 sps:$4 sm:$0xff]   ;;  %v7802_v41 = vld [vmem:[#allocation13 + $0x474] ss:$8 sps:$4 sm:$0xff]  }
 0xa27   :  { %v2492_v54 = vmax.f32 %v2487_v43, 0.0  ;;  %v7800_v43 = vld [vmem:[#allocation13 + $0x470] ss:$8 sps:$4 sm:$0xff]  }
 0xa28   :  { %2643 = vmatpush1.bf16.msra.mxu0 %v7794_v39 }
 0xa29   :  { %v2493_v57 = vpack.c.bf16 %v2492_v54, %v2492_v54  ;;  %2644 = vmatprep.subr.bf16.mxu0 %v7799_v42 }
 0xa2b   :  { %7278 = vmatmul.mubr.bf16.vlgmr.msra.gmra.mrb[48].mxu1 %v2493_v57 }
 0xa2c   :  { %6699 = vmatpush3.bf16.msra.mxu1 %v9252_v3  ;;  %2733 = vmatprep.mubr.bf16.mxu1 %v2700_v1 }
 0xa2d   :  { %6700 = vmatprep.subr.bf16.mxu1 %v9255_v49  ;;  %2645 = vmatpush1.bf16.msra.mxu0 %v7797_v44 }
 0xa2e   :  { %2646 = vmatprep.subr.bf16.mxu0 %v7802_v41 }
 0xa30   :  { %6701 = vmatpush3.bf16.msra.mxu1 %v9258_v4 }
 0xa31   :  { %6702 = vmatprep.subr.bf16.mxu1 %v9261_v50  ;;  %2647 = vmatpush1.bf16.msra.mxu0 %v7800_v43 }
 0xa32   :  { %7281 = vmatprep.subr.bf16.mxu0 %v8534_v60 }
 0xa34   :  { %6703 = vmatpush3.bf16.msra.mxu1 %v9264_v40 }
 0xa35   :  { %6704 = vmatprep.subr.bf16.mxu1 %v9267_v52 }
 0xa38   :  { %6705 = vmatpush3.bf16.msra.mxu1 %v9270_v53 }
 0xa39   :  { %6706 = vmatprep.subr.bf16.mxu1 %v9275_v32 }
 0xa3c   :  { %6707 = vmatpush3.bf16.msra.mxu1 %v9278_v33 }
 0xa3d   :  { %6708 = vmatprep.subr.bf16.mxu1 %v9281_v35 }
 0xa40   :  { %6709 = vmatpush3.bf16.msra.mxu1 %v9284_v36 }
 0xa41   :  { %6710 = vmatprep.subr.bf16.mxu1 %v9288_v59 }
 0xa44   :  { %6711 = vmatpush3.bf16.msra.mxu1 %v9291_v47 }
 0xa45   :  { %6712 = vmatprep.subr.bf16.mxu1 %v9402_v5 }
 0xa48   :  { %6713 = vmatpush3.bf16.msra.mxu1 %v9405_v7 }
 0xa4b   :  { %2734 = vmatmul.mubr.bf16.vlgmr.msra.gmra.mrb[52].mxu1 %v2699_v48 }
 0xa4c   :  { %2913 = vmatprep.mubr.bf16.mxu1 %v8533_v0 }
 0xad9   :  { %v2417_v51 = vpop.f32.mrb[44].mxu1 }
 0xada   :  { %v9472_v54 = vadd.f32 %v2417_v51, %v9411_v46  ;;  %v2419_v57 = vpop.f32.mrb[45].mxu1  ;;  %v2938_v46 = vpop.permute.xlu1 %2937 }
 0xadb   :  { %v9475_v1 = vadd.f32 %v2419_v57, %v9414_v55  ;;  %v2421_v45 = vpop.f32.mrb[46].mxu1  ;;  %v2931_v55 = vpop.permute.xlu0 %2930  ;;  %v2941_v16 = vmul.f32 %v2938_v46, %v8945_v14  ;;  %v2940_v51 = vmul.f32 %v2938_v46, %v8942_v13 }
 0xadc   :  { %v2422_v37 = vpop.f32.mrb[47].mxu1  ;;  %v2934_v62 = vmul.f32 %v2931_v55, %v8939_v12  ;;  %v2933_v57 = vmul.f32 %v2931_v55, %v8936_v10  ;;  %v7815_v45 = vld [vmem:[#allocation13 + $0x4c0] ss:$8 sps:$4 sm:$0xff]  }
 0xadd   :  { %v7820_v37 = vld [vmem:[#allocation13 + $0x4d4] ss:$8 sps:$4 sm:$0xff]  }
 0xade   :  { %v2943_v58 = vadd.f32 %v2941_v16, %v2934_v62 }
 0xae0   :  { %v2945_v21 = vadd.f32 %v2943_v58, %v8957_v25 }
 0xae2   :  { %v2947_v42 = vmax.f32 %v2945_v21, 0.0 }
 0xae4   :  { %v2949_v43 = vpack.c.bf16 %v2947_v42, %v2947_v42 }
 0xafe   :  { %v2528_v56 = vpop.f32.mrb[48].mxu1 }
 0xaff   :  { %v2529_v9 = vadd.f32 %v9359_v26, %v2528_v56  ;;  %v7279_v38 = vpop.f32.mrb[49].mxu1  ;;  %v7818_v56 = vld [vmem:[#allocation13 + $0x4d0] ss:$8 sps:$4 sm:$0xff]  }
 0xb00   :  { %v2531_v48 = vpop.f32.mrb[50].mxu1  ;;  %v7821_v38 = vld [vmem:[#allocation13 + $0x4e0] ss:$8 sps:$4 sm:$0xff]  }
 0xb01   :  { %v2534_v29 = vpack.c.bf16 %v2529_v9, %v2529_v9  ;;  %v7280_v15 = vpop.f32.mrb[51].mxu1  ;;  %v7823_v9 = vld [vmem:[#allocation13 + $0x4e4] ss:$8 sps:$4 sm:$0xff]   ;;  %v7826_v48 = vld [vmem:[#allocation13 + $0x4f4] ss:$8 sps:$4 sm:$0xff]  }
 0xb03   :  { %2665 = vmatmul.mubr.bf16.vlgmr.msra.gmra.mrb[52].mxu0 %v2534_v29  ;;  %v7824_v29 = vld [vmem:[#allocation13 + $0x4f0] ss:$8 sps:$4 sm:$0xff]  }
 0xb04   :  { %7282 = vmatpush3.bf16.msra.mxu0 %v9417_v61  ;;  %7297 = vmatprep.mubr.msk.bf16.mxu0 %vm8535_vm0, %v8534_v60 }
 0xb05   :  { %7283 = vmatprep.subr.bf16.mxu0 %v8534_v60 }
 0xb08   :  { %7284 = vmatpush3.bf16.msra.mxu0 %v9423_v18 }
 0xb09   :  { %7285 = vmatprep.subr.bf16.mxu0 %v8534_v60 }
 0xb0c   :  { %7286 = vmatpush3.bf16.msra.mxu0 %v9427_v20 }
 0xb0d   :  { %7287 = vmatprep.subr.bf16.mxu0 %v8534_v60 }
 0xb10   :  { %7288 = vmatpush3.bf16.msra.mxu0 %v9431_v63 }
 0xb11   :  { %7289 = vmatprep.subr.bf16.mxu0 %v8534_v60 }
 0xb14   :  { %7290 = vmatpush3.bf16.msra.mxu0 %v9435_v17 }
 0xb15   :  { %7291 = vmatprep.subr.bf16.mxu0 %v8534_v60 }
 0xb18   :  { %7292 = vmatpush3.bf16.msra.mxu0 %v9441_v22 }
 0xb19   :  { %7293 = vmatprep.subr.bf16.mxu0 %v8534_v60 }
 0xb1c   :  { %7294 = vmatpush3.bf16.msra.mxu0 %v9321_v2 }
 0xb1d   :  { %7295 = vmatprep.subr.bf16.mxu0 %v8534_v60 }
 0xb1e   :  { %v6714_v11 = vpop.f32.mrb[52].mxu1 }
 0xb1f   :  { %v6715_v31 = vpop.f32.mrb[53].mxu1 }
 0xb20   :  { %v6716_v23 = vadd.f32 %v6715_v31, %v6714_v11  ;;  %v6717_v28 = vpop.f32.mrb[54].mxu1  ;;  %7296 = vmatpush3.bf16.msra.mxu0 %v9326_v27 }
 0xb21   :  { %v6718_v30 = vpop.f32.mrb[55].mxu1  ;;  %6729 = vmatprep.subr.bf16.mxu0 %v9382_v34 }
 0xb22   :  { %v2736_v39 = vadd.f32 %v9330_v19, %v6716_v23 }
 0xb24   :  { %v2741_v44 = vmax.f32 %v2736_v39, 0.0 }
 0xb26   :  { %v2742_v41 = vpack.c.bf16 %v2741_v44, %v2741_v44 }
 0xb28   :  { %7298 = vmatmul.mubr.bf16.vlgmr.msra.gmra.mrb[56].mxu0 %v2742_v41 }
 0xb29   :  { %6730 = vmatpush3.bf16.msra.mxu0 %v9252_v3  ;;  %2982 = vmatprep.mubr.bf16.mxu0 %v2949_v43  ;;  %v2942_v3 = vadd.f32 %v2940_v51, %v2933_v57 }
 0xb2a   :  { %6731 = vmatprep.subr.bf16.mxu0 %v9255_v49 }
 0xb2b   :  { %v2944_v49 = vadd.f32 %v2942_v3, %v8954_v24 }
 0xb2d   :  { %6732 = vmatpush3.bf16.msra.mxu0 %v9258_v4  ;;  %v2946_v4 = vmax.f32 %v2944_v49, 0.0 }
 0xb2e   :  { %6733 = vmatprep.subr.bf16.mxu0 %v9261_v50 }
 0xb2f   :  { %v2948_v50 = vpack.c.bf16 %v2946_v4, %v2946_v4 }
 0xb31   :  { %6734 = vmatpush3.bf16.msra.mxu0 %v9264_v40  ;;  %v7803_v40 = vld [vmem:[#allocation13 + $0x480] ss:$8 sps:$4 sm:$0xff]  }
 0xb32   :  { %6735 = vmatprep.subr.bf16.mxu0 %v9267_v52  ;;  %v7805_v52 = vld [vmem:[#allocation13 + $0x484] ss:$8 sps:$4 sm:$0xff]  }
 0xb33   :  { %2881 = vmatprep.subr.bf16.mxu1 %v7805_v52 }
 0xb34   :  { %2882 = vmatpush1.bf16.msra.mxu1 %v7803_v40 }
 0xb35   :  { %6736 = vmatpush3.bf16.msra.mxu0 %v9270_v53  ;;  %v7808_v53 = vld [vmem:[#allocation13 + $0x494] ss:$8 sps:$4 sm:$0xff]  }
 0xb36   :  { %6737 = vmatprep.subr.bf16.mxu0 %v9275_v32  ;;  %v7806_v32 = vld [vmem:[#allocation13 + $0x490] ss:$8 sps:$4 sm:$0xff]   ;;  %2883 = vmatprep.subr.bf16.mxu1 %v7808_v53 }
 0xb38   :  { %2884 = vmatpush1.bf16.msra.mxu1 %v7806_v32  ;;  %v9552_v32 = vld [vmem:[#allocation7 + $0x48] sm:$0xff]  }
 0xb39   :  { %6738 = vmatpush3.bf16.msra.mxu0 %v9278_v33  ;;  %v7811_v33 = vld [vmem:[#allocation13 + $0x4a4] ss:$8 sps:$4 sm:$0xff]  }
 0xb3a   :  { %6739 = vmatprep.subr.bf16.mxu0 %v9281_v35  ;;  %v7809_v35 = vld [vmem:[#allocation13 + $0x4a0] ss:$8 sps:$4 sm:$0xff]   ;;  %2885 = vmatprep.subr.bf16.mxu1 %v7811_v33  ;;  %v9558_v33 = vld [vmem:[#allocation7 + $0x50] sm:$0xff]  }
 0xb3c   :  { %2886 = vmatpush1.bf16.msra.mxu1 %v7809_v35  ;;  %v9564_v35 = vld [vmem:[#allocation7 + $0x58] sm:$0xff]  }
 0xb3d   :  { %6740 = vmatpush3.bf16.msra.mxu0 %v9284_v36  ;;  %v7814_v36 = vld [vmem:[#allocation13 + $0x4b4] ss:$8 sps:$4 sm:$0xff]  }
 0xb3e   :  { %6741 = vmatprep.subr.bf16.mxu0 %v9288_v59  ;;  %v7812_v59 = vld [vmem:[#allocation13 + $0x4b0] ss:$8 sps:$4 sm:$0xff]   ;;  %2887 = vmatprep.subr.bf16.mxu1 %v7814_v36 }
 0xb3f   :  { %v9567_v36 = vld [vmem:[#allocation7 + $0x18] sm:$0xff]  }
 0xb40   :  { %2888 = vmatpush1.bf16.msra.mxu1 %v7812_v59 }
 0xb41   :  { %6742 = vmatpush3.bf16.msra.mxu0 %v9291_v47  ;;  %v7817_v47 = vld [vmem:[#allocation13 + $0x4c4] ss:$8 sps:$4 sm:$0xff]  }
 0xb42   :  { %6743 = vmatprep.subr.bf16.mxu0 %v9402_v5  ;;  %2889 = vmatprep.subr.bf16.mxu1 %v7817_v47 }
 0xb44   :  { %2890 = vmatpush1.bf16.msra.mxu1 %v7815_v45  ;;  %v9572_v45 = vld [vmem:[#allocation7 + $0x60] sm:$0xff]  }
 0xb45   :  { %6744 = vmatpush3.bf16.msra.mxu0 %v9405_v7  ;;  %2891 = vmatprep.subr.bf16.mxu1 %v7820_v37  ;;  %v9575_v37 = vld [vmem:[#allocation7 + $0x20] sm:$0xff]  }
 0xb48   :  { %2983 = vmatmul.mubr.bf16.vlgmr.msra.gmra.mrb[60].mxu0 %v2948_v50  ;;  %2892 = vmatpush1.bf16.msra.mxu1 %v7818_v56 }
 0xb49   :  { %3162 = vmatprep.mubr.bf16.mxu0 %v8533_v0  ;;  %2893 = vmatprep.subr.bf16.mxu1 %v7823_v9  ;;  %v9578_v9 = vld [vmem:[#allocation7 + $0x68] sm:$0xff]  }
 0xb4c   :  { %2894 = vmatpush1.bf16.msra.mxu1 %v7821_v38  ;;  %v9581_v38 = vld [vmem:[#allocation7 + $0x28] sm:$0xff]  }
 0xb4d   :  { %2895 = vmatprep.subr.bf16.mxu1 %v7826_v48 }
 0xb50   :  { %2896 = vmatpush1.bf16.msra.mxu1 %v7824_v29  ;;  %v9585_v29 = vld [vmem:[#allocation7 + $0x70] sm:$0xff]  }
 0xb51   :  { %7301 = vmatprep.subr.bf16.mxu1 %v8534_v60 }
 0xbd6   :  { %v2666_v15 = vpop.f32.mrb[52].mxu0 }
 0xbd7   :  { %v9521_v46 = vadd.f32 %v2666_v15, %v9472_v54  ;;  %v2668_v55 = vpop.f32.mrb[53].mxu0  ;;  %v3187_v54 = vpop.permute.xlu1 %3186  ;;  %v9588_v15 = vld [vmem:[#allocation7 + $0x30] sm:$0xff]  }
 0xbd8   :  { %v9524_v16 = vadd.f32 %v2668_v55, %v9475_v1  ;;  %v2670_v62 = vpop.f32.mrb[54].mxu0  ;;  %v3180_v1 = vpop.permute.xlu0 %3179  ;;  %v3190_v39 = vmul.f32 %v3187_v54, %v8945_v14  ;;  %v3189_v59 = vmul.f32 %v3187_v54, %v8942_v13  ;;  %v7836_v54 = vld [vmem:[#allocation13 + $0x530] ss:$8 sps:$4 sm:$0xff]  }
 0xbd9   :  { %v2671_v58 = vpop.f32.mrb[55].mxu0  ;;  %v3183_v42 = vmul.f32 %v3180_v1, %v8939_v12  ;;  %v3182_v47 = vmul.f32 %v3180_v1, %v8936_v10  ;;  %v7841_v1 = vld [vmem:[#allocation13 + $0x544] ss:$8 sps:$4 sm:$0xff]  }
 0xbda   :  { %v7827_v58 = vld [vmem:[#allocation13 + $0x500] ss:$8 sps:$4 sm:$0xff]  }
 0xbdb   :  { %v3192_v44 = vadd.f32 %v3190_v39, %v3183_v42  ;;  %v3191_v56 = vadd.f32 %v3189_v59, %v3182_v47  ;;  %v7839_v39 = vld [vmem:[#allocation13 + $0x540] ss:$8 sps:$4 sm:$0xff]   ;;  %v7844_v42 = vld [vmem:[#allocation13 + $0x554] ss:$8 sps:$4 sm:$0xff]  }
 0xbdd   :  { %v3194_v51 = vadd.f32 %v3192_v44, %v8957_v25  ;;  %v3193_v48 = vadd.f32 %v3191_v56, %v8954_v24  ;;  %v7842_v44 = vld [vmem:[#allocation13 + $0x550] ss:$8 sps:$4 sm:$0xff]  }
 0xbdf   :  { %v3196_v50 = vmax.f32 %v3194_v51, 0.0  ;;  %v3195_v55 = vmax.f32 %v3193_v48, 0.0  ;;  %v7850_v51 = vld [vmem:[#allocation13 + $0x574] ss:$8 sps:$4 sm:$0xff]  }
 0xbe1   :  { %v3198_v53 = vpack.c.bf16 %v3196_v50, %v3196_v50  ;;  %v3197_v62 = vpack.c.bf16 %v3195_v55, %v3195_v55 }
 0xbfb   :  { %v2777_v11 = vpop.f32.mrb[56].mxu0 }
 0xbfc   :  { %v2778_v31 = vadd.f32 %v9359_v26, %v2777_v11  ;;  %v7299_v21 = vpop.f32.mrb[57].mxu0  ;;  %v7829_v11 = vld [vmem:[#allocation13 + $0x504] ss:$8 sps:$4 sm:$0xff]  }
 0xbfd   :  { %v2780_v23 = vpop.f32.mrb[58].mxu0  ;;  %3130 = vmatprep.subr.bf16.mxu0 %v7829_v11  ;;  %v7830_v21 = vld [vmem:[#allocation13 + $0x510] ss:$8 sps:$4 sm:$0xff]  }
 0xbfe   :  { %v2783_v28 = vpack.c.bf16 %v2778_v31, %v2778_v31  ;;  %v7300_v30 = vpop.f32.mrb[59].mxu0  ;;  %v7832_v31 = vld [vmem:[#allocation13 + $0x514] ss:$8 sps:$4 sm:$0xff]   ;;  %3131 = vmatpush1.bf16.msra.mxu0 %v7827_v58  ;;  %v7835_v23 = vld [vmem:[#allocation13 + $0x524] ss:$8 sps:$4 sm:$0xff]  }
 0xbff   :  { %3132 = vmatprep.subr.bf16.mxu0 %v7832_v31  ;;  %v7838_v30 = vld [vmem:[#allocation13 + $0x534] ss:$8 sps:$4 sm:$0xff]  }
 0xc00   :  { %2914 = vmatmul.mubr.bf16.vlgmr.msra.gmra.mrb[56].mxu1 %v2783_v28  ;;  %v7833_v28 = vld [vmem:[#allocation13 + $0x520] ss:$8 sps:$4 sm:$0xff]   ;;  %v9618_v11 = vld [vmem:[#allocation10 + $0x30] sm:$0xff]  }
 0xc01   :  { %7302 = vmatpush3.bf16.msra.mxu1 %v9417_v61  ;;  %7317 = vmatprep.mubr.msk.bf16.mxu1 %vm8535_vm0, %v8534_v60 }
 0xc02   :  { %7303 = vmatprep.subr.bf16.mxu1 %v8534_v60  ;;  %3133 = vmatpush1.bf16.msra.mxu0 %v7830_v21 }
 0xc03   :  { %3134 = vmatprep.subr.bf16.mxu0 %v7835_v23 }
 0xc05   :  { %7304 = vmatpush3.bf16.msra.mxu1 %v9423_v18 }
 0xc06   :  { %7305 = vmatprep.subr.bf16.mxu1 %v8534_v60  ;;  %3135 = vmatpush1.bf16.msra.mxu0 %v7833_v28 }
 0xc07   :  { %3136 = vmatprep.subr.bf16.mxu0 %v7838_v30 }
 0xc09   :  { %7306 = vmatpush3.bf16.msra.mxu1 %v9427_v20 }
 0xc0a   :  { %7307 = vmatprep.subr.bf16.mxu1 %v8534_v60  ;;  %3137 = vmatpush1.bf16.msra.mxu0 %v7836_v54  ;;  %v9623_v54 = vld [vmem:[#allocation10 + $0x38] sm:$0xff]  }
 0xc0b   :  { %3138 = vmatprep.subr.bf16.mxu0 %v7841_v1 }
 0xc0d   :  { %7308 = vmatpush3.bf16.msra.mxu1 %v9431_v63 }
 0xc0e   :  { %7309 = vmatprep.subr.bf16.mxu1 %v8534_v60  ;;  %3139 = vmatpush1.bf16.msra.mxu0 %v7839_v39  ;;  %v9627_v39 = vld [vmem:[#allocation8] ss:$0 sm:$0xff] }
 0xc0f   :  { %3140 = vmatprep.subr.bf16.mxu0 %v7844_v42 }
 0xc11   :  { %7310 = vmatpush3.bf16.msra.mxu1 %v9435_v17 }
 0xc12   :  { %7311 = vmatprep.subr.bf16.mxu1 %v8534_v60  ;;  %3141 = vmatpush1.bf16.msra.mxu0 %v7842_v44 }
 0xc15   :  { %7312 = vmatpush3.bf16.msra.mxu1 %v9441_v22 }
 0xc16   :  { %7313 = vmatprep.subr.bf16.mxu1 %v8534_v60 }
 0xc19   :  { %7314 = vmatpush3.bf16.msra.mxu1 %v9321_v2  ;;  %v9549_v2 = vld [vmem:[#allocation7] sm:$0xff]  }
 0xc1a   :  { %7315 = vmatprep.subr.bf16.mxu1 %v8534_v60 }
 0xc1b   :  { %v6745_v41 = vpop.f32.mrb[60].mxu0 }
 0xc1c   :  { %v6746_v43 = vpop.f32.mrb[61].mxu0 }
 0xc1d   :  { %v6747_v57 = vadd.f32 %v6746_v43, %v6745_v41  ;;  %v6748_v3 = vpop.f32.mrb[62].mxu0  ;;  %7316 = vmatpush3.bf16.msra.mxu1 %v9326_v27  ;;  %v9555_v27 = vld [vmem:[#allocation7 + $0x8] sm:$0xff]  }
 0xc1e   :  { %v6749_v49 = vpop.f32.mrb[63].mxu0  ;;  %6760 = vmatprep.subr.bf16.mxu1 %v9382_v34  ;;  %v7847_v41 = vld [vmem:[#allocation13 + $0x564] ss:$8 sps:$4 sm:$0xff]   ;;  %v7845_v43 = vld [vmem:[#allocation13 + $0x560] ss:$8 sps:$4 sm:$0xff]  }
 0xc1f   :  { %v2985_v4 = vadd.f32 %v9330_v19, %v6747_v57  ;;  %v9561_v19 = vld [vmem:[#allocation7 + $0x10] sm:$0xff]   ;;  %3142 = vmatprep.subr.bf16.mxu0 %v7847_v41 }
 0xc20   :  { %3143 = vmatpush1.bf16.msra.mxu0 %v7845_v43  ;;  %v7848_v57 = vld [vmem:[#allocation13 + $0x570] ss:$8 sps:$4 sm:$0xff]  }
 0xc21   :  { %v2990_v40 = vmax.f32 %v2985_v4, 0.0  ;;  %3144 = vmatprep.subr.bf16.mxu0 %v7850_v51 }
 0xc23   :  { %v2991_v52 = vpack.c.bf16 %v2990_v40, %v2990_v40 }
 0xc24   :  { %3145 = vmatpush1.bf16.msra.mxu0 %v7848_v57 }
 0xc25   :  { %7318 = vmatmul.mubr.bf16.vlgmr.msra.gmra.mrb[60].mxu1 %v2991_v52  ;;  %7321 = vmatprep.subr.bf16.mxu0 %v8534_v60 }
 0xc26   :  { %6761 = vmatpush3.bf16.msra.mxu1 %v9549_v2  ;;  %3231 = vmatprep.mubr.bf16.mxu1 %v3198_v53 }
 0xc27   :  { %6762 = vmatprep.subr.bf16.mxu1 %v9552_v32 }
 0xc2a   :  { %6763 = vmatpush3.bf16.msra.mxu1 %v9555_v27 }
 0xc2b   :  { %6764 = vmatprep.subr.bf16.mxu1 %v9558_v33 }
 0xc2e   :  { %6765 = vmatpush3.bf16.msra.mxu1 %v9561_v19 }
 0xc2f   :  { %6766 = vmatprep.subr.bf16.mxu1 %v9564_v35 }
 0xc32   :  { %6767 = vmatpush3.bf16.msra.mxu1 %v9567_v36 }
 0xc33   :  { %6768 = vmatprep.subr.bf16.mxu1 %v9572_v45 }
 0xc36   :  { %6769 = vmatpush3.bf16.msra.mxu1 %v9575_v37 }
 0xc37   :  { %6770 = vmatprep.subr.bf16.mxu1 %v9578_v9 }
 0xc3a   :  { %6771 = vmatpush3.bf16.msra.mxu1 %v9581_v38 }
 0xc3b   :  { %6772 = vmatprep.subr.bf16.mxu1 %v9585_v29 }
 0xc3e   :  { %6773 = vmatpush3.bf16.msra.mxu1 %v9588_v15 }
 0xc3f   :  { %6774 = vmatprep.subr.bf16.mxu1 %v9402_v5 }
 0xc42   :  { %6775 = vmatpush3.bf16.msra.mxu1 %v9405_v7 }
 0xc45   :  { %3232 = vmatmul.mubr.bf16.vlgmr.msra.gmra.mrb[64].mxu1 %v3197_v62 }
 0xc46   :  { %3411 = vmatprep.mubr.bf16.mxu1 %v8533_v0 }
 0xcd3   :  { %v2915_v3 = vpop.f32.mrb[56].mxu1 }
 0xcd4   :  { %v9596_v49 = vadd.f32 %v2915_v3, %v9521_v46  ;;  %v2917_v4 = vpop.f32.mrb[57].mxu1  ;;  %v3429_v46 = vpop.permute.xlu0 %3428 }
 0xcd5   :  { %v9599_v50 = vadd.f32 %v2917_v4, %v9524_v16  ;;  %v2919_v40 = vpop.f32.mrb[58].mxu1  ;;  %v3432_v62 = vmul.f32 %v3429_v46, %v8939_v12  ;;  %v3431_v57 = vmul.f32 %v3429_v46, %v8936_v10  ;;  %v7863_v46 = vld [vmem:[#allocation13 + $0x5c0] ss:$8 sps:$4 sm:$0xff]  }
 0xcd6   :  { %v2920_v52 = vpop.f32.mrb[59].mxu1 }
 0xcf8   :  { %v3026_v53 = vpop.f32.mrb[60].mxu1 }
 0xcf9   :  { %v3027_v59 = vadd.f32 %v9359_v26, %v3026_v53  ;;  %v7319_v47 = vpop.f32.mrb[61].mxu1  ;;  %v3436_v26 = vpop.permute.xlu1 %3435  ;;  %v7851_v53 = vld [vmem:[#allocation13 + $0x580] ss:$8 sps:$4 sm:$0xff]  }
 0xcfa   :  { %v3029_v56 = vpop.f32.mrb[62].mxu1  ;;  %v3439_v16 = vmul.f32 %v3436_v26, %v8945_v14  ;;  %v7856_v47 = vld [vmem:[#allocation13 + $0x594] ss:$8 sps:$4 sm:$0xff]  }
 0xcfb   :  { %v3032_v48 = vpack.c.bf16 %v3027_v59, %v3027_v59  ;;  %v7320_v55 = vpop.f32.mrb[63].mxu1  ;;  %v7853_v59 = vld [vmem:[#allocation13 + $0x584] ss:$8 sps:$4 sm:$0xff]   ;;  %v7854_v56 = vld [vmem:[#allocation13 + $0x590] ss:$8 sps:$4 sm:$0xff]  }
 0xcfc   :  { %v3441_v58 = vadd.f32 %v3439_v16, %v3432_v62  ;;  %3379 = vmatprep.subr.bf16.mxu1 %v7853_v59  ;;  %v7857_v55 = vld [vmem:[#allocation13 + $0x5a0] ss:$8 sps:$4 sm:$0xff]   ;;  %v7868_v16 = vld [vmem:[#allocation13 + $0x5d4] ss:$8 sps:$4 sm:$0xff]   ;;  %v7866_v62 = vld [vmem:[#allocation13 + $0x5d0] ss:$8 sps:$4 sm:$0xff]  }
 0xcfd   :  { %3163 = vmatmul.mubr.bf16.vlgmr.msra.gmra.mrb[64].mxu0 %v3032_v48  ;;  %3380 = vmatpush1.bf16.msra.mxu1 %v7851_v53  ;;  %v7859_v48 = vld [vmem:[#allocation13 + $0x5a4] ss:$8 sps:$4 sm:$0xff]  }
 0xcfe   :  { %7322 = vmatpush3.bf16.msra.mxu0 %v9417_v61  ;;  %7337 = vmatprep.mubr.msk.bf16.mxu0 %vm8535_vm0, %v8534_v60  ;;  %v3443_v23 = vadd.f32 %v3441_v58, %v8957_v25  ;;  %v7871_v58 = vld [vmem:[#allocation13 + $0x5e4] ss:$8 sps:$4 sm:$0xff]  }
 0xcff   :  { %7323 = vmatprep.subr.bf16.mxu0 %v8534_v60  ;;  %3381 = vmatprep.subr.bf16.mxu1 %v7856_v47 }
 0xd00   :  { %v3445_v44 = vmax.f32 %v3443_v23, 0.0  ;;  %v7872_v23 = vld [vmem:[#allocation13 + $0x5f0] ss:$8 sps:$4 sm:$0xff]  }
 0xd01   :  { %3382 = vmatpush1.bf16.msra.mxu1 %v7854_v56  ;;  %v9679_v56 = vld [vmem:[#allocation7 + $0x40] sm:$0xff]  }
 0xd02   :  { %7324 = vmatpush3.bf16.msra.mxu0 %v9423_v18  ;;  %v3447_v51 = vpack.c.bf16 %v3445_v44, %v3445_v44  ;;  %3383 = vmatprep.subr.bf16.mxu1 %v7859_v48 }
 0xd03   :  { %7325 = vmatprep.subr.bf16.mxu0 %v8534_v60 }
 0xd05   :  { %3384 = vmatpush1.bf16.msra.mxu1 %v7857_v55 }
 0xd06   :  { %7326 = vmatpush3.bf16.msra.mxu0 %v9427_v20 }
 0xd07   :  { %7327 = vmatprep.subr.bf16.mxu0 %v8534_v60 }
 0xd0a   :  { %7328 = vmatpush3.bf16.msra.mxu0 %v9431_v63 }
 0xd0b   :  { %7329 = vmatprep.subr.bf16.mxu0 %v8534_v60 }
 0xd0e   :  { %7330 = vmatpush3.bf16.msra.mxu0 %v9435_v17 }
 0xd0f   :  { %7331 = vmatprep.subr.bf16.mxu0 %v8534_v60 }
 0xd12   :  { %7332 = vmatpush3.bf16.msra.mxu0 %v9441_v22 }
 0xd13   :  { %7333 = vmatprep.subr.bf16.mxu0 %v8534_v60 }
 0xd16   :  { %7334 = vmatpush3.bf16.msra.mxu0 %v9618_v11 }
 0xd17   :  { %7335 = vmatprep.subr.bf16.mxu0 %v8534_v60 }
 0xd18   :  { %v6776_v31 = vpop.f32.mrb[64].mxu1 }
 0xd19   :  { %v6777_v21 = vpop.f32.mrb[65].mxu1 }
 0xd1a   :  { %v6778_v28 = vadd.f32 %v6777_v21, %v6776_v31  ;;  %v6779_v30 = vpop.f32.mrb[66].mxu1  ;;  %7336 = vmatpush3.bf16.msra.mxu0 %v9623_v54  ;;  %v7869_v31 = vld [vmem:[#allocation13 + $0x5e0] ss:$8 sps:$4 sm:$0xff]   ;;  %v7874_v21 = vld [vmem:[#allocation13 + $0x5f4] ss:$8 sps:$4 sm:$0xff]  }
 0xd1b   :  { %v6780_v1 = vpop.f32.mrb[67].mxu1  ;;  %6791 = vmatprep.subr.bf16.mxu0 %v9382_v34  ;;  %v3438_v34 = vmul.f32 %v3436_v26, %v8942_v13  ;;  %v7862_v26 = vld [vmem:[#allocation13 + $0x5b4] ss:$8 sps:$4 sm:$0xff]  }
 0xd1c   :  { %v3234_v42 = vadd.f32 %v9627_v39, %v6778_v28  ;;  %3385 = vmatprep.subr.bf16.mxu1 %v7862_v26 }
 0xd1d   :  { %v3440_v3 = vadd.f32 %v3438_v34, %v3431_v57 }
 0xd1e   :  { %v3239_v41 = vmax.f32 %v3234_v42, 0.0 }
 0xd1f   :  { %v3442_v4 = vadd.f32 %v3440_v3, %v8954_v24 }
 0xd20   :  { %v3240_v43 = vpack.c.bf16 %v3239_v41, %v3239_v41 }
 0xd21   :  { %v3444_v40 = vmax.f32 %v3442_v4, 0.0 }
 0xd22   :  { %7338 = vmatmul.mubr.bf16.vlgmr.msra.gmra.mrb[68].mxu0 %v3240_v43 }
 0xd23   :  { %6792 = vmatpush3.bf16.msra.mxu0 %v9549_v2  ;;  %3480 = vmatprep.mubr.bf16.mxu0 %v3447_v51  ;;  %v3446_v52 = vpack.c.bf16 %v3444_v40, %v3444_v40  ;;  %v9656_v51 = vld [vmem:[#allocation11] ss:$0 sm:$0xff] }
 0xd24   :  { %6793 = vmatprep.subr.bf16.mxu0 %v9552_v32 }
 0xd27   :  { %6794 = vmatpush3.bf16.msra.mxu0 %v9555_v27 }
 0xd28   :  { %6795 = vmatprep.subr.bf16.mxu0 %v9558_v33 }
 0xd2b   :  { %6796 = vmatpush3.bf16.msra.mxu0 %v9561_v19 }
 0xd2c   :  { %6797 = vmatprep.subr.bf16.mxu0 %v9564_v35 }
 0xd2f   :  { %6798 = vmatpush3.bf16.msra.mxu0 %v9567_v36 }
 0xd30   :  { %6799 = vmatprep.subr.bf16.mxu0 %v9572_v45 }
 0xd33   :  { %6800 = vmatpush3.bf16.msra.mxu0 %v9575_v37 }
 0xd34   :  { %6801 = vmatprep.subr.bf16.mxu0 %v9578_v9 }
 0xd37   :  { %6802 = vmatpush3.bf16.msra.mxu0 %v9581_v38 }
 0xd38   :  { %6803 = vmatprep.subr.bf16.mxu0 %v9585_v29 }
 0xd3b   :  { %6804 = vmatpush3.bf16.msra.mxu0 %v9588_v15 }
 0xd3c   :  { %6805 = vmatprep.subr.bf16.mxu0 %v9402_v5  ;;  %v7860_v5 = vld [vmem:[#allocation13 + $0x5b0] ss:$8 sps:$4 sm:$0xff]  }
 0xd3d   :  { %3386 = vmatpush1.bf16.msra.mxu1 %v7860_v5 }
 0xd3f   :  { %6806 = vmatpush3.bf16.msra.mxu0 %v9405_v7  ;;  %v7865_v7 = vld [vmem:[#allocation13 + $0x5c4] ss:$8 sps:$4 sm:$0xff]  }
 0xd40   :  { %3387 = vmatprep.subr.bf16.mxu1 %v7865_v7 }
 0xd41   :  { %3388 = vmatpush1.bf16.msra.mxu1 %v7863_v46 }
 0xd42   :  { %3481 = vmatmul.mubr.bf16.vlgmr.msra.gmra.mrb[72].mxu0 %v3446_v52  ;;  %3389 = vmatprep.subr.bf16.mxu1 %v7868_v16 }
 0xd43   :  { %3660 = vmatprep.mubr.bf16.mxu0 %v8533_v0 }
 0xd45   :  { %3390 = vmatpush1.bf16.msra.mxu1 %v7866_v62 }
 0xd46   :  { %3391 = vmatprep.subr.bf16.mxu1 %v7871_v58 }
 0xd49   :  { %3392 = vmatpush1.bf16.msra.mxu1 %v7869_v31  ;;  %v9699_v31 = vld [vmem:[#allocation7 + $0x78] sm:$0xff]  }
 0xd4a   :  { %3393 = vmatprep.subr.bf16.mxu1 %v7874_v21  ;;  %v9702_v21 = vld [vmem:[#allocation7 + $0x38] sm:$0xff]  }
 0xd4d   :  { %3394 = vmatpush1.bf16.msra.mxu1 %v7872_v23 }
 0xd4e   :  { %7341 = vmatprep.subr.bf16.mxu1 %v8534_v60 }
 0xdd0   :  { %v3164_v28 = vpop.f32.mrb[64].mxu0 }
 0xdd1   :  { %v9651_v30 = vadd.f32 %v3164_v28, %v9596_v49  ;;  %v3166_v1 = vpop.f32.mrb[65].mxu0  ;;  %v3685_v49 = vpop.permute.xlu1 %3684  ;;  %v7875_v28 = vld [vmem:[#allocation13 + $0x600] ss:$8 sps:$4 sm:$0xff]  }
 0xdd2   :  { %v9654_v42 = vadd.f32 %v3166_v1, %v9599_v50  ;;  %v3168_v44 = vpop.f32.mrb[66].mxu0  ;;  %v3678_v50 = vpop.permute.xlu0 %3677  ;;  %v3687_v7 = vmul.f32 %v3685_v49, %v8942_v13  ;;  %v7877_v1 = vld [vmem:[#allocation13 + $0x604] ss:$8 sps:$4 sm:$0xff]  }
 0xdd3   :  { %v3169_v41 = vpop.f32.mrb[67].mxu0  ;;  %v3680_v46 = vmul.f32 %v3678_v50, %v8936_v10  ;;  %v7880_v44 = vld [vmem:[#allocation13 + $0x614] ss:$8 sps:$4 sm:$0xff]   ;;  %3628 = vmatprep.subr.bf16.mxu0 %v7877_v1 }
 0xdd4   :  { %3629 = vmatpush1.bf16.msra.mxu0 %v7875_v28  ;;  %v7878_v41 = vld [vmem:[#allocation13 + $0x610] ss:$8 sps:$4 sm:$0xff]   ;;  %v9732_v28 = vld [vmem:[#allocation10 + $0x20] sm:$0xff]  }
 0xdd5   :  { %v3689_v16 = vadd.f32 %v3687_v7, %v3680_v46  ;;  %3630 = vmatprep.subr.bf16.mxu0 %v7880_v44 }
 0xdd7   :  { %v3691_v62 = vadd.f32 %v3689_v16, %v8954_v24  ;;  %v9714_v16 = vld [vmem:[#allocation10] sm:$0xff]  }
 0xdd8   :  { %3631 = vmatpush1.bf16.msra.mxu0 %v7878_v41  ;;  %v9738_v41 = vld [vmem:[#allocation10 + $0x28] sm:$0xff]  }
 0xdd9   :  { %v3693_v58 = vmax.f32 %v3691_v62, 0.0  ;;  %v9728_v62 = vld [vmem:[#allocation10 + $0x18] sm:$0xff]  }
 0xddb   :  { %v3695_v23 = vpack.c.bf16 %v3693_v58, %v3693_v58  ;;  %v3934_v58 = vpop.permute.xlu1 %3933 }
 0xddc   :  { %v3937_v1 = vmul.f32 %v3934_v58, %v8945_v14 }
 0xdf5   :  { %v3275_v43 = vpop.f32.mrb[68].mxu0 }
 0xdf6   :  { %v3276_v34 = vadd.f32 %v9656_v51, %v3275_v43  ;;  %v7339_v57 = vpop.f32.mrb[69].mxu0  ;;  %v7883_v43 = vld [vmem:[#allocation13 + $0x624] ss:$8 sps:$4 sm:$0xff]  }
 0xdf7   :  { %v3278_v3 = vpop.f32.mrb[70].mxu0  ;;  %3632 = vmatprep.subr.bf16.mxu0 %v7883_v43  ;;  %v7886_v57 = vld [vmem:[#allocation13 + $0x634] ss:$8 sps:$4 sm:$0xff]  }
 0xdf8   :  { %v3281_v4 = vpack.c.bf16 %v3276_v34, %v3276_v34  ;;  %v7340_v40 = vpop.f32.mrb[71].mxu0  ;;  %v7881_v34 = vld [vmem:[#allocation13 + $0x620] ss:$8 sps:$4 sm:$0xff]   ;;  %v7884_v3 = vld [vmem:[#allocation13 + $0x630] ss:$8 sps:$4 sm:$0xff]  }
 0xdf9   :  { %3633 = vmatpush1.bf16.msra.mxu0 %v7881_v34  ;;  %v7887_v40 = vld [vmem:[#allocation13 + $0x640] ss:$8 sps:$4 sm:$0xff]  }
 0xdfa   :  { %3412 = vmatmul.mubr.bf16.vlgmr.msra.gmra.mrb[68].mxu1 %v3281_v4  ;;  %3634 = vmatprep.subr.bf16.mxu0 %v7886_v57  ;;  %v7889_v4 = vld [vmem:[#allocation13 + $0x644] ss:$8 sps:$4 sm:$0xff]  }
 0xdfb   :  { %7342 = vmatpush3.bf16.msra.mxu1 %v9417_v61  ;;  %7357 = vmatprep.mubr.msk.bf16.mxu1 %vm8535_vm0, %v8534_v60  ;;  %v3688_v61 = vmul.f32 %v3685_v49, %v8945_v14  ;;  %v7892_v49 = vld [vmem:[#allocation13 + $0x654] ss:$8 sps:$4 sm:$0xff]  }
 0xdfc   :  { %7343 = vmatprep.subr.bf16.mxu1 %v8534_v60 }
 0xdfd   :  { %3635 = vmatpush1.bf16.msra.mxu0 %v7884_v3 }
 0xdfe   :  { %3636 = vmatprep.subr.bf16.mxu0 %v7889_v4 }
 0xdff   :  { %7344 = vmatpush3.bf16.msra.mxu1 %v9423_v18  ;;  %v3681_v18 = vmul.f32 %v3678_v50, %v8939_v12  ;;  %v7890_v50 = vld [vmem:[#allocation13 + $0x650] ss:$8 sps:$4 sm:$0xff]  }
 0xe00   :  { %7345 = vmatprep.subr.bf16.mxu1 %v8534_v60 }
 0xe01   :  { %3637 = vmatpush1.bf16.msra.mxu0 %v7887_v40 }
 0xe02   :  { %3638 = vmatprep.subr.bf16.mxu0 %v7892_v49 }
 0xe03   :  { %7346 = vmatpush3.bf16.msra.mxu1 %v9427_v20  ;;  %v3690_v20 = vadd.f32 %v3688_v61, %v3681_v18  ;;  %v7895_v61 = vld [vmem:[#allocation13 + $0x664] ss:$8 sps:$4 sm:$0xff]   ;;  %v7893_v18 = vld [vmem:[#allocation13 + $0x660] ss:$8 sps:$4 sm:$0xff]  }
 0xe04   :  { %7347 = vmatprep.subr.bf16.mxu1 %v8534_v60 }
 0xe05   :  { %v3692_v53 = vadd.f32 %v3690_v20, %v8957_v25  ;;  %3639 = vmatpush1.bf16.msra.mxu0 %v7890_v50  ;;  %v7898_v20 = vld [vmem:[#allocation13 + $0x674] ss:$8 sps:$4 sm:$0xff]  }
 0xe06   :  { %3640 = vmatprep.subr.bf16.mxu0 %v7895_v61 }
 0xe07   :  { %7348 = vmatpush3.bf16.msra.mxu1 %v9431_v63  ;;  %v3694_v48 = vmax.f32 %v3692_v53, 0.0 }
 0xe08   :  { %7349 = vmatprep.subr.bf16.mxu1 %v8534_v60 }
 0xe09   :  { %v3696_v5 = vpack.c.bf16 %v3694_v48, %v3694_v48  ;;  %3641 = vmatpush1.bf16.msra.mxu0 %v7893_v18 }
 0xe0a   :  { %3642 = vmatprep.subr.bf16.mxu0 %v7898_v20 }
 0xe0b   :  { %7350 = vmatpush3.bf16.msra.mxu1 %v9435_v17 }
 0xe0c   :  { %7351 = vmatprep.subr.bf16.mxu1 %v8534_v60 }
 0xe0f   :  { %7352 = vmatpush3.bf16.msra.mxu1 %v9441_v22 }
 0xe10   :  { %7353 = vmatprep.subr.bf16.mxu1 %v8534_v60 }
 0xe13   :  { %7354 = vmatpush3.bf16.msra.mxu1 %v9618_v11 }
 0xe14   :  { %7355 = vmatprep.subr.bf16.mxu1 %v8534_v60 }
 0xe15   :  { %v6807_v63 = vpop.f32.mrb[72].mxu0 }
 0xe16   :  { %v6808_v52 = vpop.f32.mrb[73].mxu0 }
 0xe17   :  { %v6809_v17 = vadd.f32 %v6808_v52, %v6807_v63  ;;  %v6810_v59 = vpop.f32.mrb[74].mxu0  ;;  %7356 = vmatpush3.bf16.msra.mxu1 %v9623_v54  ;;  %v7896_v63 = vld [vmem:[#allocation13 + $0x670] ss:$8 sps:$4 sm:$0xff]  }
 0xe18   :  { %v6811_v47 = vpop.f32.mrb[75].mxu0  ;;  %6822 = vmatprep.subr.bf16.mxu1 %v9679_v56  ;;  %3643 = vmatpush1.bf16.msra.mxu0 %v7896_v63 }
 0xe19   :  { %v3483_v22 = vadd.f32 %v9627_v39, %v6809_v17  ;;  %7361 = vmatprep.subr.bf16.mxu0 %v8534_v60 }
 0xe1b   :  { %v3488_v55 = vmax.f32 %v3483_v22, 0.0 }
 0xe1d   :  { %v3489_v26 = vpack.c.bf16 %v3488_v55, %v3488_v55 }
 0xe1f   :  { %7358 = vmatmul.mubr.bf16.vlgmr.msra.gmra.mrb[72].mxu1 %v3489_v26 }
 0xe20   :  { %6823 = vmatpush3.bf16.msra.mxu1 %v9549_v2  ;;  %3729 = vmatprep.mubr.bf16.mxu1 %v3696_v5 }
 0xe21   :  { %6824 = vmatprep.subr.bf16.mxu1 %v9552_v32 }
 0xe24   :  { %6825 = vmatpush3.bf16.msra.mxu1 %v9555_v27 }
 0xe25   :  { %6826 = vmatprep.subr.bf16.mxu1 %v9558_v33 }
 0xe28   :  { %6827 = vmatpush3.bf16.msra.mxu1 %v9561_v19 }
 0xe29   :  { %6828 = vmatprep.subr.bf16.mxu1 %v9564_v35 }
 0xe2c   :  { %6829 = vmatpush3.bf16.msra.mxu1 %v9567_v36 }
 0xe2d   :  { %6830 = vmatprep.subr.bf16.mxu1 %v9572_v45 }
 0xe30   :  { %6831 = vmatpush3.bf16.msra.mxu1 %v9575_v37 }
 0xe31   :  { %6832 = vmatprep.subr.bf16.mxu1 %v9578_v9 }
 0xe34   :  { %6833 = vmatpush3.bf16.msra.mxu1 %v9581_v38 }
 0xe35   :  { %6834 = vmatprep.subr.bf16.mxu1 %v9585_v29 }
 0xe38   :  { %6835 = vmatpush3.bf16.msra.mxu1 %v9588_v15 }
 0xe39   :  { %6836 = vmatprep.subr.bf16.mxu1 %v9699_v31 }
 0xe3c   :  { %6837 = vmatpush3.bf16.msra.mxu1 %v9702_v21 }
 0xe3f   :  { %3730 = vmatmul.mubr.bf16.vlgmr.msra.gmra.mrb[76].mxu1 %v3695_v23  ;;  %v3927_v23 = vpop.permute.xlu0 %3926 }
 0xe40   :  { %3909 = vmatprep.mubr.bf16.mxu1 %v8533_v0  ;;  %v3930_v44 = vmul.f32 %v3927_v23, %v8939_v12 }
 0xe42   :  { %v3939_v43 = vadd.f32 %v3937_v1, %v3930_v44  ;;  %v7910_v1 = vld [vmem:[#allocation13 + $0x6b4] ss:$8 sps:$4 sm:$0xff]   ;;  %v7908_v44 = vld [vmem:[#allocation13 + $0x6b0] ss:$8 sps:$4 sm:$0xff]  }
 0xe44   :  { %v3941_v3 = vadd.f32 %v3939_v43, %v8957_v25  ;;  %v7913_v43 = vld [vmem:[#allocation13 + $0x6c4] ss:$8 sps:$4 sm:$0xff]  }
 0xe46   :  { %v3943_v61 = vmax.f32 %v3941_v3, 0.0  ;;  %v7914_v3 = vld [vmem:[#allocation13 + $0x6d0] ss:$8 sps:$4 sm:$0xff]  }
 0xe48   :  { %v3945_v63 = vpack.c.bf16 %v3943_v61, %v3943_v61 }
 0xecd   :  { %v3413_v52 = vpop.f32.mrb[68].mxu1 }
 0xece   :  { %v9708_v53 = vadd.f32 %v3413_v52, %v9651_v30  ;;  %v3415_v17 = vpop.f32.mrb[69].mxu1  ;;  %v9720_v30 = vld [vmem:[#allocation10 + $0x8] sm:$0xff]   ;;  %v3936_v52 = vmul.f32 %v3934_v58, %v8942_v13 }
 0xecf   :  { %v9711_v59 = vadd.f32 %v3415_v17, %v9654_v42  ;;  %v3417_v47 = vpop.f32.mrb[70].mxu1  ;;  %v9724_v42 = vld [vmem:[#allocation10 + $0x10] sm:$0xff]   ;;  %v3929_v17 = vmul.f32 %v3927_v23, %v8936_v10  ;;  %v7905_v23 = vld [vmem:[#allocation13 + $0x6a0] ss:$8 sps:$4 sm:$0xff]  }
 0xed0   :  { %v3418_v22 = vpop.f32.mrb[71].mxu1  ;;  %v7907_v58 = vld [vmem:[#allocation13 + $0x6a4] ss:$8 sps:$4 sm:$0xff]  }
 0xed1   :  { %v3938_v47 = vadd.f32 %v3936_v52, %v3929_v17 }
 0xed3   :  { %v3940_v22 = vadd.f32 %v3938_v47, %v8954_v24 }
 0xef2   :  { %v3524_v48 = vpop.f32.mrb[72].mxu1 }
 0xef3   :  { %v3525_v55 = vadd.f32 %v9656_v51, %v3524_v48  ;;  %v7359_v26 = vpop.f32.mrb[73].mxu1  ;;  %v3942_v48 = vmax.f32 %v3940_v22, 0.0 }
 0xef4   :  { %v3527_v5 = vpop.f32.mrb[74].mxu1  ;;  %v7899_v26 = vld [vmem:[#allocation13 + $0x680] ss:$8 sps:$4 sm:$0xff]  }
 0xef5   :  { %v3530_v7 = vpack.c.bf16 %v3525_v55, %v3525_v55  ;;  %v7360_v46 = vpop.f32.mrb[75].mxu1  ;;  %v3944_v55 = vpack.c.bf16 %v3942_v48, %v3942_v48  ;;  %v7901_v5 = vld [vmem:[#allocation13 + $0x684] ss:$8 sps:$4 sm:$0xff]  }
 0xef6   :  { %3877 = vmatprep.subr.bf16.mxu1 %v7901_v5  ;;  %v7902_v46 = vld [vmem:[#allocation13 + $0x690] ss:$8 sps:$4 sm:$0xff]  }
 0xef7   :  { %3661 = vmatmul.mubr.bf16.vlgmr.msra.gmra.mrb[76].mxu0 %v3530_v7  ;;  %v7904_v7 = vld [vmem:[#allocation13 + $0x694] ss:$8 sps:$4 sm:$0xff]   ;;  %3878 = vmatpush1.bf16.msra.mxu1 %v7899_v26 }
 0xef8   :  { %7362 = vmatpush3.bf16.msra.mxu0 %v9714_v16  ;;  %7377 = vmatprep.mubr.msk.bf16.mxu0 %vm8535_vm0, %v8534_v60 }
 0xef9   :  { %7363 = vmatprep.subr.bf16.mxu0 %v8534_v60  ;;  %3879 = vmatprep.subr.bf16.mxu1 %v7904_v7 }
 0xefb   :  { %3880 = vmatpush1.bf16.msra.mxu1 %v7902_v46 }
 0xefc   :  { %7364 = vmatpush3.bf16.msra.mxu0 %v9720_v30  ;;  %3881 = vmatprep.subr.bf16.mxu1 %v7907_v58 }
 0xefd   :  { %7365 = vmatprep.subr.bf16.mxu0 %v8534_v60 }
 0xeff   :  { %3882 = vmatpush1.bf16.msra.mxu1 %v7905_v23 }
 0xf00   :  { %7366 = vmatpush3.bf16.msra.mxu0 %v9724_v42  ;;  %3883 = vmatprep.subr.bf16.mxu1 %v7910_v1 }
 0xf01   :  { %7367 = vmatprep.subr.bf16.mxu0 %v8534_v60 }
 0xf03   :  { %3884 = vmatpush1.bf16.msra.mxu1 %v7908_v44 }
 0xf04   :  { %7368 = vmatpush3.bf16.msra.mxu0 %v9728_v62  ;;  %3885 = vmatprep.subr.bf16.mxu1 %v7913_v43 }
 0xf05   :  { %7369 = vmatprep.subr.bf16.mxu0 %v8534_v60 }
 0xf08   :  { %7370 = vmatpush3.bf16.msra.mxu0 %v9732_v28 }
 0xf09   :  { %7371 = vmatprep.subr.bf16.mxu0 %v8534_v60 }
 0xf0c   :  { %7372 = vmatpush3.bf16.msra.mxu0 %v9738_v41 }
 0xf0d   :  { %7373 = vmatprep.subr.bf16.mxu0 %v8534_v60 }
 0xf10   :  { %7374 = vmatpush3.bf16.msra.mxu0 %v9618_v11 }
 0xf11   :  { %7375 = vmatprep.subr.bf16.mxu0 %v8534_v60 }
 0xf12   :  { %v6838_v34 = vpop.f32.mrb[76].mxu1 }
 0xf13   :  { %v6839_v57 = vpop.f32.mrb[77].mxu1 }
 0xf14   :  { %v6840_v4 = vadd.f32 %v6839_v57, %v6838_v34  ;;  %v6841_v40 = vpop.f32.mrb[78].mxu1  ;;  %7376 = vmatpush3.bf16.msra.mxu0 %v9623_v54  ;;  %v7911_v34 = vld [vmem:[#allocation13 + $0x6c0] ss:$8 sps:$4 sm:$0xff]   ;;  %v7916_v57 = vld [vmem:[#allocation13 + $0x6d4] ss:$8 sps:$4 sm:$0xff]  }
 0xf15   :  { %v6842_v49 = vpop.f32.mrb[79].mxu1  ;;  %6853 = vmatprep.subr.bf16.mxu0 %v9679_v56  ;;  %3886 = vmatpush1.bf16.msra.mxu1 %v7911_v34  ;;  %v7917_v40 = vld [vmem:[#allocation13 + $0x6e0] ss:$8 sps:$4 sm:$0xff]  }
 0xf16   :  { %v3732_v50 = vadd.f32 %v9627_v39, %v6840_v4  ;;  %3887 = vmatprep.subr.bf16.mxu1 %v7916_v57  ;;  %v7919_v4 = vld [vmem:[#allocation13 + $0x6e4] ss:$8 sps:$4 sm:$0xff]   ;;  %v7922_v49 = vld [vmem:[#allocation13 + $0x6f4] ss:$8 sps:$4 sm:$0xff]  }
 0xf18   :  { %v3737_v18 = vmax.f32 %v3732_v50, 0.0  ;;  %v7920_v50 = vld [vmem:[#allocation13 + $0x6f0] ss:$8 sps:$4 sm:$0xff]  }
 0xf19   :  { %3888 = vmatpush1.bf16.msra.mxu1 %v7914_v3 }
 0xf1a   :  { %v3738_v20 = vpack.c.bf16 %v3737_v18, %v3737_v18  ;;  %3889 = vmatprep.subr.bf16.mxu1 %v7919_v4 }
 0xf1c   :  { %7378 = vmatmul.mubr.bf16.vlgmr.msra.gmra.mrb[80].mxu0 %v3738_v20 }
 0xf1d   :  { %6854 = vmatpush3.bf16.msra.mxu0 %v9549_v2  ;;  %3978 = vmatprep.mubr.bf16.mxu0 %v3945_v63 }
 0xf1e   :  { %6855 = vmatprep.subr.bf16.mxu0 %v9552_v32  ;;  %3890 = vmatpush1.bf16.msra.mxu1 %v7917_v40 }
 0xf1f   :  { %3891 = vmatprep.subr.bf16.mxu1 %v7922_v49 }
 0xf21   :  { %6856 = vmatpush3.bf16.msra.mxu0 %v9555_v27 }
 0xf22   :  { %6857 = vmatprep.subr.bf16.mxu0 %v9558_v33  ;;  %3892 = vmatpush1.bf16.msra.mxu1 %v7920_v50 }
 0xf23   :  { %7381 = vmatprep.subr.bf16.mxu1 %v8534_v60 }
 0xf25   :  { %6858 = vmatpush3.bf16.msra.mxu0 %v9561_v19 }
 0xf26   :  { %6859 = vmatprep.subr.bf16.mxu0 %v9564_v35 }
 0xf29   :  { %6860 = vmatpush3.bf16.msra.mxu0 %v9567_v36 }
 0xf2a   :  { %6861 = vmatprep.subr.bf16.mxu0 %v9572_v45 }
 0xf2d   :  { %6862 = vmatpush3.bf16.msra.mxu0 %v9575_v37 }
 0xf2e   :  { %6863 = vmatprep.subr.bf16.mxu0 %v9578_v9 }
 0xf31   :  { %6864 = vmatpush3.bf16.msra.mxu0 %v9581_v38 }
 0xf32   :  { %6865 = vmatprep.subr.bf16.mxu0 %v9585_v29 }
 0xf35   :  { %6866 = vmatpush3.bf16.msra.mxu0 %v9588_v15 }
 0xf36   :  { %6867 = vmatprep.subr.bf16.mxu0 %v9699_v31 }
 0xf39   :  { %6868 = vmatpush3.bf16.msra.mxu0 %v9702_v21 }
 0xf3c   :  { %3979 = vmatmul.mubr.bf16.vlgmr.msra.gmra.mrb[84].mxu0 %v3944_v55 }
 0xf3d   :  { %4158 = vmatprep.mubr.bf16.mxu0 %v8533_v0 }
 0xfca   :  { %v3662_v61 = vpop.f32.mrb[76].mxu0 }
 0xfcb   :  { %v9769_v18 = vadd.f32 %v3662_v61, %v9708_v53  ;;  %v3664_v20 = vpop.f32.mrb[77].mxu0  ;;  %v4183_v53 = vpop.permute.xlu1 %4182 }
 0xfcc   :  { %v9772_v63 = vadd.f32 %v3664_v20, %v9711_v59  ;;  %v3666_v52 = vpop.f32.mrb[78].mxu0  ;;  %v4176_v59 = vpop.permute.xlu0 %4175  ;;  %v4186_v7 = vmul.f32 %v4183_v53, %v8945_v14  ;;  %v4185_v61 = vmul.f32 %v4183_v53, %v8942_v13 }
 0xfcd   :  { %v3667_v17 = vpop.f32.mrb[79].mxu0  ;;  %v4179_v46 = vmul.f32 %v4176_v59, %v8939_v12  ;;  %v4178_v20 = vmul.f32 %v4176_v59, %v8936_v10  ;;  %v7935_v52 = vld [vmem:[#allocation13 + $0x740] ss:$8 sps:$4 sm:$0xff]  }
 0xfce   :  { %v7940_v17 = vld [vmem:[#allocation13 + $0x754] ss:$8 sps:$4 sm:$0xff]  }
 0xfcf   :  { %v4188_v58 = vadd.f32 %v4186_v7, %v4179_v46 }
 0xfd1   :  { %v4190_v44 = vadd.f32 %v4188_v58, %v8957_v25 }
 0xfd3   :  { %v4192_v4 = vmax.f32 %v4190_v44, 0.0 }
 0xfd5   :  { %v4194_v50 = vpack.c.bf16 %v4192_v4, %v4192_v4 }
 0xfef   :  { %v3773_v47 = vpop.f32.mrb[80].mxu0 }
 0xff0   :  { %v3774_v22 = vadd.f32 %v9656_v51, %v3773_v47  ;;  %v7379_v48 = vpop.f32.mrb[81].mxu0  ;;  %v7938_v47 = vld [vmem:[#allocation13 + $0x750] ss:$8 sps:$4 sm:$0xff]  }
 0xff1   :  { %v3776_v55 = vpop.f32.mrb[82].mxu0  ;;  %v7941_v48 = vld [vmem:[#allocation13 + $0x760] ss:$8 sps:$4 sm:$0xff]  }
 0xff2   :  { %v3779_v26 = vpack.c.bf16 %v3774_v22, %v3774_v22  ;;  %v7380_v5 = vpop.f32.mrb[83].mxu0  ;;  %v7943_v22 = vld [vmem:[#allocation13 + $0x764] ss:$8 sps:$4 sm:$0xff]   ;;  %v7946_v55 = vld [vmem:[#allocation13 + $0x774] ss:$8 sps:$4 sm:$0xff]  }
 0xff4   :  { %3910 = vmatmul.mubr.bf16.vlgmr.msra.gmra.mrb[80].mxu1 %v3779_v26  ;;  %v7944_v26 = vld [vmem:[#allocation13 + $0x770] ss:$8 sps:$4 sm:$0xff]  }
 0xff5   :  { %7382 = vmatpush3.bf16.msra.mxu1 %v9714_v16  ;;  %7397 = vmatprep.mubr.msk.bf16.mxu1 %vm8535_vm0, %v8534_v60 }
 0xff6   :  { %7383 = vmatprep.subr.bf16.mxu1 %v8534_v60 }
 0xff9   :  { %7384 = vmatpush3.bf16.msra.mxu1 %v9720_v30 }
 0xffa   :  { %7385 = vmatprep.subr.bf16.mxu1 %v8534_v60 }
 0xffd   :  { %7386 = vmatpush3.bf16.msra.mxu1 %v9724_v42 }
 0xffe   :  { %7387 = vmatprep.subr.bf16.mxu1 %v8534_v60 }
0x1001   :  { %7388 = vmatpush3.bf16.msra.mxu1 %v9728_v62 }
0x1002   :  { %7389 = vmatprep.subr.bf16.mxu1 %v8534_v60 }
0x1005   :  { %7390 = vmatpush3.bf16.msra.mxu1 %v9732_v28 }
0x1006   :  { %7391 = vmatprep.subr.bf16.mxu1 %v8534_v60 }
0x1009   :  { %7392 = vmatpush3.bf16.msra.mxu1 %v9738_v41 }
0x100a   :  { %7393 = vmatprep.subr.bf16.mxu1 %v8534_v60 }
0x100d   :  { %7394 = vmatpush3.bf16.msra.mxu1 %v9618_v11 }
0x100e   :  { %7395 = vmatprep.subr.bf16.mxu1 %v8534_v60 }
0x100f   :  { %v6869_v23 = vpop.f32.mrb[84].mxu0 }
0x1010   :  { %v6870_v1 = vpop.f32.mrb[85].mxu0 }
0x1011   :  { %v6871_v43 = vadd.f32 %v6870_v1, %v6869_v23  ;;  %v6872_v34 = vpop.f32.mrb[86].mxu0  ;;  %7396 = vmatpush3.bf16.msra.mxu1 %v9623_v54 }
0x1012   :  { %v6873_v57 = vpop.f32.mrb[87].mxu0  ;;  %6884 = vmatprep.subr.bf16.mxu1 %v9679_v56 }
0x1013   :  { %v3981_v3 = vadd.f32 %v9627_v39, %v6871_v43 }
0x1015   :  { %v3986_v40 = vmax.f32 %v3981_v3, 0.0 }
0x1017   :  { %v3987_v49 = vpack.c.bf16 %v3986_v40, %v3986_v40 }
0x1019   :  { %7398 = vmatmul.mubr.bf16.vlgmr.msra.gmra.mrb[84].mxu1 %v3987_v49 }
0x101a   :  { %6885 = vmatpush3.bf16.msra.mxu1 %v9549_v2  ;;  %4227 = vmatprep.mubr.bf16.mxu1 %v4194_v50  ;;  %v4187_v2 = vadd.f32 %v4185_v61, %v4178_v20 }
0x101b   :  { %6886 = vmatprep.subr.bf16.mxu1 %v9552_v32 }
0x101c   :  { %v4189_v32 = vadd.f32 %v4187_v2, %v8954_v24 }
0x101e   :  { %6887 = vmatpush3.bf16.msra.mxu1 %v9555_v27  ;;  %v4191_v27 = vmax.f32 %v4189_v32, 0.0 }
0x101f   :  { %6888 = vmatprep.subr.bf16.mxu1 %v9558_v33 }
0x1020   :  { %v4193_v33 = vpack.c.bf16 %v4191_v27, %v4191_v27 }
0x1022   :  { %6889 = vmatpush3.bf16.msra.mxu1 %v9561_v19  ;;  %v7923_v19 = vld [vmem:[#allocation13 + $0x700] ss:$8 sps:$4 sm:$0xff]  }
0x1023   :  { %6890 = vmatprep.subr.bf16.mxu1 %v9564_v35  ;;  %v7925_v35 = vld [vmem:[#allocation13 + $0x704] ss:$8 sps:$4 sm:$0xff]  }
0x1024   :  { %4126 = vmatprep.subr.bf16.mxu0 %v7925_v35 }
0x1025   :  { %4127 = vmatpush1.bf16.msra.mxu0 %v7923_v19 }
0x1026   :  { %6891 = vmatpush3.bf16.msra.mxu1 %v9567_v36  ;;  %v7928_v36 = vld [vmem:[#allocation13 + $0x714] ss:$8 sps:$4 sm:$0xff]  }
0x1027   :  { %6892 = vmatprep.subr.bf16.mxu1 %v9572_v45  ;;  %v7926_v45 = vld [vmem:[#allocation13 + $0x710] ss:$8 sps:$4 sm:$0xff]   ;;  %4128 = vmatprep.subr.bf16.mxu0 %v7928_v36 }
0x1029   :  { %4129 = vmatpush1.bf16.msra.mxu0 %v7926_v45  ;;  %v9849_v45 = vld [vmem:[#allocation7 + $0x48] sm:$0xff]  }
0x102a   :  { %6893 = vmatpush3.bf16.msra.mxu1 %v9575_v37  ;;  %v7931_v37 = vld [vmem:[#allocation13 + $0x724] ss:$8 sps:$4 sm:$0xff]  }
0x102b   :  { %6894 = vmatprep.subr.bf16.mxu1 %v9578_v9  ;;  %v7929_v9 = vld [vmem:[#allocation13 + $0x720] ss:$8 sps:$4 sm:$0xff]   ;;  %4130 = vmatprep.subr.bf16.mxu0 %v7931_v37  ;;  %v9855_v37 = vld [vmem:[#allocation7 + $0x50] sm:$0xff]  }
0x102d   :  { %4131 = vmatpush1.bf16.msra.mxu0 %v7929_v9  ;;  %v9861_v9 = vld [vmem:[#allocation7 + $0x58] sm:$0xff]  }
0x102e   :  { %6895 = vmatpush3.bf16.msra.mxu1 %v9581_v38  ;;  %v7934_v38 = vld [vmem:[#allocation13 + $0x734] ss:$8 sps:$4 sm:$0xff]  }
0x102f   :  { %6896 = vmatprep.subr.bf16.mxu1 %v9585_v29  ;;  %v7932_v29 = vld [vmem:[#allocation13 + $0x730] ss:$8 sps:$4 sm:$0xff]   ;;  %4132 = vmatprep.subr.bf16.mxu0 %v7934_v38 }
0x1030   :  { %v9864_v38 = vld [vmem:[#allocation7 + $0x18] sm:$0xff]  }
0x1031   :  { %4133 = vmatpush1.bf16.msra.mxu0 %v7932_v29 }
0x1032   :  { %6897 = vmatpush3.bf16.msra.mxu1 %v9588_v15  ;;  %v7937_v15 = vld [vmem:[#allocation13 + $0x744] ss:$8 sps:$4 sm:$0xff]  }
0x1033   :  { %6898 = vmatprep.subr.bf16.mxu1 %v9699_v31  ;;  %4134 = vmatprep.subr.bf16.mxu0 %v7937_v15 }
0x1035   :  { %4135 = vmatpush1.bf16.msra.mxu0 %v7935_v52  ;;  %v9869_v52 = vld [vmem:[#allocation7 + $0x60] sm:$0xff]  }
0x1036   :  { %6899 = vmatpush3.bf16.msra.mxu1 %v9702_v21  ;;  %4136 = vmatprep.subr.bf16.mxu0 %v7940_v17  ;;  %v9872_v17 = vld [vmem:[#allocation7 + $0x20] sm:$0xff]  }
0x1039   :  { %4228 = vmatmul.mubr.bf16.vlgmr.msra.gmra.mrb[88].mxu1 %v4193_v33  ;;  %4137 = vmatpush1.bf16.msra.mxu0 %v7938_v47 }
0x103a   :  { %4407 = vmatprep.mubr.bf16.mxu1 %v8533_v0  ;;  %4138 = vmatprep.subr.bf16.mxu0 %v7943_v22  ;;  %v9875_v22 = vld [vmem:[#allocation7 + $0x68] sm:$0xff]  }
0x103d   :  { %4139 = vmatpush1.bf16.msra.mxu0 %v7941_v48  ;;  %v9878_v48 = vld [vmem:[#allocation7 + $0x28] sm:$0xff]  }
0x103e   :  { %4140 = vmatprep.subr.bf16.mxu0 %v7946_v55 }
0x1041   :  { %4141 = vmatpush1.bf16.msra.mxu0 %v7944_v26  ;;  %v9882_v26 = vld [vmem:[#allocation7 + $0x70] sm:$0xff]  }
0x1042   :  { %7401 = vmatprep.subr.bf16.mxu0 %v8534_v60 }
0x10c7   :  { %v3911_v5 = vpop.f32.mrb[80].mxu1 }
0x10c8   :  { %v9818_v53 = vadd.f32 %v3911_v5, %v9769_v18  ;;  %v3913_v59 = vpop.f32.mrb[81].mxu1  ;;  %v4432_v18 = vpop.permute.xlu1 %4431  ;;  %v9885_v5 = vld [vmem:[#allocation7 + $0x30] sm:$0xff]  }
0x10c9   :  { %v9821_v7 = vadd.f32 %v3913_v59, %v9772_v63  ;;  %v3915_v46 = vpop.f32.mrb[82].mxu1  ;;  %v4425_v63 = vpop.permute.xlu0 %4424  ;;  %v4435_v3 = vmul.f32 %v4432_v18, %v8945_v14  ;;  %v4434_v29 = vmul.f32 %v4432_v18, %v8942_v13  ;;  %v7956_v18 = vld [vmem:[#allocation13 + $0x7b0] ss:$8 sps:$4 sm:$0xff]  }
0x10ca   :  { %v3916_v58 = vpop.f32.mrb[83].mxu1  ;;  %v4428_v4 = vmul.f32 %v4425_v63, %v8939_v12  ;;  %v4427_v15 = vmul.f32 %v4425_v63, %v8936_v10  ;;  %v7961_v63 = vld [vmem:[#allocation13 + $0x7c4] ss:$8 sps:$4 sm:$0xff]  }
0x10cb   :  { %v7947_v58 = vld [vmem:[#allocation13 + $0x780] ss:$8 sps:$4 sm:$0xff]  }
0x10cc   :  { %v4437_v40 = vadd.f32 %v4435_v3, %v4428_v4  ;;  %v4436_v47 = vadd.f32 %v4434_v29, %v4427_v15  ;;  %v7959_v3 = vld [vmem:[#allocation13 + $0x7c0] ss:$8 sps:$4 sm:$0xff]   ;;  %v7964_v4 = vld [vmem:[#allocation13 + $0x7d4] ss:$8 sps:$4 sm:$0xff]  }
0x10ce   :  { %v4439_v61 = vadd.f32 %v4437_v40, %v8957_v25  ;;  %v4438_v55 = vadd.f32 %v4436_v47, %v8954_v24  ;;  %v7962_v40 = vld [vmem:[#allocation13 + $0x7d0] ss:$8 sps:$4 sm:$0xff]  }
0x10d0   :  { %v4441_v33 = vmax.f32 %v4439_v61, 0.0  ;;  %v4440_v59 = vmax.f32 %v4438_v55, 0.0  ;;  %v7970_v61 = vld [vmem:[#allocation13 + $0x7f4] ss:$8 sps:$4 sm:$0xff]  }
0x10d2   :  { %v4443_v36 = vpack.c.bf16 %v4441_v33, %v4441_v33  ;;  %v4442_v46 = vpack.c.bf16 %v4440_v59, %v4440_v59 }
0x10ec   :  { %v4022_v23 = vpop.f32.mrb[84].mxu1 }
0x10ed   :  { %v4023_v1 = vadd.f32 %v9656_v51, %v4022_v23  ;;  %v7399_v44 = vpop.f32.mrb[85].mxu1  ;;  %v7949_v23 = vld [vmem:[#allocation13 + $0x784] ss:$8 sps:$4 sm:$0xff]  }
0x10ee   :  { %v4025_v43 = vpop.f32.mrb[86].mxu1  ;;  %4375 = vmatprep.subr.bf16.mxu1 %v7949_v23  ;;  %v7950_v44 = vld [vmem:[#allocation13 + $0x790] ss:$8 sps:$4 sm:$0xff]  }
0x10ef   :  { %v4028_v34 = vpack.c.bf16 %v4023_v1, %v4023_v1  ;;  %v7400_v57 = vpop.f32.mrb[87].mxu1  ;;  %v7952_v1 = vld [vmem:[#allocation13 + $0x794] ss:$8 sps:$4 sm:$0xff]   ;;  %4376 = vmatpush1.bf16.msra.mxu1 %v7947_v58  ;;  %v7955_v43 = vld [vmem:[#allocation13 + $0x7a4] ss:$8 sps:$4 sm:$0xff]  }
0x10f0   :  { %4377 = vmatprep.subr.bf16.mxu1 %v7952_v1  ;;  %v7958_v57 = vld [vmem:[#allocation13 + $0x7b4] ss:$8 sps:$4 sm:$0xff]  }
0x10f1   :  { %4159 = vmatmul.mubr.bf16.vlgmr.msra.gmra.mrb[88].mxu0 %v4028_v34  ;;  %v7953_v34 = vld [vmem:[#allocation13 + $0x7a0] ss:$8 sps:$4 sm:$0xff]   ;;  %v9915_v23 = vld [vmem:[#allocation10 + $0x30] sm:$0xff]  }
0x10f2   :  { %7402 = vmatpush3.bf16.msra.mxu0 %v9714_v16  ;;  %7417 = vmatprep.mubr.msk.bf16.mxu0 %vm8535_vm0, %v8534_v60 }
0x10f3   :  { %7403 = vmatprep.subr.bf16.mxu0 %v8534_v60  ;;  %4378 = vmatpush1.bf16.msra.mxu1 %v7950_v44 }
0x10f4   :  { %4379 = vmatprep.subr.bf16.mxu1 %v7955_v43 }
0x10f6   :  { %7404 = vmatpush3.bf16.msra.mxu0 %v9720_v30 }
0x10f7   :  { %7405 = vmatprep.subr.bf16.mxu0 %v8534_v60  ;;  %4380 = vmatpush1.bf16.msra.mxu1 %v7953_v34 }
0x10f8   :  { %4381 = vmatprep.subr.bf16.mxu1 %v7958_v57 }
0x10fa   :  { %7406 = vmatpush3.bf16.msra.mxu0 %v9724_v42 }
0x10fb   :  { %7407 = vmatprep.subr.bf16.mxu0 %v8534_v60  ;;  %4382 = vmatpush1.bf16.msra.mxu1 %v7956_v18  ;;  %v9920_v18 = vld [vmem:[#allocation10 + $0x38] sm:$0xff]  }
0x10fc   :  { %4383 = vmatprep.subr.bf16.mxu1 %v7961_v63 }
0x10fe   :  { %7408 = vmatpush3.bf16.msra.mxu0 %v9728_v62 }
0x10ff   :  { %7409 = vmatprep.subr.bf16.mxu0 %v8534_v60  ;;  %4384 = vmatpush1.bf16.msra.mxu1 %v7959_v3  ;;  %v9924_v3 = vld [vmem:[#allocation8] ss:$0 sm:$0xff] }
0x1100   :  { %4385 = vmatprep.subr.bf16.mxu1 %v7964_v4 }
0x1102   :  { %7410 = vmatpush3.bf16.msra.mxu0 %v9732_v28 }
0x1103   :  { %7411 = vmatprep.subr.bf16.mxu0 %v8534_v60  ;;  %4386 = vmatpush1.bf16.msra.mxu1 %v7962_v40 }
0x1106   :  { %7412 = vmatpush3.bf16.msra.mxu0 %v9738_v41 }
0x1107   :  { %7413 = vmatprep.subr.bf16.mxu0 %v8534_v60 }
0x110a   :  { %7414 = vmatpush3.bf16.msra.mxu0 %v9618_v11  ;;  %v9846_v11 = vld [vmem:[#allocation7] sm:$0xff]  }
0x110b   :  { %7415 = vmatprep.subr.bf16.mxu0 %v8534_v60 }
0x110c   :  { %v6900_v49 = vpop.f32.mrb[88].mxu1 }
0x110d   :  { %v6901_v50 = vpop.f32.mrb[89].mxu1 }
0x110e   :  { %v6902_v20 = vadd.f32 %v6901_v50, %v6900_v49  ;;  %v6903_v2 = vpop.f32.mrb[90].mxu1  ;;  %7416 = vmatpush3.bf16.msra.mxu0 %v9623_v54  ;;  %v9852_v54 = vld [vmem:[#allocation7 + $0x8] sm:$0xff]  }
0x110f   :  { %v6904_v32 = vpop.f32.mrb[91].mxu1  ;;  %6915 = vmatprep.subr.bf16.mxu0 %v9679_v56  ;;  %v7967_v49 = vld [vmem:[#allocation13 + $0x7e4] ss:$8 sps:$4 sm:$0xff]   ;;  %v7965_v50 = vld [vmem:[#allocation13 + $0x7e0] ss:$8 sps:$4 sm:$0xff]  }
0x1110   :  { %v4230_v27 = vadd.f32 %v9627_v39, %v6902_v20  ;;  %v9858_v39 = vld [vmem:[#allocation7 + $0x10] sm:$0xff]   ;;  %4387 = vmatprep.subr.bf16.mxu1 %v7967_v49 }
0x1111   :  { %4388 = vmatpush1.bf16.msra.mxu1 %v7965_v50  ;;  %v7968_v20 = vld [vmem:[#allocation13 + $0x7f0] ss:$8 sps:$4 sm:$0xff]  }
0x1112   :  { %v4235_v19 = vmax.f32 %v4230_v27, 0.0  ;;  %4389 = vmatprep.subr.bf16.mxu1 %v7970_v61 }
0x1114   :  { %v4236_v35 = vpack.c.bf16 %v4235_v19, %v4235_v19 }
0x1115   :  { %4390 = vmatpush1.bf16.msra.mxu1 %v7968_v20 }
0x1116   :  { %7418 = vmatmul.mubr.bf16.vlgmr.msra.gmra.mrb[92].mxu0 %v4236_v35  ;;  %7421 = vmatprep.subr.bf16.mxu1 %v8534_v60 }
0x1117   :  { %6916 = vmatpush3.bf16.msra.mxu0 %v9846_v11  ;;  %4476 = vmatprep.mubr.bf16.mxu0 %v4443_v36 }
0x1118   :  { %6917 = vmatprep.subr.bf16.mxu0 %v9849_v45 }
0x111b   :  { %6918 = vmatpush3.bf16.msra.mxu0 %v9852_v54 }
0x111c   :  { %6919 = vmatprep.subr.bf16.mxu0 %v9855_v37 }
0x111f   :  { %6920 = vmatpush3.bf16.msra.mxu0 %v9858_v39 }
0x1120   :  { %6921 = vmatprep.subr.bf16.mxu0 %v9861_v9 }
0x1123   :  { %6922 = vmatpush3.bf16.msra.mxu0 %v9864_v38 }
0x1124   :  { %6923 = vmatprep.subr.bf16.mxu0 %v9869_v52 }
0x1127   :  { %6924 = vmatpush3.bf16.msra.mxu0 %v9872_v17 }
0x1128   :  { %6925 = vmatprep.subr.bf16.mxu0 %v9875_v22 }
0x112b   :  { %6926 = vmatpush3.bf16.msra.mxu0 %v9878_v48 }
0x112c   :  { %6927 = vmatprep.subr.bf16.mxu0 %v9882_v26 }
0x112f   :  { %6928 = vmatpush3.bf16.msra.mxu0 %v9885_v5 }
0x1130   :  { %6929 = vmatprep.subr.bf16.mxu0 %v9699_v31 }
0x1133   :  { %6930 = vmatpush3.bf16.msra.mxu0 %v9702_v21 }
0x1136   :  { %4477 = vmatmul.mubr.bf16.vlgmr.msra.gmra.mrb[96].mxu0 %v4442_v46 }
0x1137   :  { %4656 = vmatprep.mubr.bf16.mxu0 %v8533_v0 }
0x11c4   :  { %v4160_v2 = vpop.f32.mrb[88].mxu0 }
0x11c5   :  { %v9893_v32 = vadd.f32 %v4160_v2, %v9818_v53  ;;  %v4162_v27 = vpop.f32.mrb[89].mxu0  ;;  %v4674_v53 = vpop.permute.xlu0 %4673 }
0x11c6   :  { %v9896_v33 = vadd.f32 %v4162_v27, %v9821_v7  ;;  %v4164_v19 = vpop.f32.mrb[90].mxu0  ;;  %v4677_v46 = vmul.f32 %v4674_v53, %v8939_v12  ;;  %v4676_v20 = vmul.f32 %v4674_v53, %v8936_v10  ;;  %v7983_v53 = vld [vmem:[#allocation13 + $0x840] ss:$8 sps:$4 sm:$0xff]  }
0x11c7   :  { %v4165_v35 = vpop.f32.mrb[91].mxu0 }
0x11e9   :  { %v4271_v36 = vpop.f32.mrb[92].mxu0 }
0x11ea   :  { %v4272_v29 = vadd.f32 %v9656_v51, %v4271_v36  ;;  %v7419_v15 = vpop.f32.mrb[93].mxu0  ;;  %v4681_v51 = vpop.permute.xlu1 %4680  ;;  %v7971_v36 = vld [vmem:[#allocation13 + $0x800] ss:$8 sps:$4 sm:$0xff]  }
0x11eb   :  { %v4274_v47 = vpop.f32.mrb[94].mxu0  ;;  %v4684_v7 = vmul.f32 %v4681_v51, %v8945_v14  ;;  %v7976_v15 = vld [vmem:[#allocation13 + $0x814] ss:$8 sps:$4 sm:$0xff]  }
0x11ec   :  { %v4277_v55 = vpack.c.bf16 %v4272_v29, %v4272_v29  ;;  %v7420_v59 = vpop.f32.mrb[95].mxu0  ;;  %v7973_v29 = vld [vmem:[#allocation13 + $0x804] ss:$8 sps:$4 sm:$0xff]   ;;  %v7974_v47 = vld [vmem:[#allocation13 + $0x810] ss:$8 sps:$4 sm:$0xff]  }
0x11ed   :  { %v4686_v58 = vadd.f32 %v4684_v7, %v4677_v46  ;;  %4624 = vmatprep.subr.bf16.mxu0 %v7973_v29  ;;  %v7977_v59 = vld [vmem:[#allocation13 + $0x820] ss:$8 sps:$4 sm:$0xff]   ;;  %v7988_v7 = vld [vmem:[#allocation13 + $0x854] ss:$8 sps:$4 sm:$0xff]   ;;  %v7986_v46 = vld [vmem:[#allocation13 + $0x850] ss:$8 sps:$4 sm:$0xff]  }
0x11ee   :  { %4408 = vmatmul.mubr.bf16.vlgmr.msra.gmra.mrb[92].mxu1 %v4277_v55  ;;  %4625 = vmatpush1.bf16.msra.mxu0 %v7971_v36  ;;  %v7979_v55 = vld [vmem:[#allocation13 + $0x824] ss:$8 sps:$4 sm:$0xff]  }
0x11ef   :  { %7422 = vmatpush3.bf16.msra.mxu1 %v9714_v16  ;;  %7437 = vmatprep.mubr.msk.bf16.mxu1 %vm8535_vm0, %v8534_v60  ;;  %v4688_v43 = vadd.f32 %v4686_v58, %v8957_v25  ;;  %v7991_v58 = vld [vmem:[#allocation13 + $0x864] ss:$8 sps:$4 sm:$0xff]  }
0x11f0   :  { %7423 = vmatprep.subr.bf16.mxu1 %v8534_v60  ;;  %4626 = vmatprep.subr.bf16.mxu0 %v7976_v15 }
0x11f1   :  { %v4690_v40 = vmax.f32 %v4688_v43, 0.0  ;;  %v7992_v43 = vld [vmem:[#allocation13 + $0x870] ss:$8 sps:$4 sm:$0xff]  }
0x11f2   :  { %4627 = vmatpush1.bf16.msra.mxu0 %v7974_v47  ;;  %v9976_v47 = vld [vmem:[#allocation7 + $0x40] sm:$0xff]  }
0x11f3   :  { %7424 = vmatpush3.bf16.msra.mxu1 %v9720_v30  ;;  %v4692_v61 = vpack.c.bf16 %v4690_v40, %v4690_v40  ;;  %4628 = vmatprep.subr.bf16.mxu0 %v7979_v55 }
0x11f4   :  { %7425 = vmatprep.subr.bf16.mxu1 %v8534_v60 }
0x11f6   :  { %4629 = vmatpush1.bf16.msra.mxu0 %v7977_v59 }
0x11f7   :  { %7426 = vmatpush3.bf16.msra.mxu1 %v9724_v42 }
0x11f8   :  { %7427 = vmatprep.subr.bf16.mxu1 %v8534_v60 }
0x11fb   :  { %7428 = vmatpush3.bf16.msra.mxu1 %v9728_v62 }
0x11fc   :  { %7429 = vmatprep.subr.bf16.mxu1 %v8534_v60 }
0x11ff   :  { %7430 = vmatpush3.bf16.msra.mxu1 %v9732_v28 }
0x1200   :  { %7431 = vmatprep.subr.bf16.mxu1 %v8534_v60 }
0x1203   :  { %7432 = vmatpush3.bf16.msra.mxu1 %v9738_v41 }
0x1204   :  { %7433 = vmatprep.subr.bf16.mxu1 %v8534_v60 }
0x1207   :  { %7434 = vmatpush3.bf16.msra.mxu1 %v9915_v23 }
0x1208   :  { %7435 = vmatprep.subr.bf16.mxu1 %v8534_v60 }
0x1209   :  { %v6931_v1 = vpop.f32.mrb[96].mxu0 }
0x120a   :  { %v6932_v44 = vpop.f32.mrb[97].mxu0 }
0x120b   :  { %v6933_v34 = vadd.f32 %v6932_v44, %v6931_v1  ;;  %v6934_v57 = vpop.f32.mrb[98].mxu0  ;;  %7436 = vmatpush3.bf16.msra.mxu1 %v9920_v18  ;;  %v7989_v1 = vld [vmem:[#allocation13 + $0x860] ss:$8 sps:$4 sm:$0xff]   ;;  %v7994_v44 = vld [vmem:[#allocation13 + $0x874] ss:$8 sps:$4 sm:$0xff]  }
0x120c   :  { %v6935_v63 = vpop.f32.mrb[99].mxu0  ;;  %6946 = vmatprep.subr.bf16.mxu1 %v9679_v56  ;;  %v4683_v56 = vmul.f32 %v4681_v51, %v8942_v13  ;;  %v7982_v51 = vld [vmem:[#allocation13 + $0x834] ss:$8 sps:$4 sm:$0xff]  }
0x120d   :  { %v4479_v4 = vadd.f32 %v9924_v3, %v6933_v34  ;;  %4630 = vmatprep.subr.bf16.mxu0 %v7982_v51 }
0x120e   :  { %v4685_v2 = vadd.f32 %v4683_v56, %v4676_v20 }
0x120f   :  { %v4484_v49 = vmax.f32 %v4479_v4, 0.0 }
0x1210   :  { %v4687_v27 = vadd.f32 %v4685_v2, %v8954_v24 }
0x1211   :  { %v4485_v50 = vpack.c.bf16 %v4484_v49, %v4484_v49 }
0x1212   :  { %v4689_v19 = vmax.f32 %v4687_v27, 0.0 }
0x1213   :  { %7438 = vmatmul.mubr.bf16.vlgmr.msra.gmra.mrb[96].mxu1 %v4485_v50 }
0x1214   :  { %6947 = vmatpush3.bf16.msra.mxu1 %v9846_v11  ;;  %4725 = vmatprep.mubr.bf16.mxu1 %v4692_v61  ;;  %v4691_v35 = vpack.c.bf16 %v4689_v19, %v4689_v19  ;;  %v9953_v61 = vld [vmem:[#allocation11] ss:$0 sm:$0xff] }
0x1215   :  { %6948 = vmatprep.subr.bf16.mxu1 %v9849_v45 }
0x1218   :  { %6949 = vmatpush3.bf16.msra.mxu1 %v9852_v54 }
0x1219   :  { %6950 = vmatprep.subr.bf16.mxu1 %v9855_v37 }
0x121c   :  { %6951 = vmatpush3.bf16.msra.mxu1 %v9858_v39 }
0x121d   :  { %6952 = vmatprep.subr.bf16.mxu1 %v9861_v9 }
0x1220   :  { %6953 = vmatpush3.bf16.msra.mxu1 %v9864_v38 }
0x1221   :  { %6954 = vmatprep.subr.bf16.mxu1 %v9869_v52 }
0x1224   :  { %6955 = vmatpush3.bf16.msra.mxu1 %v9872_v17 }
0x1225   :  { %6956 = vmatprep.subr.bf16.mxu1 %v9875_v22 }
0x1228   :  { %6957 = vmatpush3.bf16.msra.mxu1 %v9878_v48 }
0x1229   :  { %6958 = vmatprep.subr.bf16.mxu1 %v9882_v26 }
0x122c   :  { %6959 = vmatpush3.bf16.msra.mxu1 %v9885_v5 }
0x122d   :  { %6960 = vmatprep.subr.bf16.mxu1 %v9699_v31  ;;  %v7980_v31 = vld [vmem:[#allocation13 + $0x830] ss:$8 sps:$4 sm:$0xff]  }
0x122e   :  { %4631 = vmatpush1.bf16.msra.mxu0 %v7980_v31 }
0x1230   :  { %6961 = vmatpush3.bf16.msra.mxu1 %v9702_v21  ;;  %v7985_v21 = vld [vmem:[#allocation13 + $0x844] ss:$8 sps:$4 sm:$0xff]  }
0x1231   :  { %4632 = vmatprep.subr.bf16.mxu0 %v7985_v21 }
0x1232   :  { %4633 = vmatpush1.bf16.msra.mxu0 %v7983_v53 }
0x1233   :  { %4726 = vmatmul.mubr.bf16.vlgmr.msra.gmra.mrb[100].mxu1 %v4691_v35  ;;  %4634 = vmatprep.subr.bf16.mxu0 %v7988_v7 }
0x1234   :  { %4905 = vmatprep.mubr.bf16.mxu1 %v8533_v0 }
0x1236   :  { %4635 = vmatpush1.bf16.msra.mxu0 %v7986_v46 }
0x1237   :  { %4636 = vmatprep.subr.bf16.mxu0 %v7991_v58 }
0x123a   :  { %4637 = vmatpush1.bf16.msra.mxu0 %v7989_v1  ;;  %v9996_v1 = vld [vmem:[#allocation7 + $0x78] sm:$0xff]  }
0x123b   :  { %4638 = vmatprep.subr.bf16.mxu0 %v7994_v44  ;;  %v9999_v44 = vld [vmem:[#allocation7 + $0x38] sm:$0xff]  }
0x123e   :  { %4639 = vmatpush1.bf16.msra.mxu0 %v7992_v43 }
0x123f   :  { %7441 = vmatprep.subr.bf16.mxu0 %v8534_v60 }
0x12c1   :  { %v4409_v34 = vpop.f32.mrb[92].mxu1 }
0x12c2   :  { %v9948_v57 = vadd.f32 %v4409_v34, %v9893_v32  ;;  %v4411_v63 = vpop.f32.mrb[93].mxu1  ;;  %v4930_v32 = vpop.permute.xlu1 %4929  ;;  %v7995_v34 = vld [vmem:[#allocation13 + $0x880] ss:$8 sps:$4 sm:$0xff]  }
0x12c3   :  { %v9951_v4 = vadd.f32 %v4411_v63, %v9896_v33  ;;  %v4413_v40 = vpop.f32.mrb[94].mxu1  ;;  %v4923_v33 = vpop.permute.xlu0 %4922  ;;  %v4932_v21 = vmul.f32 %v4930_v32, %v8942_v13  ;;  %v7997_v63 = vld [vmem:[#allocation13 + $0x884] ss:$8 sps:$4 sm:$0xff]  }
0x12c4   :  { %v4414_v49 = vpop.f32.mrb[95].mxu1  ;;  %v4925_v53 = vmul.f32 %v4923_v33, %v8936_v10  ;;  %v8000_v40 = vld [vmem:[#allocation13 + $0x894] ss:$8 sps:$4 sm:$0xff]   ;;  %4873 = vmatprep.subr.bf16.mxu1 %v7997_v63 }
0x12c5   :  { %4874 = vmatpush1.bf16.msra.mxu1 %v7995_v34  ;;  %v7998_v49 = vld [vmem:[#allocation13 + $0x890] ss:$8 sps:$4 sm:$0xff]   ;;  %v10029_v34 = vld [vmem:[#allocation10 + $0x20] sm:$0xff]  }
0x12c6   :  { %v4934_v7 = vadd.f32 %v4932_v21, %v4925_v53  ;;  %4875 = vmatprep.subr.bf16.mxu1 %v8000_v40 }
0x12c8   :  { %v4936_v46 = vadd.f32 %v4934_v7, %v8954_v24  ;;  %v10011_v7 = vld [vmem:[#allocation10] sm:$0xff]  }
0x12c9   :  { %4876 = vmatpush1.bf16.msra.mxu1 %v7998_v49  ;;  %v10035_v49 = vld [vmem:[#allocation10 + $0x28] sm:$0xff]  }
0x12ca   :  { %v4938_v58 = vmax.f32 %v4936_v46, 0.0  ;;  %v10025_v46 = vld [vmem:[#allocation10 + $0x18] sm:$0xff]  }
0x12cc   :  { %v4940_v43 = vpack.c.bf16 %v4938_v58, %v4938_v58  ;;  %v5179_v58 = vpop.permute.xlu1 %5178 }
0x12cd   :  { %v5182_v63 = vmul.f32 %v5179_v58, %v8945_v14 }
0x12e6   :  { %v4520_v50 = vpop.f32.mrb[96].mxu1 }
0x12e7   :  { %v4521_v56 = vadd.f32 %v9953_v61, %v4520_v50  ;;  %v7439_v20 = vpop.f32.mrb[97].mxu1  ;;  %v8003_v50 = vld [vmem:[#allocation13 + $0x8a4] ss:$8 sps:$4 sm:$0xff]  }
0x12e8   :  { %v4523_v2 = vpop.f32.mrb[98].mxu1  ;;  %4877 = vmatprep.subr.bf16.mxu1 %v8003_v50  ;;  %v8006_v20 = vld [vmem:[#allocation13 + $0x8b4] ss:$8 sps:$4 sm:$0xff]  }
0x12e9   :  { %v4526_v27 = vpack.c.bf16 %v4521_v56, %v4521_v56  ;;  %v7440_v19 = vpop.f32.mrb[99].mxu1  ;;  %v8001_v56 = vld [vmem:[#allocation13 + $0x8a0] ss:$8 sps:$4 sm:$0xff]   ;;  %v8004_v2 = vld [vmem:[#allocation13 + $0x8b0] ss:$8 sps:$4 sm:$0xff]  }
0x12ea   :  { %4878 = vmatpush1.bf16.msra.mxu1 %v8001_v56  ;;  %v8007_v19 = vld [vmem:[#allocation13 + $0x8c0] ss:$8 sps:$4 sm:$0xff]  }
0x12eb   :  { %4657 = vmatmul.mubr.bf16.vlgmr.msra.gmra.mrb[100].mxu0 %v4526_v27  ;;  %4879 = vmatprep.subr.bf16.mxu1 %v8006_v20  ;;  %v8009_v27 = vld [vmem:[#allocation13 + $0x8c4] ss:$8 sps:$4 sm:$0xff]  }
0x12ec   :  { %7442 = vmatpush3.bf16.msra.mxu0 %v9714_v16  ;;  %7457 = vmatprep.mubr.msk.bf16.mxu0 %vm8535_vm0, %v8534_v60  ;;  %v4933_v16 = vmul.f32 %v4930_v32, %v8945_v14  ;;  %v8012_v32 = vld [vmem:[#allocation13 + $0x8d4] ss:$8 sps:$4 sm:$0xff]  }
0x12ed   :  { %7443 = vmatprep.subr.bf16.mxu0 %v8534_v60 }
0x12ee   :  { %4880 = vmatpush1.bf16.msra.mxu1 %v8004_v2 }
0x12ef   :  { %4881 = vmatprep.subr.bf16.mxu1 %v8009_v27 }
0x12f0   :  { %7444 = vmatpush3.bf16.msra.mxu0 %v9720_v30  ;;  %v4926_v30 = vmul.f32 %v4923_v33, %v8939_v12  ;;  %v8010_v33 = vld [vmem:[#allocation13 + $0x8d0] ss:$8 sps:$4 sm:$0xff]  }
0x12f1   :  { %7445 = vmatprep.subr.bf16.mxu0 %v8534_v60 }
0x12f2   :  { %4882 = vmatpush1.bf16.msra.mxu1 %v8007_v19 }
0x12f3   :  { %4883 = vmatprep.subr.bf16.mxu1 %v8012_v32 }
0x12f4   :  { %7446 = vmatpush3.bf16.msra.mxu0 %v9724_v42  ;;  %v4935_v42 = vadd.f32 %v4933_v16, %v4926_v30  ;;  %v8015_v16 = vld [vmem:[#allocation13 + $0x8e4] ss:$8 sps:$4 sm:$0xff]   ;;  %v8013_v30 = vld [vmem:[#allocation13 + $0x8e0] ss:$8 sps:$4 sm:$0xff]  }
0x12f5   :  { %7447 = vmatprep.subr.bf16.mxu0 %v8534_v60 }
0x12f6   :  { %v4937_v36 = vadd.f32 %v4935_v42, %v8957_v25  ;;  %4884 = vmatpush1.bf16.msra.mxu1 %v8010_v33  ;;  %v8018_v42 = vld [vmem:[#allocation13 + $0x8f4] ss:$8 sps:$4 sm:$0xff]  }
0x12f7   :  { %4885 = vmatprep.subr.bf16.mxu1 %v8015_v16 }
0x12f8   :  { %7448 = vmatpush3.bf16.msra.mxu0 %v9728_v62  ;;  %v4939_v55 = vmax.f32 %v4937_v36, 0.0 }
0x12f9   :  { %7449 = vmatprep.subr.bf16.mxu0 %v8534_v60 }
0x12fa   :  { %v4941_v31 = vpack.c.bf16 %v4939_v55, %v4939_v55  ;;  %4886 = vmatpush1.bf16.msra.mxu1 %v8013_v30 }
0x12fb   :  { %4887 = vmatprep.subr.bf16.mxu1 %v8018_v42 }
0x12fc   :  { %7450 = vmatpush3.bf16.msra.mxu0 %v9732_v28 }
0x12fd   :  { %7451 = vmatprep.subr.bf16.mxu0 %v8534_v60 }
0x1300   :  { %7452 = vmatpush3.bf16.msra.mxu0 %v9738_v41 }
0x1301   :  { %7453 = vmatprep.subr.bf16.mxu0 %v8534_v60 }
0x1304   :  { %7454 = vmatpush3.bf16.msra.mxu0 %v9915_v23 }
0x1305   :  { %7455 = vmatprep.subr.bf16.mxu0 %v8534_v60 }
0x1306   :  { %v6962_v62 = vpop.f32.mrb[100].mxu1 }
0x1307   :  { %v6963_v35 = vpop.f32.mrb[101].mxu1 }
0x1308   :  { %v6964_v28 = vadd.f32 %v6963_v35, %v6962_v62  ;;  %v6965_v29 = vpop.f32.mrb[102].mxu1  ;;  %7456 = vmatpush3.bf16.msra.mxu0 %v9920_v18  ;;  %v8016_v62 = vld [vmem:[#allocation13 + $0x8f0] ss:$8 sps:$4 sm:$0xff]  }
0x1309   :  { %v6966_v15 = vpop.f32.mrb[103].mxu1  ;;  %6977 = vmatprep.subr.bf16.mxu0 %v9976_v47  ;;  %4888 = vmatpush1.bf16.msra.mxu1 %v8016_v62 }
0x130a   :  { %v4728_v41 = vadd.f32 %v9924_v3, %v6964_v28  ;;  %7461 = vmatprep.subr.bf16.mxu1 %v8534_v60 }
0x130c   :  { %v4733_v59 = vmax.f32 %v4728_v41, 0.0 }
0x130e   :  { %v4734_v51 = vpack.c.bf16 %v4733_v59, %v4733_v59 }
0x1310   :  { %7458 = vmatmul.mubr.bf16.vlgmr.msra.gmra.mrb[104].mxu0 %v4734_v51 }
0x1311   :  { %6978 = vmatpush3.bf16.msra.mxu0 %v9846_v11  ;;  %4974 = vmatprep.mubr.bf16.mxu0 %v4941_v31 }
0x1312   :  { %6979 = vmatprep.subr.bf16.mxu0 %v9849_v45 }
0x1315   :  { %6980 = vmatpush3.bf16.msra.mxu0 %v9852_v54 }
0x1316   :  { %6981 = vmatprep.subr.bf16.mxu0 %v9855_v37 }
0x1319   :  { %6982 = vmatpush3.bf16.msra.mxu0 %v9858_v39 }
0x131a   :  { %6983 = vmatprep.subr.bf16.mxu0 %v9861_v9 }
0x131d   :  { %6984 = vmatpush3.bf16.msra.mxu0 %v9864_v38 }
0x131e   :  { %6985 = vmatprep.subr.bf16.mxu0 %v9869_v52 }
0x1321   :  { %6986 = vmatpush3.bf16.msra.mxu0 %v9872_v17 }
0x1322   :  { %6987 = vmatprep.subr.bf16.mxu0 %v9875_v22 }
0x1325   :  { %6988 = vmatpush3.bf16.msra.mxu0 %v9878_v48 }
0x1326   :  { %6989 = vmatprep.subr.bf16.mxu0 %v9882_v26 }
0x1329   :  { %6990 = vmatpush3.bf16.msra.mxu0 %v9885_v5 }
0x132a   :  { %6991 = vmatprep.subr.bf16.mxu0 %v9996_v1 }
0x132d   :  { %6992 = vmatpush3.bf16.msra.mxu0 %v9999_v44 }
0x1330   :  { %4975 = vmatmul.mubr.bf16.vlgmr.msra.gmra.mrb[108].mxu0 %v4940_v43  ;;  %v5172_v43 = vpop.permute.xlu0 %5171 }
0x1331   :  { %5154 = vmatprep.mubr.bf16.mxu0 %v8533_v0  ;;  %v5175_v40 = vmul.f32 %v5172_v43, %v8939_v12 }
0x1333   :  { %v5184_v50 = vadd.f32 %v5182_v63, %v5175_v40  ;;  %v8030_v63 = vld [vmem:[#allocation13 + $0x934] ss:$8 sps:$4 sm:$0xff]   ;;  %v8028_v40 = vld [vmem:[#allocation13 + $0x930] ss:$8 sps:$4 sm:$0xff]  }
0x1335   :  { %v5186_v2 = vadd.f32 %v5184_v50, %v8957_v25  ;;  %v8033_v50 = vld [vmem:[#allocation13 + $0x944] ss:$8 sps:$4 sm:$0xff]  }
0x1337   :  { %v5188_v16 = vmax.f32 %v5186_v2, 0.0  ;;  %v8034_v2 = vld [vmem:[#allocation13 + $0x950] ss:$8 sps:$4 sm:$0xff]  }
0x1339   :  { %v5190_v62 = vpack.c.bf16 %v5188_v16, %v5188_v16 }
0x13be   :  { %v4658_v35 = vpop.f32.mrb[100].mxu0 }
0x13bf   :  { %v10005_v36 = vadd.f32 %v4658_v35, %v9948_v57  ;;  %v4660_v28 = vpop.f32.mrb[101].mxu0  ;;  %v10017_v57 = vld [vmem:[#allocation10 + $0x8] sm:$0xff]   ;;  %v5181_v35 = vmul.f32 %v5179_v58, %v8942_v13 }
0x13c0   :  { %v10008_v29 = vadd.f32 %v4660_v28, %v9951_v4  ;;  %v4662_v15 = vpop.f32.mrb[102].mxu0  ;;  %v10021_v4 = vld [vmem:[#allocation10 + $0x10] sm:$0xff]   ;;  %v5174_v28 = vmul.f32 %v5172_v43, %v8936_v10  ;;  %v8025_v43 = vld [vmem:[#allocation13 + $0x920] ss:$8 sps:$4 sm:$0xff]  }
0x13c1   :  { %v4663_v41 = vpop.f32.mrb[103].mxu0  ;;  %v8027_v58 = vld [vmem:[#allocation13 + $0x924] ss:$8 sps:$4 sm:$0xff]  }
0x13c2   :  { %v5183_v15 = vadd.f32 %v5181_v35, %v5174_v28 }
0x13c4   :  { %v5185_v41 = vadd.f32 %v5183_v15, %v8954_v24 }
0x13e3   :  { %v4769_v55 = vpop.f32.mrb[104].mxu0 }
0x13e4   :  { %v4770_v59 = vadd.f32 %v9953_v61, %v4769_v55  ;;  %v7459_v51 = vpop.f32.mrb[105].mxu0  ;;  %v5187_v55 = vmax.f32 %v5185_v41, 0.0 }
0x13e5   :  { %v4772_v31 = vpop.f32.mrb[106].mxu0  ;;  %v8019_v51 = vld [vmem:[#allocation13 + $0x900] ss:$8 sps:$4 sm:$0xff]  }
0x13e6   :  { %v4775_v21 = vpack.c.bf16 %v4770_v59, %v4770_v59  ;;  %v7460_v53 = vpop.f32.mrb[107].mxu0  ;;  %v5189_v59 = vpack.c.bf16 %v5187_v55, %v5187_v55  ;;  %v8021_v31 = vld [vmem:[#allocation13 + $0x904] ss:$8 sps:$4 sm:$0xff]  }
0x13e7   :  { %5122 = vmatprep.subr.bf16.mxu0 %v8021_v31  ;;  %v8022_v53 = vld [vmem:[#allocation13 + $0x910] ss:$8 sps:$4 sm:$0xff]  }
0x13e8   :  { %4906 = vmatmul.mubr.bf16.vlgmr.msra.gmra.mrb[104].mxu1 %v4775_v21  ;;  %v8024_v21 = vld [vmem:[#allocation13 + $0x914] ss:$8 sps:$4 sm:$0xff]   ;;  %5123 = vmatpush1.bf16.msra.mxu0 %v8019_v51 }
0x13e9   :  { %7462 = vmatpush3.bf16.msra.mxu1 %v10011_v7  ;;  %7477 = vmatprep.mubr.msk.bf16.mxu1 %vm8535_vm0, %v8534_v60 }
0x13ea   :  { %7463 = vmatprep.subr.bf16.mxu1 %v8534_v60  ;;  %5124 = vmatprep.subr.bf16.mxu0 %v8024_v21 }
0x13ec   :  { %5125 = vmatpush1.bf16.msra.mxu0 %v8022_v53 }
0x13ed   :  { %7464 = vmatpush3.bf16.msra.mxu1 %v10017_v57  ;;  %5126 = vmatprep.subr.bf16.mxu0 %v8027_v58 }
0x13ee   :  { %7465 = vmatprep.subr.bf16.mxu1 %v8534_v60 }
0x13f0   :  { %5127 = vmatpush1.bf16.msra.mxu0 %v8025_v43 }
0x13f1   :  { %7466 = vmatpush3.bf16.msra.mxu1 %v10021_v4  ;;  %5128 = vmatprep.subr.bf16.mxu0 %v8030_v63 }
0x13f2   :  { %7467 = vmatprep.subr.bf16.mxu1 %v8534_v60 }
0x13f4   :  { %5129 = vmatpush1.bf16.msra.mxu0 %v8028_v40 }
0x13f5   :  { %7468 = vmatpush3.bf16.msra.mxu1 %v10025_v46  ;;  %5130 = vmatprep.subr.bf16.mxu0 %v8033_v50 }
0x13f6   :  { %7469 = vmatprep.subr.bf16.mxu1 %v8534_v60 }
0x13f9   :  { %7470 = vmatpush3.bf16.msra.mxu1 %v10029_v34 }
0x13fa   :  { %7471 = vmatprep.subr.bf16.mxu1 %v8534_v60 }
0x13fd   :  { %7472 = vmatpush3.bf16.msra.mxu1 %v10035_v49 }
0x13fe   :  { %7473 = vmatprep.subr.bf16.mxu1 %v8534_v60 }
0x1401   :  { %7474 = vmatpush3.bf16.msra.mxu1 %v9915_v23 }
0x1402   :  { %7475 = vmatprep.subr.bf16.mxu1 %v8534_v60 }
0x1403   :  { %v6993_v56 = vpop.f32.mrb[108].mxu0 }
0x1404   :  { %v6994_v20 = vpop.f32.mrb[109].mxu0 }
0x1405   :  { %v6995_v27 = vadd.f32 %v6994_v20, %v6993_v56  ;;  %v6996_v19 = vpop.f32.mrb[110].mxu0  ;;  %7476 = vmatpush3.bf16.msra.mxu1 %v9920_v18  ;;  %v8031_v56 = vld [vmem:[#allocation13 + $0x940] ss:$8 sps:$4 sm:$0xff]   ;;  %v8036_v20 = vld [vmem:[#allocation13 + $0x954] ss:$8 sps:$4 sm:$0xff]  }
0x1406   :  { %v6997_v32 = vpop.f32.mrb[111].mxu0  ;;  %7008 = vmatprep.subr.bf16.mxu1 %v9976_v47  ;;  %5131 = vmatpush1.bf16.msra.mxu0 %v8031_v56  ;;  %v8037_v19 = vld [vmem:[#allocation13 + $0x960] ss:$8 sps:$4 sm:$0xff]  }
0x1407   :  { %v4977_v33 = vadd.f32 %v9924_v3, %v6995_v27  ;;  %5132 = vmatprep.subr.bf16.mxu0 %v8036_v20  ;;  %v8039_v27 = vld [vmem:[#allocation13 + $0x964] ss:$8 sps:$4 sm:$0xff]   ;;  %v8042_v32 = vld [vmem:[#allocation13 + $0x974] ss:$8 sps:$4 sm:$0xff]  }
0x1409   :  { %v4982_v30 = vmax.f32 %v4977_v33, 0.0  ;;  %v8040_v33 = vld [vmem:[#allocation13 + $0x970] ss:$8 sps:$4 sm:$0xff]  }
0x140a   :  { %5133 = vmatpush1.bf16.msra.mxu0 %v8034_v2 }
0x140b   :  { %v4983_v42 = vpack.c.bf16 %v4982_v30, %v4982_v30  ;;  %5134 = vmatprep.subr.bf16.mxu0 %v8039_v27 }
0x140d   :  { %7478 = vmatmul.mubr.bf16.vlgmr.msra.gmra.mrb[108].mxu1 %v4983_v42 }
0x140e   :  { %7009 = vmatpush3.bf16.msra.mxu1 %v9846_v11  ;;  %5223 = vmatprep.mubr.bf16.mxu1 %v5190_v62 }
0x140f   :  { %7010 = vmatprep.subr.bf16.mxu1 %v9849_v45  ;;  %5135 = vmatpush1.bf16.msra.mxu0 %v8037_v19 }
0x1410   :  { %5136 = vmatprep.subr.bf16.mxu0 %v8042_v32  ;;  %v8064_v32 = vld [vmem:[#allocation13 + $0x9f0] ss:$8 sps:$4 sm:$0xff]  }
0x1412   :  { %7011 = vmatpush3.bf16.msra.mxu1 %v9852_v54 }
0x1413   :  { %7012 = vmatprep.subr.bf16.mxu1 %v9855_v37  ;;  %5137 = vmatpush1.bf16.msra.mxu0 %v8040_v33 }
0x1414   :  { %7481 = vmatprep.subr.bf16.mxu0 %v8534_v60 }
0x1416   :  { %7013 = vmatpush3.bf16.msra.mxu1 %v9858_v39 }
0x1417   :  { %7014 = vmatprep.subr.bf16.mxu1 %v9861_v9 }
0x141a   :  { %7015 = vmatpush3.bf16.msra.mxu1 %v9864_v38 }
0x141b   :  { %7016 = vmatprep.subr.bf16.mxu1 %v9869_v52 }
0x141e   :  { %7017 = vmatpush3.bf16.msra.mxu1 %v9872_v17 }
0x141f   :  { %7018 = vmatprep.subr.bf16.mxu1 %v9875_v22 }
0x1422   :  { %7019 = vmatpush3.bf16.msra.mxu1 %v9878_v48 }
0x1423   :  { %7020 = vmatprep.subr.bf16.mxu1 %v9882_v26 }
0x1426   :  { %7021 = vmatpush3.bf16.msra.mxu1 %v9885_v5 }
0x1427   :  { %7022 = vmatprep.subr.bf16.mxu1 %v9996_v1 }
0x142a   :  { %7023 = vmatpush3.bf16.msra.mxu1 %v9999_v44 }
0x142d   :  { %5224 = vmatmul.mubr.bf16.vlgmr.msra.gmra.mrb[112].mxu1 %v5189_v59 }
0x142e   :  { %5403 = vmatprep.mubr.bf16.mxu1 %v8533_v0 }
0x14bb   :  { %v4907_v16 = vpop.f32.mrb[104].mxu1 }
0x14bc   :  { %v10066_v30 = vadd.f32 %v4907_v16, %v10005_v36  ;;  %v4909_v42 = vpop.f32.mrb[105].mxu1  ;;  %v5428_v36 = vpop.permute.xlu1 %5427 }
0x14bd   :  { %v10069_v62 = vadd.f32 %v4909_v42, %v10008_v29  ;;  %v4911_v35 = vpop.f32.mrb[106].mxu1  ;;  %v5421_v29 = vpop.permute.xlu0 %5420  ;;  %v5431_v21 = vmul.f32 %v5428_v36, %v8945_v14 }
0x14be   :  { %v4912_v28 = vpop.f32.mrb[107].mxu1  ;;  %v5424_v53 = vmul.f32 %v5421_v29, %v8939_v12 }
0x14c0   :  { %v5433_v58 = vadd.f32 %v5431_v21, %v5424_v53  ;;  %v8067_v21 = vld [vmem:[#allocation13 + $0xa00] ss:$8 sps:$4 sm:$0xff]   ;;  %v8072_v53 = vld [vmem:[#allocation13 + $0xa14] ss:$8 sps:$4 sm:$0xff]  }
0x14c2   :  { %v5435_v63 = vadd.f32 %v5433_v58, %v8957_v25  ;;  %v5430_v25 = vmul.f32 %v5428_v36, %v8942_v13  ;;  %v8043_v13 = vld [vmem:[#allocation13 + $0x980] ss:$8 sps:$4 sm:$0xff]   ;;  %v8075_v58 = vld [vmem:[#allocation13 + $0xa24] ss:$8 sps:$4 sm:$0xff]  }
0x14c4   :  { %v5437_v20 = vmax.f32 %v5435_v63, 0.0  ;;  %v8078_v63 = vld [vmem:[#allocation13 + $0xa34] ss:$8 sps:$4 sm:$0xff]  }
0x14c6   :  { %v5439_v19 = vpack.c.bf16 %v5437_v20, %v5437_v20  ;;  %v8090_v20 = vld [vmem:[#allocation13 + $0xa74] ss:$8 sps:$4 sm:$0xff]  }
0x14e0   :  { %v5018_v15 = vpop.f32.mrb[108].mxu1 }
0x14e1   :  { %v5019_v41 = vadd.f32 %v9953_v61, %v5018_v15  ;;  %v7479_v55 = vpop.f32.mrb[109].mxu1 }
0x14e2   :  { %v5021_v59 = vpop.f32.mrb[110].mxu1 }
0x14e3   :  { %v5024_v51 = vpack.c.bf16 %v5019_v41, %v5019_v41  ;;  %v7480_v31 = vpop.f32.mrb[111].mxu1 }
0x14e5   :  { %5155 = vmatmul.mubr.bf16.vlgmr.msra.gmra.mrb[112].mxu0 %v5024_v51 }
0x14e6   :  { %7482 = vmatpush3.bf16.msra.mxu0 %v10011_v7  ;;  %7497 = vmatprep.mubr.msk.bf16.mxu0 %vm8535_vm0, %v8534_v60 }
0x14e7   :  { %7483 = vmatprep.subr.bf16.mxu0 %v8534_v60 }
0x14ea   :  { %7484 = vmatpush3.bf16.msra.mxu0 %v10017_v57 }
0x14eb   :  { %7485 = vmatprep.subr.bf16.mxu0 %v8534_v60 }
0x14ee   :  { %7486 = vmatpush3.bf16.msra.mxu0 %v10021_v4 }
0x14ef   :  { %7487 = vmatprep.subr.bf16.mxu0 %v8534_v60 }
0x14f2   :  { %7488 = vmatpush3.bf16.msra.mxu0 %v10025_v46 }
0x14f3   :  { %7489 = vmatprep.subr.bf16.mxu0 %v8534_v60 }
0x14f6   :  { %7490 = vmatpush3.bf16.msra.mxu0 %v10029_v34 }
0x14f7   :  { %7491 = vmatprep.subr.bf16.mxu0 %v8534_v60 }
0x14fa   :  { %7492 = vmatpush3.bf16.msra.mxu0 %v10035_v49 }
0x14fb   :  { %7493 = vmatprep.subr.bf16.mxu0 %v8534_v60 }
0x14fe   :  { %7494 = vmatpush3.bf16.msra.mxu0 %v9915_v23 }
0x14ff   :  { %7495 = vmatprep.subr.bf16.mxu0 %v8534_v60 }
0x1500   :  { %v7024_v43 = vpop.f32.mrb[112].mxu1 }
0x1501   :  { %v7025_v40 = vpop.f32.mrb[113].mxu1 }
0x1502   :  { %v7026_v50 = vadd.f32 %v7025_v40, %v7024_v43  ;;  %v7027_v56 = vpop.f32.mrb[114].mxu1  ;;  %7496 = vmatpush3.bf16.msra.mxu0 %v9920_v18  ;;  %v8073_v43 = vld [vmem:[#allocation13 + $0xa20] ss:$8 sps:$4 sm:$0xff]   ;;  %v8081_v40 = vld [vmem:[#allocation13 + $0xa44] ss:$8 sps:$4 sm:$0xff]  }
0x1503   :  { %v7028_v14 = vpop.f32.mrb[115].mxu1  ;;  %7039 = vmatprep.subr.bf16.mxu0 %v9976_v47  ;;  %v5423_v47 = vmul.f32 %v5421_v29, %v8936_v10  ;;  %v8082_v56 = vld [vmem:[#allocation13 + $0xa50] ss:$8 sps:$4 sm:$0xff]  }
0x1504   :  { %v5226_v12 = vadd.f32 %v9924_v3, %v7026_v50  ;;  %v8084_v50 = vld [vmem:[#allocation13 + $0xa54] ss:$8 sps:$4 sm:$0xff]   ;;  %v8087_v14 = vld [vmem:[#allocation13 + $0xa64] ss:$8 sps:$4 sm:$0xff]  }
0x1506   :  { %v5231_v2 = vmax.f32 %v5226_v12, 0.0  ;;  %v8085_v12 = vld [vmem:[#allocation13 + $0xa60] ss:$8 sps:$4 sm:$0xff]  }
0x1508   :  { %v5232_v27 = vpack.c.bf16 %v5231_v2, %v5231_v2  ;;  %v8088_v2 = vld [vmem:[#allocation13 + $0xa70] ss:$8 sps:$4 sm:$0xff]  }
0x150a   :  { %7498 = vmatmul.mubr.bf16.vlgmr.msra.gmra.mrb[116].mxu0 %v5232_v27  ;;  %v8091_v27 = vld [vmem:[#allocation16 + $0x40] sm:$0xff]  }
0x150b   :  { %7040 = vmatpush3.bf16.msra.mxu0 %v9846_v11  ;;  %5472 = vmatprep.mubr.bf16.mxu0 %v5439_v19  ;;  %v5432_v11 = vadd.f32 %v5430_v25, %v5423_v47  ;;  %v8092_v19 = vld [vmem:[#allocation16] sm:$0xff]   ;;  %v8093_v25 = vld [vmem:[#allocation16 + $0x48] sm:$0xff]  }
0x150c   :  { %7041 = vmatprep.subr.bf16.mxu0 %v9849_v45  ;;  %v8094_v47 = vld [vmem:[#allocation16 + $0x8] sm:$0xff]  }
0x150d   :  { %v5434_v45 = vadd.f32 %v5432_v11, %v8954_v24  ;;  %v8051_v24 = vld [vmem:[#allocation13 + $0x9a4] ss:$8 sps:$4 sm:$0xff]   ;;  %v8095_v11 = vld [vmem:[#allocation16 + $0x50] sm:$0xff]  }
0x150f   :  { %7042 = vmatpush3.bf16.msra.mxu0 %v9852_v54  ;;  %v5436_v54 = vmax.f32 %v5434_v45, 0.0  ;;  %v8096_v45 = vld [vmem:[#allocation16 + $0x10] sm:$0xff]  }
0x1510   :  { %7043 = vmatprep.subr.bf16.mxu0 %v9855_v37  ;;  %v8045_v37 = vld [vmem:[#allocation13 + $0x984] ss:$8 sps:$4 sm:$0xff]  }
0x1511   :  { %v5438_v10 = vpack.c.bf16 %v5436_v54, %v5436_v54  ;;  %5371 = vmatprep.subr.bf16.mxu1 %v8045_v37  ;;  %v8097_v54 = vld [vmem:[#allocation16 + $0x58] sm:$0xff]   ;;  %v8100_v37 = vld [vmem:[#allocation16 + $0x20] sm:$0xff]  }
0x1512   :  { %5372 = vmatpush1.bf16.msra.mxu1 %v8043_v13  ;;  %v8099_v13 = vld [vmem:[#allocation16 + $0x60] sm:$0xff]  }
0x1513   :  { %7044 = vmatpush3.bf16.msra.mxu0 %v9858_v39  ;;  %v8048_v39 = vld [vmem:[#allocation13 + $0x994] ss:$8 sps:$4 sm:$0xff]  }
0x1514   :  { %7045 = vmatprep.subr.bf16.mxu0 %v9861_v9  ;;  %v8046_v9 = vld [vmem:[#allocation13 + $0x990] ss:$8 sps:$4 sm:$0xff]   ;;  %5373 = vmatprep.subr.bf16.mxu1 %v8048_v39 }
0x1515   :  { %v8101_v39 = vld [vmem:[#allocation16 + $0x68] sm:$0xff]  }
0x1516   :  { %5374 = vmatpush1.bf16.msra.mxu1 %v8046_v9 }
0x1517   :  { %7046 = vmatpush3.bf16.msra.mxu0 %v9864_v38  ;;  %v8049_v38 = vld [vmem:[#allocation13 + $0x9a0] ss:$8 sps:$4 sm:$0xff]   ;;  %5375 = vmatprep.subr.bf16.mxu1 %v8051_v24 }
0x1518   :  { %7047 = vmatprep.subr.bf16.mxu0 %v9869_v52  ;;  %v8054_v52 = vld [vmem:[#allocation13 + $0x9b4] ss:$8 sps:$4 sm:$0xff]  }
0x151a   :  { %5376 = vmatpush1.bf16.msra.mxu1 %v8049_v38 }
0x151b   :  { %7048 = vmatpush3.bf16.msra.mxu0 %v9872_v17  ;;  %v8052_v17 = vld [vmem:[#allocation13 + $0x9b0] ss:$8 sps:$4 sm:$0xff]   ;;  %5377 = vmatprep.subr.bf16.mxu1 %v8054_v52 }
0x151c   :  { %7049 = vmatprep.subr.bf16.mxu0 %v9875_v22  ;;  %v8057_v22 = vld [vmem:[#allocation13 + $0x9c4] ss:$8 sps:$4 sm:$0xff]  }
0x151e   :  { %5378 = vmatpush1.bf16.msra.mxu1 %v8052_v17 }
0x151f   :  { %7050 = vmatpush3.bf16.msra.mxu0 %v9878_v48  ;;  %v8055_v48 = vld [vmem:[#allocation13 + $0x9c0] ss:$8 sps:$4 sm:$0xff]   ;;  %5379 = vmatprep.subr.bf16.mxu1 %v8057_v22 }
0x1520   :  { %7051 = vmatprep.subr.bf16.mxu0 %v9882_v26  ;;  %v8058_v26 = vld [vmem:[#allocation13 + $0x9d0] ss:$8 sps:$4 sm:$0xff]  }
0x1522   :  { %5380 = vmatpush1.bf16.msra.mxu1 %v8055_v48 }
0x1523   :  { %7052 = vmatpush3.bf16.msra.mxu0 %v9885_v5  ;;  %v8063_v5 = vld [vmem:[#allocation13 + $0x9e4] ss:$8 sps:$4 sm:$0xff]  }
0x1524   :  { %7053 = vmatprep.subr.bf16.mxu0 %v9996_v1  ;;  %v8061_v1 = vld [vmem:[#allocation13 + $0x9e0] ss:$8 sps:$4 sm:$0xff]  }
0x1527   :  { %7054 = vmatpush3.bf16.msra.mxu0 %v9999_v44  ;;  %v8066_v44 = vld [vmem:[#allocation13 + $0x9f4] ss:$8 sps:$4 sm:$0xff]  }
0x152a   :  { %5473 = vmatmul.mubr.bf16.vlgmr.msra.gmra.mrb[120].mxu0 %v5438_v10  ;;  %v8098_v10 = vld [vmem:[#allocation16 + $0x18] sm:$0xff]  }
0x152b   :  { %5652 = vmatprep.mubr.bf16.mxu0 %v8533_v0  ;;  %v8060_v0 = vld [vmem:[#allocation13 + $0x9d4] ss:$8 sps:$4 sm:$0xff]  }
0x152c   :  { %5381 = vmatprep.subr.bf16.mxu1 %v8060_v0 }
0x152d   :  { %5382 = vmatpush1.bf16.msra.mxu1 %v8058_v26 }
0x152e   :  { %5383 = vmatprep.subr.bf16.mxu1 %v8063_v5 }
0x1531   :  { %5384 = vmatpush1.bf16.msra.mxu1 %v8061_v1 }
0x1532   :  { %5385 = vmatprep.subr.bf16.mxu1 %v8066_v44 }
0x1535   :  { %5386 = vmatpush1.bf16.msra.mxu1 %v8064_v32  ;;  %v8102_v32 = vld [vmem:[#allocation16 + $0x28] sm:$0xff]  }
0x1536   :  { %7501 = vmatprep.subr.bf16.mxu1 %v8534_v60 }
0x15b8   :  { %v5156_v33 = vpop.f32.mrb[112].mxu0 }
0x15b9   :  { %v10115_v16 = vadd.f32 %v5156_v33, %v10066_v30  ;;  %v5158_v42 = vpop.f32.mrb[113].mxu0  ;;  %v8103_v33 = vld [vmem:[#allocation16 + $0x70] sm:$0xff]  }
0x15ba   :  { %v10118_v35 = vadd.f32 %v5158_v42, %v10069_v62  ;;  %v5160_v28 = vpop.f32.mrb[114].mxu0  ;;  %v8105_v42 = vld [vmem:[#allocation16 + $0x78] sm:$0xff]  }
0x15bb   :  { %v5161_v15 = vpop.f32.mrb[115].mxu0  ;;  %v8107_v28 = vld [vmem:[#allocation19] sm:$0xff]  }
0x15bc   :  { %v8109_v15 = vld [vmem:[#allocation19 + $0x10] sm:$0xff]  }
0x15dd   :  { %v5267_v41 = vpop.f32.mrb[116].mxu0 }
0x15de   :  { %v5268_v55 = vadd.f32 %v9953_v61, %v5267_v41  ;;  %v7499_v59 = vpop.f32.mrb[117].mxu0  ;;  %v8110_v41 = vld [vmem:[#allocation19 + $0x18] sm:$0xff]  }
0x15df   :  { %v5270_v51 = vpop.f32.mrb[118].mxu0  ;;  %v8112_v59 = vld [vmem:[#allocation19 + $0x28] sm:$0xff]  }
0x15e0   :  { %v5273_v31 = vpack.c.bf16 %v5268_v55, %v5268_v55  ;;  %v7500_v36 = vpop.f32.mrb[119].mxu0  ;;  %v8111_v55 = vld [vmem:[#allocation19 + $0x20] sm:$0xff]   ;;  %v5663_v51 = vld [vmem:[#allocation14] sm:$0x3] }
0x15e2   :  { %5404 = vmatmul.mubr.bf16.vlgmr.msra.gmra.mrb[116].mxu1 %v5273_v31  ;;  %v5668_v31 = vrot.slane %v5663_v51, %v8931_v6  ;;  %v8114_v6 = vld [vmem:[#allocation19 + $0x38] sm:$0xff]  }
0x15e3   :  { %7502 = vmatpush3.bf16.msra.mxu1 %v10011_v7  ;;  %7517 = vmatprep.mubr.msk.bf16.mxu1 %vm8535_vm0, %v8534_v60 }
0x15e4   :  { %7503 = vmatprep.subr.bf16.mxu1 %v8534_v60 }
0x15e7   :  { %7504 = vmatpush3.bf16.msra.mxu1 %v10017_v57 }
0x15e8   :  { %7505 = vmatprep.subr.bf16.mxu1 %v8534_v60 }
0x15eb   :  { %7506 = vmatpush3.bf16.msra.mxu1 %v10021_v4 }
0x15ec   :  { %7507 = vmatprep.subr.bf16.mxu1 %v8534_v60 }
0x15ef   :  { %7508 = vmatpush3.bf16.msra.mxu1 %v10025_v46 }
0x15f0   :  { %7509 = vmatprep.subr.bf16.mxu1 %v8534_v60 }
0x15f3   :  { %7510 = vmatpush3.bf16.msra.mxu1 %v10029_v34 }
0x15f4   :  { %7511 = vmatprep.subr.bf16.mxu1 %v8534_v60 }
0x15f7   :  { %7512 = vmatpush3.bf16.msra.mxu1 %v10035_v49  ;;  %v8069_v49 = vld [vmem:[#allocation13 + $0xa04] ss:$8 sps:$4 sm:$0xff]  }
0x15f8   :  { %7513 = vmatprep.subr.bf16.mxu1 %v8534_v60  ;;  %5620 = vmatprep.subr.bf16.mxu0 %v8069_v49 }
0x15f9   :  { %5621 = vmatpush1.bf16.msra.mxu0 %v8067_v21 }
0x15fa   :  { %5622 = vmatprep.subr.bf16.mxu0 %v8072_v53 }
0x15fb   :  { %7514 = vmatpush3.bf16.msra.mxu1 %v9915_v23  ;;  %v8070_v23 = vld [vmem:[#allocation13 + $0xa10] ss:$8 sps:$4 sm:$0xff]  }
0x15fc   :  { %7515 = vmatprep.subr.bf16.mxu1 %v8534_v60 }
0x15fd   :  { %v7055_v7 = vpop.f32.mrb[120].mxu0  ;;  %5623 = vmatpush1.bf16.msra.mxu0 %v8070_v23 }
0x15fe   :  { %v7056_v57 = vpop.f32.mrb[121].mxu0  ;;  %5624 = vmatprep.subr.bf16.mxu0 %v8075_v58  ;;  %v8113_v58 = vld [vmem:[#allocation19 + $0x30] sm:$0xff]  }
0x15ff   :  { %v7057_v4 = vadd.f32 %v7056_v57, %v7055_v7  ;;  %v7058_v30 = vpop.f32.mrb[122].mxu0  ;;  %7516 = vmatpush3.bf16.msra.mxu1 %v9920_v18  ;;  %v8076_v18 = vld [vmem:[#allocation13 + $0xa30] ss:$8 sps:$4 sm:$0xff]   ;;  %v5672_v7 = vrot.slane %v5663_v51, %v8933_v8 }
0x1600   :  { %v7059_v46 = vpop.f32.mrb[123].mxu0  ;;  %7070 = vmatprep.subr.bf16.mxu1 %v8091_v27 }
0x1601   :  { %v5475_v62 = vadd.f32 %v9924_v3, %v7057_v4  ;;  %5625 = vmatpush1.bf16.msra.mxu0 %v8073_v43  ;;  %v8079_v3 = vld [vmem:[#allocation13 + $0xa40] ss:$8 sps:$4 sm:$0xff]  }
0x1602   :  { %5626 = vmatprep.subr.bf16.mxu0 %v8078_v63  ;;  %v6393_v43 = vld [vmem:[#allocation17] ss:$0 sm:$0xff] }
0x1603   :  { %v5480_v34 = vmax.f32 %v5475_v62, 0.0 }
0x1605   :  { %v5481_v29 = vpack.c.bf16 %v5480_v34, %v5480_v34  ;;  %5627 = vmatpush1.bf16.msra.mxu0 %v8076_v18 }
0x1606   :  { %5628 = vmatprep.subr.bf16.mxu0 %v8081_v40 }
0x1607   :  { %7518 = vmatmul.mubr.bf16.vlgmr.msra.gmra.mrb[120].mxu1 %v5481_v29 }
0x1608   :  { %7071 = vmatpush3.bf16.msra.mxu1 %v8092_v19 }
0x1609   :  { %5629 = vmatpush1.bf16.msra.mxu0 %v8079_v3  ;;  %7072 = vmatprep.subr.bf16.mxu1 %v8093_v25 }
0x160a   :  { %5630 = vmatprep.subr.bf16.mxu0 %v8084_v50 }
0x160c   :  { %7073 = vmatpush3.bf16.msra.mxu1 %v8094_v47 }
0x160d   :  { %5631 = vmatpush1.bf16.msra.mxu0 %v8082_v56  ;;  %7074 = vmatprep.subr.bf16.mxu1 %v8095_v11 }
0x160e   :  { %5632 = vmatprep.subr.bf16.mxu0 %v8087_v14 }
0x1610   :  { %7075 = vmatpush3.bf16.msra.mxu1 %v8096_v45 }
0x1611   :  { %5633 = vmatpush1.bf16.msra.mxu0 %v8085_v12  ;;  %7076 = vmatprep.subr.bf16.mxu1 %v8097_v54  ;;  %v6410_v12 = vld [vmem:[#allocation20] ss:$0 sm:$0xff] }
0x1612   :  { %5634 = vmatprep.subr.bf16.mxu0 %v8090_v20 }
0x1614   :  { %7077 = vmatpush3.bf16.msra.mxu1 %v8098_v10 }
0x1615   :  { %5635 = vmatpush1.bf16.msra.mxu0 %v8088_v2  ;;  %7078 = vmatprep.subr.bf16.mxu1 %v8099_v13 }
0x1616   :  { %7521 = vmatprep.subr.bf16.mxu0 %v8534_v60 }
0x1618   :  { %7079 = vmatpush3.bf16.msra.mxu1 %v8100_v37 }
0x1619   :  { %7080 = vmatprep.subr.bf16.mxu1 %v8101_v39 }
0x161c   :  { %7081 = vmatpush3.bf16.msra.mxu1 %v8102_v32 }
0x161d   :  { %7082 = vmatprep.subr.bf16.mxu1 %v8103_v33 }
0x16b5   :  { %v5405_v9 = vpop.f32.mrb[116].mxu1 }
0x16b6   :  { %v5412_v24 = vadd.f32 %v5405_v9, %v10115_v16  ;;  %v5407_v38 = vpop.f32.mrb[117].mxu1  ;;  %v8104_v16 = vld [vmem:[#allocation16 + $0x30] sm:$0xff]  }
0x16b7   :  { %v5413_v52 = vadd.f32 %v5407_v38, %v10118_v35  ;;  %v5409_v17 = vpop.f32.mrb[118].mxu1  ;;  %7083 = vmatpush3.bf16.msra.mxu1 %v8104_v16  ;;  %v8106_v35 = vld [vmem:[#allocation16 + $0x38] sm:$0xff]  }
0x16b8   :  { %v5410_v22 = vpop.f32.mrb[119].mxu1  ;;  %7084 = vmatprep.subr.bf16.mxu1 %v8105_v42 }
0x16bb   :  { %7085 = vmatpush3.bf16.msra.mxu1 %v8106_v35 }
0x16da   :  { %v5516_v48 = vpop.f32.mrb[120].mxu1 }
0x16db   :  { %v5517_v0 = vadd.f32 %v9953_v61, %v5516_v48  ;;  %v7519_v26 = vpop.f32.mrb[121].mxu1  ;;  %v8108_v61 = vld [vmem:[#allocation19 + $0x8] sm:$0xff]  }
0x16dc   :  { %v5519_v5 = vpop.f32.mrb[122].mxu1 }
0x16dd   :  { %v5522_v1 = vpack.c.bf16 %v5517_v0, %v5517_v0  ;;  %v7520_v44 = vpop.f32.mrb[123].mxu1 }
0x16df   :  { %5653 = vmatmul.mubr.bf16.vlgmr.msra.gmra.mrb[124].mxu0 %v5522_v1 }
0x16e0   :  { %7537 = vmatprep.mubr.msk.bf16.mxu0 %vm8535_vm0, %v8534_v60  ;;  %7522 = vmatpush3.bf16.msra.mxu0 %v8107_v28 }
0x16e1   :  { %7523 = vmatprep.subr.bf16.mxu0 %v8534_v60 }
0x16e4   :  { %7524 = vmatpush3.bf16.msra.mxu0 %v8108_v61 }
0x16e5   :  { %7525 = vmatprep.subr.bf16.mxu0 %v8534_v60 }
0x16e8   :  { %7526 = vmatpush3.bf16.msra.mxu0 %v8109_v15 }
0x16e9   :  { %7527 = vmatprep.subr.bf16.mxu0 %v8534_v60 }
0x16ec   :  { %7528 = vmatpush3.bf16.msra.mxu0 %v8110_v41 }
0x16ed   :  { %7529 = vmatprep.subr.bf16.mxu0 %v8534_v60 }
0x16f0   :  { %7530 = vmatpush3.bf16.msra.mxu0 %v8111_v55 }
0x16f1   :  { %7531 = vmatprep.subr.bf16.mxu0 %v8534_v60 }
0x16f4   :  { %7532 = vmatpush3.bf16.msra.mxu0 %v8112_v59 }
0x16f5   :  { %7533 = vmatprep.subr.bf16.mxu0 %v8534_v60 }
0x16f8   :  { %7534 = vmatpush3.bf16.msra.mxu0 %v8113_v58 }
0x16f9   :  { %7535 = vmatprep.subr.bf16.mxu0 %v8534_v60 }
0x16fc   :  { %7536 = vmatpush3.bf16.msra.mxu0 %v8114_v6 }
0x17b2   :  { %v5654_v36 = vpop.f32.mrb[124].mxu0 }
0x17b3   :  { %v5661_v57 = vadd.f32 %v5654_v36, %v5412_v24  ;;  %v5656_v4 = vpop.f32.mrb[125].mxu0 }
0x17b4   :  { %v5662_v30 = vadd.f32 %v5656_v4, %v5413_v52  ;;  %v5658_v46 = vpop.f32.mrb[126].mxu0 }
0x17b5   :  { %v5675_v62 = vadd.f32 %v5668_v31, %v5661_v57  ;;  %v5659_v34 = vpop.f32.mrb[127].mxu0 }
0x17b6   :  { %v5676_v29 = vadd.f32 %v5672_v7, %v5662_v30 }
0x17b7   :  { %v5677_v21 = vmax.f32 %v5675_v62, 0.0 }
0x17b8   :  { %v5678_v49 = vmax.f32 %v5676_v29, 0.0 }
0x17b9   :  { %v5679_v23 = vpack.c.bf16 %v5677_v21, %v5677_v21 }
0x17ba   :  { %v5680_v53 = vpack.c.bf16 %v5678_v49, %v5678_v49 }
0x17bc   :  { %5848 = vmatprep.mubr.bf16.mxu1 %v5680_v53 }
0x17bd   :  { %5849 = vmatmul.mubr.bf16.vlgmr.msra.gmra.mrb[124].mxu1 %v5679_v23 }
0x1890   :  { %v7086_v8 = vpop.f32.mrb[124].mxu1 }
0x1891   :  { %v7087_v63 = vpop.f32.mrb[125].mxu1 }
0x1892   :  { %v7088_v18 = vadd.f32 %v7087_v63, %v7086_v8  ;;  %v7089_v40 = vpop.f32.mrb[126].mxu1 }
0x1893   :  { %v7090_v3 = vpop.f32.mrb[127].mxu1 }
0x1894   :  { %v5851_v50 = vadd.f32 %v7088_v18, %v6393_v43 }
0x1896   :  { %v5856_v56 = vmax.f32 %v5851_v50, 0.0 }
0x1898   :  { %v5857_v14 = vpack.c.bf16 %v5856_v56, %v5856_v56 }
0x189a   :  { %7538 = vmatmul.mubr.bf16.vlgmr.msra.gmra.mrb[128].mxu0 %v5857_v14 }
0x196d   :  { %v5963_v20 = vpop.f32.mrb[128].mxu0 }
0x196e   :  { %v5964_v2 = vadd.f32 %v6410_v12, %v5963_v20  ;;  %v7539_v27 = vpop.f32.mrb[129].mxu0 }
0x196f   :  { %v5966_v60 = vpop.f32.mrb[130].mxu0 }
0x1970   :  { %5969 = vst [vmem:[#allocation22] sm:$0xff] %v5964_v2  ;;  %v7540_v19 = vpop.f32.mrb[131].mxu0 }
0x1971   :  { %8490 = shalt.err (!%p8487_p2)
}
0x1972   :  { %s8491_s29 = scalar_lea.hbm %s10180_s14, 128 }
0x1973   :  { %p8492_p3 = scmp.ne.s32.totalorder %s10180_s14, %s8491_s29  ;;  %p8495_p4 = scmp.lt.u32.totalorder %s8491_s29, %s10180_s14 }
0x1975   :  { %p8497_p5 = pnand %p8495_p4, %p8492_p3 }
0x1977   :  { %8500 = shalt.err (!%p8497_p5)
}
0x1978   :  { %5979 = dma.vmem_to_hbm [thread:$0]  %s5977_s1, 128, %s10180_s14, [#allocation4]  }
0x1979   :  { %8515 = dma.done.wait [#allocation4], 128  }
0x197a   :  { %8516 = vsyncadd [#allocation4], 4294967168 }
0x197b   :  { %5983 = vsyncpa [#allocation3], 1 }
0x197c   :  { %5984 = vsyncpa [#allocation6], 1 }
0x197d   :  { %5985 = vsyncpa [#allocation9], 1 }
0x197e   :  { %5986 = vsyncpa [#allocation12], 1 }
0x197f   :  { %5987 = vsyncpa [#allocation15], 1 }
0x1980   :  { %5988 = vsyncpa [#allocation18], 1 }
0x1981   :  { %5989 = vsyncpa [#allocation21], 1 }
0x1982   :  { %5990 = vsyncpa [#allocation4], 1 }

</bundles_post_ra>
